<compile_context>
chip_gen: v6e
topology: v6e:2x2x1
jax: 0.10.0
libtpu: 0.0.40
codegen_flags: <defaults>
</compile_context>

<pallas_src>
import functools
import math
import numpy as np
import jax
import jax.numpy as jnp
from jax.experimental import pallas as pl
from jax.experimental.pallas import tpu as pltpu


def _osg_decoder_kernel(feat_ref, w1_ref, b1_ref, w23_ref, b23_ref, out_ref, *, d_out):
    # feat_ref : (P, R, L)        bf16/f32, R = tile_m/k token-rows, L = k*C lanes
    # w1_ref   : (L, k*H)         f32, block-diag kron(I_k, W1/P)  (plane mean folded)
    # b1_ref   : (1, k*H)         f32, b1 tiled k times
    # w23_ref  : (k*H, k*(D+1))   f32, block-diag of fused [color || density] head
    # b23_ref  : (1, k*(D+1))     f32
    # out_ref  : (R, k*(D+1))     f32; within each token's (D+1) lane group,
    #                             lanes [0, D) = rgb, lane D = sigma
    P = feat_ref.shape[0]

    # Plane reduction: plain f32 sum of the P slabs (the 1/P lives in w1).
    x = feat_ref[0].astype(jnp.float32)
    for p in range(1, P):
        x = x + feat_ref[p].astype(jnp.float32)

    # Shared FC -> hidden (MXU, k tokens per push), softplus (EUP slot).
    h = jnp.dot(x, w1_ref[...], preferred_element_type=jnp.float32) + b1_ref[...]
    h = jax.nn.softplus(h)

    # Fused color + density head: one MXU push stream, one output DMA stream.
    z = jnp.dot(h, w23_ref[...], preferred_element_type=jnp.float32) + b23_ref[...]
    rgb = jax.nn.sigmoid(z) * (1.0 + 2.0 * 0.001) - 0.001
    lane = jax.lax.broadcasted_iota(jnp.int32, z.shape, 1)
    is_rgb = (lane % (d_out + 1)) < d_out
    out_ref[...] = jnp.where(is_rgb, rgb, z).astype(out_ref.dtype)


def osg_decoder_forward(sampled_features, ray_directions, params, *, tile_m=8192):
    """sampled_features: (N, P, M, C), f32 or bf16 (bf16 recommended).
    ray_directions is unused (as in the reference forward).
    Returns dict with rgb (N, M, D) and sigma (N, M, 1), both f32."""
    del ray_directions  # unused by the reference forward pass
    N, P, M, C = sampled_features.shape
    H = params["w1"].shape[1]
    D = params["w2"].shape[1]

    # Token-packing factor: pack k consecutive tokens along the lane axis so the
    # feature stream is lane-dense (k*C == 128) and each MXU push carries k tokens.
    k = 128 // C if (C <= 128 and 128 % C == 0 and M % (128 // C) == 0) else 1
    L = k * C

    tile_m = min(tile_m, M)
    assert M % tile_m == 0, "M must be a multiple of the token tile"
    assert tile_m % (8 * k) == 0, "token tile must keep 8-sublane alignment after packing"
    R = tile_m // k  # packed token-rows per tile

    # Tiny parameter prep (negligible vs the feature stream):
    #   fold 1/P into W1, fuse the two heads column-wise, build k-block-diagonals.
    eye_k = jnp.eye(k, dtype=jnp.float32)
    w1s = (params["w1"].astype(jnp.float32) * (1.0 / P))
    w1_bd = jnp.kron(eye_k, w1s)                                           # (k*C, k*H)
    b1_bd = jnp.tile(params["b1"].astype(jnp.float32).reshape(1, H), (1, k))
    w23 = jnp.concatenate([params["w2"], params["w3"]], axis=1).astype(jnp.float32)
    b23 = jnp.concatenate([params["b2"], params["b3"]]).astype(jnp.float32).reshape(1, D + 1)
    w23_bd = jnp.kron(eye_k, w23)                                          # (k*H, k*(D+1))
    b23_bd = jnp.tile(b23, (1, k))

    # Free trailing-dim reshape (no data movement): tokens packed along lanes.
    feat = sampled_features.reshape(N, P, M // k, L)

    grid = (N, M // tile_m)
    kernel = functools.partial(_osg_decoder_kernel, d_out=D)
    fused = pl.pallas_call(
        kernel,
        out_shape=jax.ShapeDtypeStruct((N, M // k, k * (D + 1)), jnp.float32),
        grid_spec=pltpu.PrefetchScalarGridSpec(
            num_scalar_prefetch=0,
            grid=grid,
            in_specs=[
                # Batch dim squeezed out; tile the packed layout directly.
                pl.BlockSpec((None, P, R, L), lambda n, m: (n, 0, m, 0)),
                pl.BlockSpec((L, k * H), lambda n, m: (0, 0)),
                pl.BlockSpec((1, k * H), lambda n, m: (0, 0)),
                pl.BlockSpec((k * H, k * (D + 1)), lambda n, m: (0, 0)),
                pl.BlockSpec((1, k * (D + 1)), lambda n, m: (0, 0)),
            ],
            out_specs=pl.BlockSpec((None, R, k * (D + 1)), lambda n, m: (n, m, 0)),
        ),
        compiler_params=pltpu.CompilerParams(
            dimension_semantics=("parallel", "parallel"),
            vmem_limit_bytes=32 * 1024 * 1024),
    )(feat, w1_bd, b1_bd, w23_bd, b23_bd)

    # Free trailing-dim unpack, then tiny slices for the two heads.
    fused = fused.reshape(N, M, D + 1)
    return {"rgb": fused[..., :D], "sigma": fused[..., D:]}


def init_params(key, n_features, hidden_dim, out_dim, lr_mul=1.0):
    """Deterministic init mimicking FullyConnectedLayer: weight ~ N(0,1)/lr_mul,
    bias = 0; the runtime gains (lr_mul/sqrt(fan_in) for weight, lr_mul for bias)
    are folded into the stored parameters (parameter-setup glue)."""
    k1, k2, k3 = jax.random.split(key, 3)

    def fc(k, fan_in, fan_out):
        w = jax.random.normal(k, (fan_out, fan_in), jnp.float32) / lr_mul
        b = jnp.zeros((fan_out,), jnp.float32)
        w_eff = (w * (lr_mul / math.sqrt(fan_in))).T    # (in, out), pre-transposed
        b_eff = b * lr_mul
        return w_eff, b_eff

    w1, b1 = fc(k1, n_features, hidden_dim)
    w2, b2 = fc(k2, hidden_dim, out_dim)
    w3, b3 = fc(k3, hidden_dim, 1)
    return {"w1": w1, "b1": b1, "w2": w2, "b2": b2, "w3": w3, "b3": b3}


def _reference_forward(sampled_features, params):
    # Pure-JAX reference mirroring the PyTorch module (f32 end-to-end).
    x = sampled_features.astype(jnp.float32).mean(axis=1)   # (N, M, C)
    N, M, C = x.shape
    x = x.reshape(N * M, C)
    h = jax.nn.softplus(x @ params["w1"] + params["b1"])
    rgb = jax.nn.sigmoid(h @ params["w2"] + params["b2"]) * (1 + 2 * 0.001) - 0.001
    sigma = h @ params["w3"] + params["b3"]
    D = params["w2"].shape[1]
    return {"rgb": rgb.reshape(N, M, D), "sigma": sigma.reshape(N, M, 1)}


if __name__ == "__main__":
    key = jax.random.PRNGKey(0)
    k_feat, k_dir, k_par = jax.random.split(key, 3)

    # Small shapes consistent with the module:
    N, P, M, C = 2, 3, 1024, 32       # batch, triplanes, rays*samples, n_features
    HIDDEN = 64                       # self.hidden_dim
    OUT_DIM = 3                       # options['decoder_output_dim']
    LR_MUL = 1.0                      # options['decoder_lr_mul']

    # Features stored/fed in bf16 upstream (halves the dominant HBM read stream).
    sampled_features = jax.random.normal(
        k_feat, (N, P, M, C), jnp.float32).astype(jnp.bfloat16)
    ray_directions = jax.random.normal(k_dir, (N, M, 3), jnp.float32)
    params = init_params(k_par, C, HIDDEN, OUT_DIM, LR_MUL)

    out = osg_decoder_forward(sampled_features, ray_directions, params, tile_m=8192)
    jax.block_until_ready(out)

    # Reference uses the same bf16-rounded features promoted to f32, so the check
    # isolates kernel correctness (mean-fold, block-diag packing, fused heads,
    # lane masks) from the input dtype choice.
    ref = _reference_forward(sampled_features, params)
    np.testing.assert_allclose(np.asarray(out["rgb"]), np.asarray(ref["rgb"]),
                               rtol=1e-4, atol=1e-4)
    np.testing.assert_allclose(np.asarray(out["sigma"]), np.asarray(ref["sigma"]),
                               rtol=1e-4, atol=1e-4)

    print("KERNEL_OK")
</pallas_src>

<mosaic_0001>
module attributes {stable_mosaic.version = 11 : i64} {
  func.func @_osg_decoder_kernel(%arg0: i32, %arg1: i32, %arg2: memref<1x3x256x128xbf16, #tpu.memory_space<vmem>>, %arg3: memref<128x256xf32, #tpu.memory_space<vmem>>, %arg4: memref<1x256xf32, #tpu.memory_space<vmem>>, %arg5: memref<256x16xf32, #tpu.memory_space<vmem>>, %arg6: memref<1x16xf32, #tpu.memory_space<vmem>>, %arg7: memref<1x256x16xf32, #tpu.memory_space<vmem>>) attributes {dimension_semantics = [#tpu.dimension_semantics<parallel>, #tpu.dimension_semantics<parallel>], iteration_bounds = array<i64: 2, 1>, scalar_prefetch = 0 : i64, scratch_operands = 0 : i64, tpu.core_type = #tpu.core_type<tc>, window_params = [{transform_indices = @transform_0, window_bounds = array<i64: 1, 3, 256, 128>}, {pipeline_mode = #tpu.pipeline_mode<synchronous>, transform_indices = @transform_1, window_bounds = array<i64: 128, 256>}, {pipeline_mode = #tpu.pipeline_mode<synchronous>, transform_indices = @transform_2, window_bounds = array<i64: 1, 256>}, {pipeline_mode = #tpu.pipeline_mode<synchronous>, transform_indices = @transform_3, window_bounds = array<i64: 256, 16>}, {pipeline_mode = #tpu.pipeline_mode<synchronous>, transform_indices = @transform_4, window_bounds = array<i64: 1, 16>}, {transform_indices = @transform_5, window_bounds = array<i64: 1, 256, 16>}]} {
    %c0 = arith.constant 0 : index
    %c0_0 = arith.constant 0 : index
    %c0_1 = arith.constant 0 : index
    %c0_2 = arith.constant 0 : index
    %0 = vector.load %arg2[%c0, %c0_0, %c0_1, %c0_2] : memref<1x3x256x128xbf16, #tpu.memory_space<vmem>>, vector<1x1x256x128xbf16>
    %1 = vector.shape_cast %0 : vector<1x1x256x128xbf16> to vector<256x128xbf16>
    %2 = arith.extf %1 : vector<256x128xbf16> to vector<256x128xf32>
    %c0_3 = arith.constant 0 : index
    %c1 = arith.constant 1 : index
    %c0_4 = arith.constant 0 : index
    %c0_5 = arith.constant 0 : index
    %3 = vector.load %arg2[%c0_3, %c1, %c0_4, %c0_5] : memref<1x3x256x128xbf16, #tpu.memory_space<vmem>>, vector<1x1x256x128xbf16>
    %4 = vector.shape_cast %3 : vector<1x1x256x128xbf16> to vector<256x128xbf16>
    %5 = arith.extf %4 : vector<256x128xbf16> to vector<256x128xf32>
    %6 = arith.addf %2, %5 : vector<256x128xf32>
    %c0_6 = arith.constant 0 : index
    %c2 = arith.constant 2 : index
    %c0_7 = arith.constant 0 : index
    %c0_8 = arith.constant 0 : index
    %7 = vector.load %arg2[%c0_6, %c2, %c0_7, %c0_8] : memref<1x3x256x128xbf16, #tpu.memory_space<vmem>>, vector<1x1x256x128xbf16>
    %8 = vector.shape_cast %7 : vector<1x1x256x128xbf16> to vector<256x128xbf16>
    %9 = arith.extf %8 : vector<256x128xbf16> to vector<256x128xf32>
    %10 = arith.addf %6, %9 : vector<256x128xf32>
    %c0_9 = arith.constant 0 : index
    %c0_10 = arith.constant 0 : index
    %11 = vector.load %arg3[%c0_9, %c0_10] : memref<128x256xf32, #tpu.memory_space<vmem>>, vector<128x256xf32>
    %cst = arith.constant dense<0.000000e+00> : vector<256x256xf32>
    %12 = tpu.matmul %10, %11, %cst {dimension_numbers = #tpu.dot_dimension_numbers<[1], [0], [0], [1], [0, 0, 1, 1], [], []>} : vector<256x128xf32>, vector<128x256xf32>, vector<256x256xf32> -> vector<256x256xf32>
    %c0_11 = arith.constant 0 : index
    %c0_12 = arith.constant 0 : index
    %13 = vector.load %arg4[%c0_11, %c0_12] : memref<1x256xf32, #tpu.memory_space<vmem>>, vector<1x256xf32>
    %14 = vector.broadcast %13 : vector<1x256xf32> to vector<256x256xf32>
    %15 = arith.addf %12, %14 : vector<256x256xf32>
    %cst_13 = arith.constant 0.000000e+00 : f32
    %16 = vector.broadcast %cst_13 : f32 to vector<256x256xf32>
    %17 = arith.maximumf %15, %16 : vector<256x256xf32>
    %18 = vector.broadcast %cst_13 : f32 to vector<256x256xf32>
    %19 = arith.subf %15, %18 : vector<256x256xf32>
    %20 = arith.cmpf one, %19, %19 : vector<256x256xf32>
    %21 = vector.broadcast %cst_13 : f32 to vector<256x256xf32>
    %22 = arith.addf %15, %21 : vector<256x256xf32>
    %23 = math.absf %19 : vector<256x256xf32>
    %cst_14 = arith.constant 0.000000e+00 : f32
    %24 = vector.broadcast %cst_14 : f32 to vector<256x256xf32>
    %25 = arith.subf %24, %23 : vector<256x256xf32>
    %26 = math.exp %25 : vector<256x256xf32>
    %27 = math.log1p %26 : vector<256x256xf32>
    %28 = arith.addf %17, %27 : vector<256x256xf32>
    %29 = arith.select %20, %22, %28 : vector<256x256xi1>, vector<256x256xf32>
    %c0_15 = arith.constant 0 : index
    %c0_16 = arith.constant 0 : index
    %30 = vector.load %arg5[%c0_15, %c0_16] : memref<256x16xf32, #tpu.memory_space<vmem>>, vector<256x16xf32>
    %cst_17 = arith.constant dense<0.000000e+00> : vector<256x16xf32>
    %31 = tpu.matmul %29, %30, %cst_17 {dimension_numbers = #tpu.dot_dimension_numbers<[1], [0], [0], [1], [0, 0, 1, 1], [], []>} : vector<256x256xf32>, vector<256x16xf32>, vector<256x16xf32> -> vector<256x16xf32>
    %c0_18 = arith.constant 0 : index
    %c0_19 = arith.constant 0 : index
    %32 = vector.load %arg6[%c0_18, %c0_19] : memref<1x16xf32, #tpu.memory_space<vmem>>, vector<1x16xf32>
    %33 = vector.broadcast %32 : vector<1x16xf32> to vector<256x16xf32>
    %34 = arith.addf %31, %33 : vector<256x16xf32>
    %35 = arith.negf %34 : vector<256x16xf32>
    %36 = math.exp %35 : vector<256x16xf32>
    %cst_20 = arith.constant 1.000000e+00 : f32
    %37 = vector.broadcast %cst_20 : f32 to vector<256x16xf32>
    %38 = arith.addf %37, %36 : vector<256x16xf32>
    %39 = arith.divf %37, %38 : vector<256x16xf32>
    %cst_21 = arith.constant 1.002000e+00 : f32
    %40 = vector.broadcast %cst_21 : f32 to vector<256x16xf32>
    %41 = arith.mulf %39, %40 : vector<256x16xf32>
    %cst_22 = arith.constant 1.000000e-03 : f32
    %42 = vector.broadcast %cst_22 : f32 to vector<256x16xf32>
    %43 = arith.subf %41, %42 : vector<256x16xf32>
    %44 = tpu.iota {dimensions = array<i32: 1>} : vector<256x16xi32>
    %c4_i32 = arith.constant 4 : i32
    %c0_i32 = arith.constant 0 : i32
    %45 = arith.cmpi eq, %c4_i32, %c0_i32 : i32
    %c1_i32 = arith.constant 1 : i32
    %46 = arith.select %45, %c1_i32, %c4_i32 : i32
    %47 = vector.broadcast %46 : i32 to vector<256x16xi32>
    %48 = arith.remsi %44, %47 : vector<256x16xi32>
    %c0_i32_23 = arith.constant 0 : i32
    %49 = vector.broadcast %c0_i32_23 : i32 to vector<256x16xi32>
    %50 = arith.cmpi ne, %48, %49 : vector<256x16xi32>
    %c0_i32_24 = arith.constant 0 : i32
    %51 = vector.broadcast %c0_i32_24 : i32 to vector<256x16xi32>
    %52 = arith.cmpi slt, %48, %51 : vector<256x16xi32>
    %c0_i32_25 = arith.constant 0 : i32
    %53 = arith.cmpi slt, %46, %c0_i32_25 : i32
    %54 = vector.broadcast %53 : i1 to vector<256x16xi1>
    %55 = vector.broadcast %54 : vector<256x16xi1> to vector<256x16xi1>
    %56 = arith.xori %52, %55 : vector<256x16xi1>
    %57 = arith.andi %56, %50 : vector<256x16xi1>
    %58 = vector.broadcast %46 : i32 to vector<256x16xi32>
    %59 = arith.addi %48, %58 : vector<256x16xi32>
    %60 = arith.select %57, %59, %48 : vector<256x16xi1>, vector<256x16xi32>
    %c3_i32 = arith.constant 3 : i32
    %61 = vector.broadcast %c3_i32 : i32 to vector<256x16xi32>
    %62 = arith.cmpi slt, %60, %61 : vector<256x16xi32>
    %63 = arith.select %62, %43, %34 : vector<256x16xi1>, vector<256x16xf32>
    %c0_26 = arith.constant 0 : index
    %c0_27 = arith.constant 0 : index
    %c0_28 = arith.constant 0 : index
    %64 = vector.load %arg7[%c0_26, %c0_27, %c0_28] : memref<1x256x16xf32, #tpu.memory_space<vmem>>, vector<1x256x16xf32>
    %65 = vector.shape_cast %64 : vector<1x256x16xf32> to vector<256x16xf32>
    %66 = vector.shape_cast %63 : vector<256x16xf32> to vector<1x256x16xf32>
    tpu.vector_store %arg7[%c0_26, %c0_27, %c0_28], %66 {strides = array<i32>} : memref<1x256x16xf32, #tpu.memory_space<vmem>>, vector<1x256x16xf32>,
    return
  }
  func.func @transform_0(%arg0: i32, %arg1: i32) -> (i32, i32, i32, i32) {
    %c0_i32 = arith.constant 0 : i32
    %c0_i32_0 = arith.constant 0 : i32
    %c0_i32_1 = arith.constant 0 : i32
    return %arg0, %c0_i32, %arg1, %c0_i32_0 : i32, i32, i32, i32
  }
  func.func @transform_1(%arg0: i32, %arg1: i32) -> (i32, i32) {
    %c0_i32 = arith.constant 0 : i32
    %c0_i32_0 = arith.constant 0 : i32
    %c0_i32_1 = arith.constant 0 : i32
    return %c0_i32, %c0_i32_0 : i32, i32
  }
  func.func @transform_2(%arg0: i32, %arg1: i32) -> (i32, i32) {
    %c0_i32 = arith.constant 0 : i32
    %c0_i32_0 = arith.constant 0 : i32
    %c0_i32_1 = arith.constant 0 : i32
    return %c0_i32, %c0_i32_0 : i32, i32
  }
  func.func @transform_3(%arg0: i32, %arg1: i32) -> (i32, i32) {
    %c0_i32 = arith.constant 0 : i32
    %c0_i32_0 = arith.constant 0 : i32
    %c0_i32_1 = arith.constant 0 : i32
    return %c0_i32, %c0_i32_0 : i32, i32
  }
  func.func @transform_4(%arg0: i32, %arg1: i32) -> (i32, i32) {
    %c0_i32 = arith.constant 0 : i32
    %c0_i32_0 = arith.constant 0 : i32
    %c0_i32_1 = arith.constant 0 : i32
    return %c0_i32, %c0_i32_0 : i32, i32
  }
  func.func @transform_5(%arg0: i32, %arg1: i32) -> (i32, i32, i32) {
    %c0_i32 = arith.constant 0 : i32
    %c0_i32_0 = arith.constant 0 : i32
    return %arg0, %arg1, %c0_i32 : i32, i32, i32
  }
}

</mosaic_0001>

<bundles_post_ra>
// kernel: tpu_custom_call.1
= control target key start
LH: loop header
LB: loop body
LE: loop exit
PB: predicated region body
PF: predicated region fallthrough
CT: control target
= control target key end

     0   :  { %10 = vsyncpa [#allocation3], 0  ;;  %s5682_s0 = inlined_call_operand.hbm [shape: bf16[2,3,256,128], index: 0, kind: input, shape index: {}]   ;;  %s5683_s1 = inlined_call_operand.vmem [shape: f32[128,256], index: 1, kind: input, shape index: {}]   ;;  %s5684_s2 = inlined_call_operand.vmem [shape: f32[1,256], index: 2, kind: input, shape index: {}]   ;;  %s5685_s3 = inlined_call_operand.vmem [shape: f32[256,16], index: 3, kind: input, shape index: {}]   ;;  %s5686_s4 = inlined_call_operand.vmem [shape: f32[1,16], index: 4, kind: input, shape index: {}]   ;;  %s5687_s5 = inlined_call_operand.vmem [shape: f32[2,256,16], index: 5, kind: output, shape index: {}]  }
   0x1   :  { %12 = vsyncpa [#allocation3 + $0x1], 0  ;;  %s3681_s18 = smov 0   ;;  %s3683_s19 = smov 0  }
   0x2   :  { %s3685_s20 = smov 0   ;;  %s3687_s21 = smov 0  }
   0x3   :  { %s3689_s22 = smov 0   ;;  %s3691_s23 = smov 0  }
   0x4 LB: > { %s2679_s24 = sadd.s32 4294967295, %s3645_s23   ;;  %s30_s25 = sadd.s32 1, %s3641_s22  ;;  %s3645_s23 = sphi %s3691_s23, %s18_s23   ;;  %s3641_s22 = sphi %s3689_s22, %s5828_s22   ;;  %s3637_s21 = sphi %s3687_s21, %s5827_s21   ;;  %s3633_s20 = sphi %s3685_s20, %s5826_s20   ;;  %s3629_s19 = sphi %s3683_s19, %s5825_s19   ;;  %s3625_s18 = sphi %s3681_s18, %s5824_s18  }
   0x5   : > { %p32_p0 = scmp.ge.s32.totalorder %s30_s25, 2  ;;  %s39_s26 = sadd.s32 1, %s3633_s20 }
   0x6   : > { %p46_p1 = scmp.ne.s32.totalorder %s3633_s20, %s3629_s19  ;;  %p47_p2 = scmp.eq.s32.totalorder %s3645_s23, 0 }
   0x7   : > { %s5830_s25 = smov (%p32_p0, %s30_s25), 0  ;;  %p52_p4 = scmp.ne.s32.totalorder %s3629_s19, %s3625_s18 }
   0x8   : > { %p48_p3 = por %p47_p2, %p46_p1  ;;  %s34_s27 = ssub.s32 %s3641_s22, %s5830_s25 }
   0x9   : > { %p53_p5 = scmp.eq.s32.totalorder %s2679_s24, 0  ;;  %p37_p6 = scmp.eq.s32.totalorder %s34_s27, 0 }
   0xa   : > { %p3131_p8 = scmp.lt.s32.totalorder %s3645_s23, 2  ;;  %s200_s30 = sand.u32 1, %s3633_s20  }
   0xb   : > { %p3720_p7 = por %p53_p5, %p52_p4  ;;  %s3123_s6 = smul.u32 6144, %s3641_s22 }
   0xc   : > { %s3726_s29 = scalar_select %p37_p6, %s3633_s20, %s39_s26  }
   0xd   : > { %s3122_s7 = smul.u32 384, %s200_s30  ;;  %s212_s10 = scalar_lea.hbm %s5682_s0, %s3123_s6 }
   0xe   : > { %p3733_p9 = pnand %p3131_p8, %p48_p3  ;;  %s201_s14 = scalar_lea.sflag [#allocation3], %s200_s30 }
   0xf   : > { %s204_s12 = scalar_lea.vmem [#allocation2], %s3122_s7  ;;  %s3647_s16 = smov [#allocation2]  }
  0x10   : > { %s213_s13 = sshll.u32 %s204_s12, 4  ;;  %p3569_p10 = pneg %p3733_p9  ;;  %s214_s13 = int_to_ptr.vmem [resolvable:$true] %s213_s13 }
  0x11   : > { %s3580_s15 = scalar_lea.vmem %s214_s13, 6144  ;;  %s3585_s17 = sshll.u32 %s3647_s16, 4  ;;  %s3586_s17 = int_to_ptr.vmem [resolvable:$false] %s3585_s17 }
  0x12   : > { %p3581_p11 = scmp.ne.s32.totalorder %s214_s13, %s3580_s15  ;;  %s3587_s18 = scalar_lea.vmem %s3586_s17, 12288 }
  0x13   : > { %p3588_p0 = scmp.lt.s32.totalorder %s214_s13, %s3586_s17  ;;  %p3589_p1 = scmp.lt.s32.totalorder %s3587_s18, %s3580_s15 }
  0x14   : > { %p3583_p12 = pnand %p3581_p11, %p3569_p10 }
  0x15   : > { %p3590_p2 = por %p3589_p1, %p3588_p0 }
  0x16   : > { %p3584_p13 = pneg %p3583_p12 }
  0x18   : > { %p3591_p3 = pnand %p3590_p2, %p3584_p13 }
  0x1a   : > { %3594 = shalt.err (!%p3591_p3)
}
  0x1b   : > { %s3648_s24 = smov 64   ;;  %s3649_s26 = smov 4  }
  0x1c   : > { %3130 = dma.hbm_to_vmem [thread:$0]  (!%p3733_p9), %s212_s10, 6144, %s214_s13, %s201_s14, %s3648_s24, %s3648_s24, %s3649_s26  }
  0x1d   : > { %p2684_p4 = scmp.ge.s32.totalorder %s3645_s23, 1  ;;  %p221_p5 = scmp.lt.s32.totalorder %s3645_s23, 3 }
  0x1f   : > { %p222_p6 = pnand %p2684_p4, %p221_p5 }
  0x21   : > { %225 = sbr.rel (%p222_p6) target bundleno = 808 (0x328), region = 40 }
  0x26   : > { %s227_s27 = sand.u32 1, %s3629_s19  }
  0x27   : > { %s3124_s30 = smul.u32 384, %s227_s27  ;;  %s228_s6 = scalar_lea.sflag [#allocation3], %s227_s27 }
  0x29   : > { %s3744_s7 = scalar_lea.vmem [#allocation2], %s3124_s30 }
  0x2a   : > { %3620 = dma.done.wait (%p3720_p7), %s228_s6, 6144  }
  0x2b   : > { %3622 = vsyncadd (%p3720_p7), %s228_s6, 4294961152  ;;  %v3650_v0 = vmov 0.0   ;;  %v562_v1 = vld [vmem:[%s5683_s1 + $0xf8] sm:$0xff]  ;;  %v561_v2 = vld [vmem:[%s5683_s1 + $0xf0] sm:$0xff]  ;;  %p264_p7 = scmp.lt.s32.totalorder %s3637_s21, 1 }
  0x2c   : > { %639 = vmatprep.mubr.f32.mxu0 %v3650_v0  ;;  %3058 = vmatprep.subr.mxu1 %v3650_v0  ;;  %v560_v3 = vld [vmem:[%s5683_s1 + $0xe8] sm:$0xff]  ;;  %v559_v4 = vld [vmem:[%s5683_s1 + $0xe0] sm:$0xff]  ;;  %v558_v5 = vld [vmem:[%s5683_s1 + $0xd8] sm:$0xff] }
  0x2d   : > { %575 = vmatprep.subr.mxu0 %v562_v1  ;;  %v557_v6 = vld [vmem:[%s5683_s1 + $0xd0] sm:$0xff]  ;;  %v556_v7 = vld [vmem:[%s5683_s1 + $0xc8] sm:$0xff]  ;;  %v555_v8 = vld [vmem:[%s5683_s1 + $0xc0] sm:$0xff]  ;;  %s5832_s21 = smov (!%p264_p7, %s3637_s21), 1 }
  0x2e   : > { %576 = vmatpush1.msra.mxu0 %v561_v2  ;;  %v554_v9 = vld [vmem:[%s5683_s1 + $0xb8] sm:$0xff]  ;;  %v553_v10 = vld [vmem:[%s5683_s1 + $0xb0] sm:$0xff]  ;;  %v552_v11 = vld [vmem:[%s5683_s1 + $0xa8] sm:$0xff]  ;;  %s2818_s24 = sshll.u32 %s5832_s21, 8 }
  0x2f   : > { %577 = vmatprep.subr.mxu0 %v560_v3  ;;  %v551_v12 = vld [vmem:[%s5683_s1 + $0xa0] sm:$0xff]  ;;  %v550_v13 = vld [vmem:[%s5683_s1 + $0x98] sm:$0xff]  ;;  %v549_v14 = vld [vmem:[%s5683_s1 + $0x90] sm:$0xff]  ;;  %s5454_s30 = scalar_lea.vmem %s5687_s5, %s2818_s24 }
  0x30   : > { %578 = vmatpush1.msra.mxu0 %v559_v4  ;;  %v548_v15 = vld [vmem:[%s5683_s1 + $0x88] sm:$0xff]  ;;  %v547_v16 = vld [vmem:[%s5683_s1 + $0x80] sm:$0xff]  ;;  %v546_v17 = vld [vmem:[%s5683_s1 + $0x78] sm:$0xff] }
  0x31   : > { %579 = vmatprep.subr.mxu0 %v558_v5  ;;  %v545_v18 = vld [vmem:[%s5683_s1 + $0x70] sm:$0xff]  ;;  %v544_v19 = vld [vmem:[%s5683_s1 + $0x68] sm:$0xff]  ;;  %v543_v20 = vld [vmem:[%s5683_s1 + $0x60] sm:$0xff] }
  0x32   : > { %580 = vmatpush1.msra.mxu0 %v557_v6  ;;  %v542_v21 = vld [vmem:[%s5683_s1 + $0x58] sm:$0xff]  ;;  %v2820_v22 = vld [vmem:[%s3744_s7] sm:$0xff]   ;;  %v541_v24 = vld [vmem:[%s5683_s1 + $0x50] sm:$0xff] }
  0x33   : > { %581 = vmatprep.subr.mxu0 %v556_v7  ;;  %v3026_v23 = vld [vmem:[%s3744_s7 + $0x80] sm:$0xff]   ;;  %v540_v25 = vld [vmem:[%s5683_s1 + $0x48] sm:$0xff]  ;;  %v2821_v27 = vunpack.c.l.bf16 %v2820_v22  ;;  %v538_v29 = vld [vmem:[%s5683_s1 + $0x38] sm:$0xff]  ;;  %v2822_v36 = vunpack.c.h.bf16 %v2820_v22 }
  0x34   : > { %582 = vmatpush1.msra.mxu0 %v555_v8  ;;  %v539_v26 = vld [vmem:[%s5683_s1 + $0x40] sm:$0xff]  ;;  %v2885_v28 = vunpack.c.l.bf16 %v3026_v23  ;;  %v537_v31 = vld [vmem:[%s5683_s1 + $0x30] sm:$0xff]  ;;  %v536_v32 = vld [vmem:[%s5683_s1 + $0x28] sm:$0xff]  ;;  %v2886_v37 = vunpack.c.h.bf16 %v3026_v23 }
  0x35   : > { %583 = vmatprep.subr.mxu0 %v554_v9  ;;  %v3042_v30 = vld [vmem:[%s3744_s7 + $0x100] sm:$0xff]   ;;  %v534_v38 = vld [vmem:[%s5683_s1 + $0x18] sm:$0xff]  ;;  %v3011_v39 = vld [vmem:[%s3744_s7 + $0x8] sm:$0xff]  }
  0x36   : > { %584 = vmatpush1.msra.mxu0 %v553_v10  ;;  %v535_v33 = vld [vmem:[%s5683_s1 + $0x20] sm:$0xff]  ;;  %v402_v34 = vadd.f32 %v2885_v28, %v2821_v27  ;;  %v2949_v35 = vunpack.c.l.bf16 %v3042_v30  ;;  %v3027_v40 = vld [vmem:[%s3744_s7 + $0x88] sm:$0xff]   ;;  %v533_v41 = vld [vmem:[%s5683_s1 + $0x10] sm:$0xff]  ;;  %v2950_v43 = vunpack.c.h.bf16 %v3042_v30  ;;  %v403_v46 = vadd.f32 %v2886_v37, %v2822_v36 }
  0x37   : > { %585 = vmatprep.subr.mxu0 %v552_v11  ;;  %v532_v42 = vld [vmem:[%s5683_s1 + $0x8] sm:$0xff]  ;;  %v531_v44 = vld [vmem:[%s5683_s1] sm:$0xff]  ;;  %v2825_v47 = vunpack.c.l.bf16 %v3011_v39  ;;  %v2889_v48 = vunpack.c.l.bf16 %v3027_v40  ;;  %v1999_v50 = vld [vmem:[%s5685_s3 + $0x78] sm:$0xff]  ;;  %v2826_v55 = vunpack.c.h.bf16 %v3011_v39  ;;  %v2890_v56 = vunpack.c.h.bf16 %v3027_v40 }
  0x38   : > { %586 = vmatpush1.msra.mxu0 %v551_v12  ;;  %v499_v45 = vadd.f32 %v2949_v35, %v402_v34  ;;  %v3043_v49 = vld [vmem:[%s3744_s7 + $0x108] sm:$0xff]   ;;  %3090 = vmatpush1.msra.mxu1 %v1999_v50  ;;  %v1998_v51 = vld [vmem:[%s5685_s3 + $0x70] sm:$0xff]  ;;  %v500_v53 = vadd.f32 %v2950_v43, %v403_v46  ;;  %v1996_v3 = vld [vmem:[%s5685_s3 + $0x60] sm:$0xff] }
  0x39   : > { %587 = vmatprep.subr.mxu0 %v550_v13  ;;  %3059 = vmatprep.subr.mxu1 %v3650_v0  ;;  %v2953_v52 = vunpack.c.l.bf16 %v3043_v49  ;;  %v404_v54 = vadd.f32 %v2889_v48, %v2825_v47  ;;  %v3012_v57 = vld [vmem:[%s3744_s7 + $0x10] sm:$0xff]   ;;  %v1997_v59 = vld [vmem:[%s5685_s3 + $0x68] sm:$0xff]  ;;  %v2954_v60 = vunpack.c.h.bf16 %v3043_v49  ;;  %v405_v62 = vadd.f32 %v2890_v56, %v2826_v55  ;;  %v1995_v4 = vld [vmem:[%s5685_s3 + $0x58] sm:$0xff] }
  0x3a   : > { %588 = vmatpush1.msra.mxu0 %v549_v14  ;;  %3091 = vmatpush1.msra.mxu1 %v1998_v51  ;;  %v3028_v58 = vld [vmem:[%s3744_s7 + $0x90] sm:$0xff]   ;;  %v2829_v63 = vunpack.c.l.bf16 %v3012_v57  ;;  %v2830_v8 = vunpack.c.h.bf16 %v3012_v57  ;;  %v3013_v11 = vld [vmem:[%s3744_s7 + $0x18] sm:$0xff]   ;;  %v1993_v13 = vld [vmem:[%s5685_s3 + $0x48] sm:$0xff] }
  0x3b   : > { %589 = vmatprep.subr.mxu0 %v548_v15  ;;  %3060 = vmatprep.subr.mxu1 %v3650_v0  ;;  %v501_v61 = vadd.f32 %v2953_v52, %v404_v54  ;;  %v2893_v1 = vunpack.c.l.bf16 %v3028_v58  ;;  %v3044_v2 = vld [vmem:[%s3744_s7 + $0x110] sm:$0xff]   ;;  %v502_v6 = vadd.f32 %v2954_v60, %v405_v62  ;;  %v2894_v9 = vunpack.c.h.bf16 %v3028_v58  ;;  %v3029_v12 = vld [vmem:[%s3744_s7 + $0x98] sm:$0xff]   ;;  %v3030_v27 = vld [vmem:[%s3744_s7 + $0xa0] sm:$0xff]  }
  0x3c   : > { %590 = vmatpush1.msra.mxu0 %v547_v16  ;;  %3092 = vmatpush1.msra.mxu1 %v1997_v59  ;;  %v2957_v5 = vunpack.c.l.bf16 %v3044_v2  ;;  %v1994_v10 = vld [vmem:[%s5685_s3 + $0x50] sm:$0xff]  ;;  %v2958_v14 = vunpack.c.h.bf16 %v3044_v2  ;;  %v3015_v39 = vld [vmem:[%s3744_s7 + $0x28] sm:$0xff]   ;;  %v3017_v2 = vld [vmem:[%s3744_s7 + $0x38] sm:$0xff]  }
  0x3d   : > { %591 = vmatprep.subr.mxu0 %v546_v17  ;;  %3061 = vmatprep.subr.mxu1 %v3650_v0  ;;  %v406_v7 = vadd.f32 %v2893_v1, %v2829_v63  ;;  %v407_v16 = vadd.f32 %v2894_v9, %v2830_v8  ;;  %v2833_v17 = vunpack.c.l.bf16 %v3013_v11  ;;  %v3031_v40 = vld [vmem:[%s3744_s7 + $0xa8] sm:$0xff]   ;;  %v3016_v52 = vld [vmem:[%s3744_s7 + $0x30] sm:$0xff]   ;;  %v3049_v9 = vld [vmem:[%s3744_s7 + $0x138] sm:$0xff]  }
  0x3e   : > { %592 = vmatpush1.msra.mxu0 %v545_v18  ;;  %3093 = vmatpush1.msra.mxu1 %v1996_v3  ;;  %v2897_v18 = vunpack.c.l.bf16 %v3029_v12  ;;  %v3047_v46 = vld [vmem:[%s3744_s7 + $0x128] sm:$0xff]   ;;  %v2845_v57 = vunpack.c.l.bf16 %v3016_v52  ;;  %v2846_v63 = vunpack.c.h.bf16 %v3016_v52  ;;  %v1988_v52 = vld [vmem:[%s5685_s3 + $0x20] sm:$0xff] }
  0x3f   : > { %593 = vmatprep.subr.mxu0 %v544_v19  ;;  %3062 = vmatprep.subr.mxu1 %v3650_v0  ;;  %v503_v15 = vadd.f32 %v2957_v5, %v406_v7  ;;  %v3045_v19 = vld [vmem:[%s3744_s7 + $0x118] sm:$0xff]   ;;  %v504_v22 = vadd.f32 %v2958_v14, %v407_v16  ;;  %v2969_v47 = vunpack.c.l.bf16 %v3047_v46  ;;  %v2970_v54 = vunpack.c.h.bf16 %v3047_v46  ;;  %v3034_v16 = vld [vmem:[%s3744_s7 + $0xc0] sm:$0xff]  }
  0x40   : > { %594 = vmatpush1.msra.mxu0 %v543_v20  ;;  %3094 = vmatpush1.msra.mxu1 %v1995_v4  ;;  %v1992_v20 = vld [vmem:[%s5685_s3 + $0x40] sm:$0xff]  ;;  %v408_v23 = vadd.f32 %v2897_v18, %v2833_v17  ;;  %v2962_v28 = vunpack.c.h.bf16 %v3045_v19  ;;  %v2849_v7 = vunpack.c.l.bf16 %v3017_v2  ;;  %v2978_v17 = vunpack.c.h.bf16 %v3049_v9 }
  0x41   : > { %595 = vmatprep.subr.mxu0 %v542_v21  ;;  %3063 = vmatprep.subr.mxu1 %v3650_v0  ;;  %v2961_v21 = vunpack.c.l.bf16 %v3045_v19 }
  0x42   : > { %596 = vmatpush1.msra.mxu0 %v541_v24  ;;  %3095 = vmatpush1.msra.mxu1 %v1994_v10  ;;  %v2834_v24 = vunpack.c.h.bf16 %v3013_v11 }
  0x43   : > { %597 = vmatprep.subr.mxu0 %v540_v25  ;;  %v2898_v25 = vunpack.c.h.bf16 %v3029_v12  ;;  %3064 = vmatprep.subr.mxu1 %v3650_v0 }
  0x44   : > { %598 = vmatpush1.msra.mxu0 %v539_v26  ;;  %v3014_v26 = vld [vmem:[%s3744_s7 + $0x20] sm:$0xff]   ;;  %3096 = vmatpush1.msra.mxu1 %v1993_v13 }
  0x45   : > { %599 = vmatprep.subr.mxu0 %v538_v29  ;;  %3065 = vmatprep.subr.mxu1 %v3650_v0  ;;  %v505_v29 = vadd.f32 %v2961_v21, %v408_v23  ;;  %v409_v30 = vadd.f32 %v2898_v25, %v2834_v24  ;;  %v2838_v37 = vunpack.c.h.bf16 %v3014_v26  ;;  %v2917_v21 = vunpack.c.l.bf16 %v3034_v16 }
  0x46   : > { %600 = vmatpush1.msra.mxu0 %v537_v31  ;;  %v2837_v31 = vunpack.c.l.bf16 %v3014_v26  ;;  %3097 = vmatpush1.msra.mxu1 %v1992_v20 }
  0x47   : > { %601 = vmatprep.subr.mxu0 %v536_v32  ;;  %v2901_v32 = vunpack.c.l.bf16 %v3030_v27  ;;  %3066 = vmatprep.subr.mxu1 %v3650_v0  ;;  %v506_v35 = vadd.f32 %v2962_v28, %v409_v30  ;;  %v3019_v28 = vld [vmem:[%s3744_s7 + $0x48] sm:$0xff]  }
  0x48   : > { %602 = vmatpush1.msra.mxu0 %v535_v33  ;;  %v3046_v33 = vld [vmem:[%s3744_s7 + $0x120] sm:$0xff]  }
  0x49   : > { %603 = vmatprep.subr.mxu0 %v534_v38  ;;  %v2965_v34 = vunpack.c.l.bf16 %v3046_v33  ;;  %v410_v36 = vadd.f32 %v2901_v32, %v2837_v31  ;;  %v2902_v38 = vunpack.c.h.bf16 %v3030_v27  ;;  %v2918_v27 = vunpack.c.h.bf16 %v3034_v16  ;;  %v2014_v16 = vld [vmem:[%s5685_s3 + $0xf0] sm:$0xff] }
  0x4a   : > { %604 = vmatpush1.msra.mxu0 %v533_v41  ;;  %v2966_v41 = vunpack.c.h.bf16 %v3046_v33  ;;  %v2857_v33 = vunpack.c.l.bf16 %v3019_v28 }
  0x4b   : > { %605 = vmatprep.subr.mxu0 %v532_v42  ;;  %v507_v42 = vadd.f32 %v2965_v34, %v410_v36  ;;  %v411_v43 = vadd.f32 %v2902_v38, %v2838_v37 }
  0x4c   : > { %606 = vmatpush1.msra.mxu0 %v531_v44  ;;  %v2841_v44 = vunpack.c.l.bf16 %v3015_v39 }
  0x4d   : > { %640 = vmatmul.mubr.f32.vlgmr.msra.gmra.mxu0 %v499_v45  ;;  %2023 = vmatprep.subr.mxu0 %v3650_v0  ;;  %v2905_v45 = vunpack.c.l.bf16 %v3031_v40  ;;  %v508_v48 = vadd.f32 %v2966_v41, %v411_v43  ;;  %v1991_v41 = vld [vmem:[%s5685_s3 + $0x38] sm:$0xff]  ;;  %v3036_v43 = vld [vmem:[%s3744_s7 + $0xd0] sm:$0xff]  }
  0x4e   : > { %645 = vmatprep.mubr.f32.mxu0 %v3650_v0  ;;  %2024 = vmatpush1.msra.mxu0 %v1999_v50  ;;  %v2842_v50 = vunpack.c.h.bf16 %v3015_v39  ;;  %v2858_v39 = vunpack.c.h.bf16 %v3019_v28 }
  0x4f   : > { %2025 = vmatprep.subr.mxu0 %v3650_v0  ;;  %v412_v49 = vadd.f32 %v2905_v45, %v2841_v44  ;;  %v1990_v44 = vld [vmem:[%s5685_s3 + $0x30] sm:$0xff]  ;;  %3098 = vmatpush1.msra.mxu1 %v1991_v41 }
  0x50   : > { %2026 = vmatpush1.msra.mxu0 %v1998_v51  ;;  %v2906_v51 = vunpack.c.h.bf16 %v3031_v40  ;;  %3067 = vmatprep.subr.mxu1 %v3650_v0 }
  0x51   : > { %646 = vmatmul.mubr.f32.gmra.mxu0 %v500_v53  ;;  %2027 = vmatprep.subr.mxu0 %v3650_v0  ;;  %v3032_v53 = vld [vmem:[%s3744_s7 + $0xb0] sm:$0xff]   ;;  %v509_v55 = vadd.f32 %v2969_v47, %v412_v49  ;;  %v2925_v49 = vunpack.c.l.bf16 %v3036_v43 }
  0x52   : > { %651 = vmatprep.mubr.f32.mxu0 %v3650_v0  ;;  %2028 = vmatpush1.msra.mxu0 %v1997_v59  ;;  %v413_v56 = vadd.f32 %v2906_v51, %v2842_v50  ;;  %v2909_v58 = vunpack.c.l.bf16 %v3032_v53  ;;  %v3048_v59 = vld [vmem:[%s3744_s7 + $0x130] sm:$0xff]   ;;  %v2910_v1 = vunpack.c.h.bf16 %v3032_v53  ;;  %v1989_v51 = vld [vmem:[%s5685_s3 + $0x28] sm:$0xff] }
  0x53   : > { %2029 = vmatprep.subr.mxu0 %v3650_v0  ;;  %v2973_v60 = vunpack.c.l.bf16 %v3048_v59  ;;  %v3052_v50 = vld [vmem:[%s3744_s7 + $0x150] sm:$0xff]   ;;  %3099 = vmatpush1.msra.mxu1 %v1990_v44 }
  0x54   : > { %2030 = vmatpush1.msra.mxu0 %v1996_v3  ;;  %v414_v62 = vadd.f32 %v2909_v58, %v2845_v57  ;;  %v3033_v3 = vld [vmem:[%s3744_s7 + $0xb8] sm:$0xff]   ;;  %v2989_v53 = vunpack.c.l.bf16 %v3052_v50  ;;  %3068 = vmatprep.subr.mxu1 %v3650_v0  ;;  %v2926_v57 = vunpack.c.h.bf16 %v3036_v43 }
  0x55   : > { %652 = vmatmul.mubr.f32.gmra.mxu0 %v501_v61  ;;  %2031 = vmatprep.subr.mxu0 %v3650_v0  ;;  %v510_v61 = vadd.f32 %v2970_v54, %v413_v56  ;;  %v2913_v8 = vunpack.c.l.bf16 %v3033_v3  ;;  %v2914_v14 = vunpack.c.h.bf16 %v3033_v3  ;;  %v3021_v58 = vld [vmem:[%s3744_s7 + $0x58] sm:$0xff]  }
  0x56   : > { %657 = vmatprep.mubr.f32.mxu0 %v3650_v0  ;;  %2032 = vmatpush1.msra.mxu0 %v1995_v4  ;;  %v2974_v4 = vunpack.c.h.bf16 %v3048_v59  ;;  %v511_v5 = vadd.f32 %v2973_v60, %v414_v62  ;;  %v3037_v59 = vld [vmem:[%s3744_s7 + $0xd8] sm:$0xff]   ;;  %v1986_v62 = vld [vmem:[%s5685_s3 + $0x10] sm:$0xff] }
  0x57   : > { %2033 = vmatprep.subr.mxu0 %v3650_v0  ;;  %v416_v12 = vadd.f32 %v2913_v8, %v2849_v7  ;;  %v1987_v60 = vld [vmem:[%s5685_s3 + $0x18] sm:$0xff]  ;;  %3100 = vmatpush1.msra.mxu1 %v1989_v51  ;;  %v2929_v3 = vunpack.c.l.bf16 %v3037_v59  ;;  %v1984_v7 = vld [vmem:[%s5685_s3] sm:$0xff] }
  0x58   : > { %2034 = vmatpush1.msra.mxu0 %v1994_v10  ;;  %v2977_v10 = vunpack.c.l.bf16 %v3049_v9  ;;  %3069 = vmatprep.subr.mxu1 %v3650_v0 }
  0x59   : > { %658 = vmatmul.mubr.f32.gmra.mxu0 %v502_v6  ;;  %2035 = vmatprep.subr.mxu0 %v3650_v0  ;;  %v415_v6 = vadd.f32 %v2910_v1, %v2846_v63 }
  0x5a   : > { %663 = vmatprep.mubr.f32.mxu0 %v3650_v0  ;;  %2036 = vmatpush1.msra.mxu0 %v1993_v13  ;;  %v2850_v13 = vunpack.c.h.bf16 %v3017_v2  ;;  %v513_v18 = vadd.f32 %v2977_v10, %v416_v12  ;;  %v2865_v2 = vunpack.c.l.bf16 %v3021_v58  ;;  %v2866_v10 = vunpack.c.h.bf16 %v3021_v58  ;;  %v3022_v12 = vld [vmem:[%s3744_s7 + $0x60] sm:$0xff]  }
  0x5b   : > { %2037 = vmatprep.subr.mxu0 %v3650_v0  ;;  %v512_v11 = vadd.f32 %v2974_v4, %v415_v6  ;;  %3101 = vmatpush1.msra.mxu1 %v1988_v52  ;;  %v3053_v4 = vld [vmem:[%s3744_s7 + $0x158] sm:$0xff]   ;;  %v2004_v58 = vld [vmem:[%s5685_s3 + $0xa0] sm:$0xff] }
  0x5c   : > { %2038 = vmatpush1.msra.mxu0 %v1992_v20  ;;  %v417_v19 = vadd.f32 %v2914_v14, %v2850_v13  ;;  %3070 = vmatprep.subr.mxu1 %v3650_v0  ;;  %v2993_v6 = vunpack.c.l.bf16 %v3053_v4  ;;  %v424_v9 = vadd.f32 %v2929_v3, %v2865_v2  ;;  %v3038_v13 = vld [vmem:[%s3744_s7 + $0xe0] sm:$0xff]   ;;  %v2015_v14 = vld [vmem:[%s5685_s3 + $0xf8] sm:$0xff] }
  0x5d   : > { %664 = vmatmul.mubr.f32.gmra.mxu0 %v503_v15  ;;  %2039 = vmatprep.subr.mxu0 %v3650_v0  ;;  %v3018_v15 = vld [vmem:[%s3744_s7 + $0x40] sm:$0xff]   ;;  %v2934_v28 = vunpack.c.h.bf16 %v3038_v13  ;;  %v2003_v2 = vld [vmem:[%s5685_s3 + $0x98] sm:$0xff] }
  0x5e   : > { %669 = vmatprep.mubr.f32.mxu0 %v3650_v0  ;;  %v2853_v20 = vunpack.c.l.bf16 %v3018_v15  ;;  %v514_v24 = vadd.f32 %v2978_v17, %v417_v19  ;;  %v2854_v26 = vunpack.c.h.bf16 %v3018_v15  ;;  %2040 = vmatpush1.msra.mxu0 %v1991_v41  ;;  %v2994_v15 = vunpack.c.h.bf16 %v3053_v4  ;;  %v4040_v41 = vld [vmem:[%s5685_s3 + $0xc0] sm:$0xff] }
  0x5f   : > { %2041 = vmatprep.subr.mxu0 %v3650_v0  ;;  %3102 = vmatpush1.msra.mxu1 %v1987_v60  ;;  %v521_v17 = vadd.f32 %v2993_v6, %v424_v9  ;;  %v2869_v19 = vunpack.c.l.bf16 %v3022_v12  ;;  %v2002_v9 = vld [vmem:[%s5685_s3 + $0x90] sm:$0xff] }
  0x60   : > { %v418_v25 = vadd.f32 %v2917_v21, %v2853_v20  ;;  %v419_v32 = vadd.f32 %v2918_v27, %v2854_v26  ;;  %2042 = vmatpush1.msra.mxu0 %v1990_v44  ;;  %3071 = vmatprep.subr.mxu1 %v3650_v0  ;;  %v2933_v20 = vunpack.c.l.bf16 %v3038_v13  ;;  %v3054_v21 = vld [vmem:[%s3744_s7 + $0x160] sm:$0xff]   ;;  %v2870_v27 = vunpack.c.h.bf16 %v3022_v12 }
  0x61   : > { %670 = vmatmul.mubr.f32.gmra.mxu0 %v504_v22  ;;  %v3050_v22 = vld [vmem:[%s3744_s7 + $0x140] sm:$0xff]   ;;  %2043 = vmatprep.subr.mxu0 %v3650_v0 }
  0x62   : > { %675 = vmatprep.mubr.f32.mxu0 %v3650_v0  ;;  %v2981_v23 = vunpack.c.l.bf16 %v3050_v22  ;;  %v2982_v30 = vunpack.c.h.bf16 %v3050_v22  ;;  %2044 = vmatpush1.msra.mxu0 %v1989_v51  ;;  %v3998_v22 = vld [vmem:[%s5685_s3 + $0xe8] sm:$0xff]  ;;  %v426_v26 = vadd.f32 %v2933_v20, %v2869_v19 }
  0x63   : > { %2045 = vmatprep.subr.mxu0 %v3650_v0  ;;  %3103 = vmatpush1.msra.mxu1 %v1986_v62 }
  0x64   : > { %v515_v31 = vadd.f32 %v2981_v23, %v418_v25  ;;  %v516_v37 = vadd.f32 %v2982_v30, %v419_v32  ;;  %2046 = vmatpush1.msra.mxu0 %v1988_v52  ;;  %3072 = vmatprep.subr.mxu1 %v3650_v0  ;;  %v2997_v23 = vunpack.c.l.bf16 %v3054_v21  ;;  %v3039_v30 = vld [vmem:[%s3744_s7 + $0xe8] sm:$0xff]   ;;  %v2998_v32 = vunpack.c.h.bf16 %v3054_v21 }
  0x65   : > { %676 = vmatmul.mubr.f32.gmra.mxu0 %v505_v29  ;;  %v3035_v29 = vld [vmem:[%s3744_s7 + $0xc8] sm:$0xff]   ;;  %2047 = vmatprep.subr.mxu0 %v3650_v0  ;;  %v5688_v21 = vlaneseq }
  0x66   : > { %681 = vmatprep.mubr.f32.mxu0 %v3650_v0  ;;  %v2921_v34 = vunpack.c.l.bf16 %v3035_v29  ;;  %v2922_v40 = vunpack.c.h.bf16 %v3035_v29  ;;  %2048 = vmatpush1.msra.mxu0 %v1987_v60  ;;  %v3023_v29 = vld [vmem:[%s3744_s7 + $0x68] sm:$0xff]  }
  0x67   : > { %2049 = vmatprep.subr.mxu0 %v3650_v0  ;;  %v2874_v44 = vunpack.c.h.bf16 %v3023_v29 }
  0x68   : > { %v420_v38 = vadd.f32 %v2921_v34, %v2857_v33  ;;  %v421_v47 = vadd.f32 %v2922_v40, %v2858_v39  ;;  %2050 = vmatpush1.msra.mxu0 %v1986_v62  ;;  %v4023_v33 = vld [vmem:[%s5685_s3 + $0xd0] sm:$0xff]  ;;  %v523_v34 = vadd.f32 %v2997_v23, %v426_v26  ;;  %v4033_v39 = vld [vmem:[%s5685_s3 + $0xc8] sm:$0xff] }
  0x69   : > { %682 = vmatmul.mubr.f32.gmra.mxu0 %v506_v35  ;;  %v3051_v35 = vld [vmem:[%s3744_s7 + $0x148] sm:$0xff]   ;;  %2051 = vmatprep.subr.mxu0 %v3650_v0 }
  0x6a   : > { %687 = vmatprep.mubr.f32.mxu0 %v3650_v0  ;;  %v2985_v36 = vunpack.c.l.bf16 %v3051_v35  ;;  %v2986_v45 = vunpack.c.h.bf16 %v3051_v35  ;;  %v427_v35 = vadd.f32 %v2934_v28, %v2870_v27 }
  0x6c   : > { %v517_v46 = vadd.f32 %v2985_v36, %v420_v38  ;;  %v518_v54 = vadd.f32 %v2986_v45, %v421_v47  ;;  %v2873_v36 = vunpack.c.l.bf16 %v3023_v29  ;;  %v3055_v38 = vld [vmem:[%s3744_s7 + $0x168] sm:$0xff]   ;;  %v2938_v45 = vunpack.c.h.bf16 %v3039_v30  ;;  %v3040_v47 = vld [vmem:[%s3744_s7 + $0xf0] sm:$0xff]  }
  0x6d   : > { %688 = vmatmul.mubr.f32.gmra.mxu0 %v507_v42  ;;  %v3020_v42 = vld [vmem:[%s3744_s7 + $0x50] sm:$0xff]   ;;  %v3001_v40 = vunpack.c.l.bf16 %v3055_v38  ;;  %v2942_v62 = vunpack.c.h.bf16 %v3040_v47 }
  0x6e   : > { %693 = vmatprep.mubr.f32.mxu0 %v3650_v0  ;;  %v2862_v56 = vunpack.c.h.bf16 %v3020_v42  ;;  %v429_v52 = vadd.f32 %v2938_v45, %v2874_v44 }
  0x70   : > { %v423_v1 = vadd.f32 %v2926_v57, %v2862_v56  ;;  %v4068_v56 = vld [vmem:[%s5685_s3 + $0xa8] sm:$0xff] }
  0x71   : > { %694 = vmatmul.mubr.f32.gmra.mxu0 %v508_v48  ;;  %v2861_v48 = vunpack.c.l.bf16 %v3020_v42  ;;  %v524_v42 = vadd.f32 %v2998_v32, %v427_v35 }
  0x72   : > { %699 = vmatprep.mubr.f32.mxu0 %v3650_v0 }
  0x75   : > { %700 = vmatmul.mubr.f32.gmra.mxu0 %v509_v55  ;;  %v422_v55 = vadd.f32 %v2925_v49, %v2861_v48  ;;  %v4051_v48 = vld [vmem:[%s5685_s3 + $0xb8] sm:$0xff]  ;;  %v3002_v49 = vunpack.c.h.bf16 %v3055_v38 }
  0x76   : > { %705 = vmatprep.mubr.f32.mxu0 %v3650_v0 }
  0x77   : > { %v519_v63 = vadd.f32 %v2989_v53, %v422_v55  ;;  %v3056_v55 = vld [vmem:[%s3744_s7 + $0x170] sm:$0xff]  }
  0x78   : > { %v3005_v57 = vunpack.c.l.bf16 %v3056_v55  ;;  %v3006_v3 = vunpack.c.h.bf16 %v3056_v55 }
  0x79   : > { %706 = vmatmul.mubr.f32.gmra.mxu0 %v510_v61  ;;  %v2990_v61 = vunpack.c.h.bf16 %v3052_v50  ;;  %v4058_v50 = vld [vmem:[%s5685_s3 + $0xb0] sm:$0xff] }
  0x7a   : > { %711 = vmatprep.mubr.f32.mxu0 %v3650_v0 }
  0x7b   : > { %v520_v8 = vadd.f32 %v2990_v61, %v423_v1  ;;  %v3041_v1 = vld [vmem:[%s3744_s7 + $0xf8] sm:$0xff]  }
  0x7d   : > { %712 = vmatmul.mubr.f32.gmra.mxu0 %v511_v5  ;;  %v1985_v5 = vld [vmem:[%s5685_s3 + $0x8] sm:$0xff] }
  0x7e   : > { %717 = vmatprep.mubr.f32.mxu0 %v3650_v0  ;;  %2052 = vmatpush1.msra.mxu0 %v1985_v5 }
  0x7f   : > { %2053 = vmatprep.subr.mxu0 %v3650_v0  ;;  %3104 = vmatpush1.msra.mxu1 %v1985_v5 }
  0x80   : > { %2054 = vmatpush1.msra.mxu0 %v1984_v7  ;;  %3073 = vmatprep.subr.mxu1 %v3650_v0 }
  0x81   : > { %718 = vmatmul.mubr.f32.gmra.mxu0 %v512_v11  ;;  %v2930_v11 = vunpack.c.h.bf16 %v3037_v59  ;;  %2055 = vmatprep.subr.mxu0 %v3650_v0  ;;  %v526_v59 = vadd.f32 %v3002_v49, %v429_v52 }
  0x82   : > { %723 = vmatprep.mubr.f32.mxu0 %v3650_v0  ;;  %2056 = vmatpush2.msra.mxu0 %v2015_v14 }
  0x83   : > { %2057 = vmatprep.subr.mxu0 %v3650_v0  ;;  %3105 = vmatpush1.msra.mxu1 %v1984_v7  ;;  %v2945_v7 = vunpack.c.l.bf16 %v3041_v1 }
  0x84   : > { %2058 = vmatpush2.msra.mxu0 %v2014_v16  ;;  %3074 = vmatprep.subr.mxu1 %v3650_v0 }
  0x85   : > { %724 = vmatmul.mubr.f32.gmra.mxu0 %v513_v18  ;;  %v425_v18 = vadd.f32 %v2930_v11, %v2866_v10  ;;  %2059 = vmatprep.subr.mxu0 %v3650_v0  ;;  %v2001_v11 = vld [vmem:[%s5685_s3 + $0x88] sm:$0xff] }
  0x86   : > { %729 = vmatprep.mubr.f32.mxu0 %v3650_v0  ;;  %2060 = vmatpush2.msra.mxu0 %v3998_v22 }
  0x87   : > { %v522_v25 = vadd.f32 %v2994_v15, %v425_v18  ;;  %2061 = vmatprep.subr.mxu0 %v3650_v0  ;;  %3106 = vmatpush2.msra.mxu1 %v2015_v14  ;;  %v2946_v15 = vunpack.c.h.bf16 %v3041_v1 }
  0x88   : > { %3075 = vmatprep.subr.mxu1 %v3650_v0 }
  0x89   : > { %730 = vmatmul.mubr.f32.gmra.mxu0 %v514_v24  ;;  %v4005_v24 = vld [vmem:[%s5685_s3 + $0xe0] sm:$0xff]  ;;  %3107 = vmatpush2.msra.mxu1 %v2014_v16 }
  0x8a   : > { %735 = vmatprep.mubr.f32.mxu0 %v3650_v0  ;;  %2062 = vmatpush2.msra.mxu0 %v4005_v24  ;;  %v2000_v16 = vld [vmem:[%s5685_s3 + $0x80] sm:$0xff] }
  0x8b   : > { %2063 = vmatprep.subr.mxu0 %v3650_v0  ;;  %3076 = vmatprep.subr.mxu1 %v3650_v0 }
  0x8c   : > { %3108 = vmatpush2.msra.mxu1 %v3998_v22  ;;  %v566_v22 = vshrl.u32 %v5688_v21, 7 }
  0x8d   : > { %736 = vmatmul.mubr.f32.gmra.mxu0 %v515_v31  ;;  %v4016_v31 = vld [vmem:[%s5685_s3 + $0xd8] sm:$0xff]  ;;  %3077 = vmatprep.subr.mxu1 %v3650_v0 }
  0x8e   : > { %741 = vmatprep.mubr.f32.mxu0 %v3650_v0  ;;  %2064 = vmatpush2.msra.mxu0 %v4016_v31  ;;  %v567_v23 = vsub.s32 0, %v566_v22 }
  0x8f   : > { %2065 = vmatprep.subr.mxu0 %v3650_v0  ;;  %3109 = vmatpush2.msra.mxu1 %v4005_v24  ;;  %v563_v24 = vld [vmem:[%s5684_s2] sm:$0x3] }
  0x90   : > { %2066 = vmatpush2.msra.mxu0 %v4023_v33  ;;  %3078 = vmatprep.subr.mxu1 %v3650_v0  ;;  %v4126_v26 = vrot.slane %v563_v24, %v567_v23 }
  0x91   : > { %742 = vmatmul.mubr.f32.gmra.mxu0 %v516_v37  ;;  %v2937_v37 = vunpack.c.l.bf16 %v3039_v30  ;;  %2067 = vmatprep.subr.mxu0 %v3650_v0 }
  0x92   : > { %747 = vmatprep.mubr.f32.mxu0 %v3650_v0  ;;  %2068 = vmatpush2.msra.mxu0 %v4033_v39 }
  0x93   : > { %v428_v43 = vadd.f32 %v2937_v37, %v2873_v36  ;;  %2069 = vmatprep.subr.mxu0 %v3650_v0  ;;  %3110 = vmatpush2.msra.mxu1 %v4016_v31 }
  0x94   : > { %2070 = vmatpush2.msra.mxu0 %v4040_v41  ;;  %3079 = vmatprep.subr.mxu1 %v3650_v0 }
  0x95   : > { %748 = vmatmul.mubr.f32.gmra.mxu0 %v517_v46  ;;  %v3024_v46 = vld [vmem:[%s3744_s7 + $0x70] sm:$0xff]   ;;  %2071 = vmatprep.subr.mxu0 %v3650_v0  ;;  %v525_v51 = vadd.f32 %v3001_v40, %v428_v43 }
  0x96   : > { %753 = vmatprep.mubr.f32.mxu0 %v3650_v0  ;;  %2072 = vmatpush2.msra.mxu0 %v4051_v48  ;;  %v2877_v53 = vunpack.c.l.bf16 %v3024_v46  ;;  %v2878_v61 = vunpack.c.h.bf16 %v3024_v46 }
  0x97   : > { %2073 = vmatprep.subr.mxu0 %v3650_v0  ;;  %3111 = vmatpush2.msra.mxu1 %v4023_v33 }
  0x98   : > { %2074 = vmatpush2.msra.mxu0 %v4058_v50  ;;  %v431_v5 = vadd.f32 %v2942_v62, %v2878_v61  ;;  %3080 = vmatprep.subr.mxu1 %v3650_v0 }
  0x99   : > { %754 = vmatmul.mubr.f32.gmra.mxu0 %v518_v54  ;;  %v2941_v54 = vunpack.c.l.bf16 %v3040_v47  ;;  %2075 = vmatprep.subr.mxu0 %v3650_v0 }
  0x9a   : > { %759 = vmatprep.mubr.f32.mxu0 %v3650_v0  ;;  %2076 = vmatpush2.msra.mxu0 %v4068_v56  ;;  %v528_v12 = vadd.f32 %v3006_v3, %v431_v5 }
  0x9b   : > { %v430_v60 = vadd.f32 %v2941_v54, %v2877_v53  ;;  %2077 = vmatprep.subr.mxu0 %v3650_v0  ;;  %3112 = vmatpush2.msra.mxu1 %v4033_v39 }
  0x9c   : > { %2078 = vmatpush2.msra.mxu0 %v2004_v58  ;;  %3081 = vmatprep.subr.mxu1 %v3650_v0 }
  0x9d   : > { %760 = vmatmul.mubr.f32.gmra.mxu0 %v519_v63  ;;  %v3025_v63 = vld [vmem:[%s3744_s7 + $0x78] sm:$0xff]   ;;  %2079 = vmatprep.subr.mxu0 %v3650_v0  ;;  %v527_v4 = vadd.f32 %v3005_v57, %v430_v60 }
  0x9e   : > { %765 = vmatprep.mubr.f32.mxu0 %v3650_v0  ;;  %v2881_v6 = vunpack.c.l.bf16 %v3025_v63  ;;  %2080 = vmatpush2.msra.mxu0 %v2003_v2  ;;  %v2882_v14 = vunpack.c.h.bf16 %v3025_v63 }
  0x9f   : > { %2081 = vmatprep.subr.mxu0 %v3650_v0  ;;  %3113 = vmatpush2.msra.mxu1 %v4040_v41 }
  0xa0   : > { %2082 = vmatpush2.msra.mxu0 %v2002_v9  ;;  %v432_v13 = vadd.f32 %v2945_v7, %v2881_v6  ;;  %v433_v18 = vadd.f32 %v2946_v15, %v2882_v14  ;;  %3082 = vmatprep.subr.mxu1 %v3650_v0 }
  0xa1   : > { %766 = vmatmul.mubr.f32.gmra.mxu0 %v520_v8  ;;  %v3057_v8 = vld [vmem:[%s3744_s7 + $0x178] sm:$0xff]   ;;  %2083 = vmatprep.subr.mxu0 %v3650_v0 }
  0xa2   : > { %771 = vmatprep.mubr.f32.mxu0 %v3650_v0  ;;  %v3009_v10 = vunpack.c.l.bf16 %v3057_v8  ;;  %2084 = vmatpush2.msra.mxu0 %v2001_v11  ;;  %v3010_v19 = vunpack.c.h.bf16 %v3057_v8 }
  0xa3   : > { %2085 = vmatprep.subr.mxu0 %v3650_v0  ;;  %3114 = vmatpush2.msra.mxu1 %v4051_v48 }
  0xa4   : > { %2086 = vmatpush2.msra.mxu0 %v2000_v16  ;;  %3083 = vmatprep.subr.mxu1 %v3650_v0  ;;  %v530_v20 = vadd.f32 %v3010_v19, %v433_v18 }
  0xa5   : > { %772 = vmatmul.mubr.f32.gmra.mxu0 %v521_v17  ;;  %v529_v17 = vadd.f32 %v3009_v10, %v432_v13  ;;  %3115 = vmatpush2.msra.mxu1 %v4058_v50 }
  0xa6   : > { %777 = vmatprep.mubr.f32.mxu0 %v3650_v0  ;;  %3084 = vmatprep.subr.mxu1 %v3650_v0 }
  0xa7   : > { %3116 = vmatpush2.msra.mxu1 %v4068_v56 }
  0xa8   : > { %3085 = vmatprep.subr.mxu1 %v3650_v0 }
  0xa9   : > { %778 = vmatmul.mubr.f32.gmra.mxu0 %v522_v25  ;;  %3117 = vmatpush2.msra.mxu1 %v2004_v58  ;;  %v571_v25 = vsub.s32 1, %v566_v22 }
  0xaa   : > { %783 = vmatprep.mubr.f32.mxu0 %v3650_v0  ;;  %3086 = vmatprep.subr.mxu1 %v3650_v0 }
  0xab   : > { %3118 = vmatpush2.msra.mxu1 %v2003_v2  ;;  %v4128_v27 = vrot.slane %v563_v24, %v571_v25 }
  0xac   : > { %3087 = vmatprep.subr.mxu1 %v3650_v0 }
  0xad   : > { %784 = vmatmul.mubr.f32.gmra.mxu0 %v523_v34  ;;  %3119 = vmatpush2.msra.mxu1 %v2002_v9 }
  0xae   : > { %789 = vmatprep.mubr.f32.mxu0 %v3650_v0  ;;  %3088 = vmatprep.subr.mxu1 %v3650_v0 }
  0xaf   : > { %3120 = vmatpush2.msra.mxu1 %v2001_v11 }
  0xb0   : > { %3089 = vmatprep.subr.mxu1 %v3650_v0 }
  0xb1   : > { %790 = vmatmul.mubr.f32.gmra.mxu0 %v524_v42  ;;  %3121 = vmatpush2.msra.mxu1 %v2000_v16 }
  0xb2   : > { %795 = vmatprep.mubr.f32.mxu0 %v3650_v0 }
  0xb5   : > { %796 = vmatmul.mubr.f32.gmra.mxu0 %v525_v51 }
  0xb6   : > { %801 = vmatprep.mubr.f32.mxu0 %v3650_v0 }
  0xb9   : > { %802 = vmatmul.mubr.f32.gmra.mxu0 %v526_v59 }
  0xba   : > { %807 = vmatprep.mubr.f32.mxu0 %v3650_v0 }
  0xbd   : > { %808 = vmatmul.mubr.f32.gmra.mxu0 %v527_v4 }
  0xbe   : > { %813 = vmatprep.mubr.f32.mxu0 %v3650_v0 }
  0xc1   : > { %814 = vmatmul.mubr.f32.gmra.mxu0 %v528_v12 }
  0xc2   : > { %819 = vmatprep.mubr.f32.mxu0 %v3650_v0 }
  0xc5   : > { %820 = vmatmul.mubr.f32.gmra.mxu0 %v529_v17 }
  0xc6   : > { %825 = vmatprep.mubr.f32.mxu0 %v3650_v0 }
  0xc9   : > { %826 = vmatmul.mubr.f32.gmra.mxu0 %v530_v20 }
 0x10d   : > { %v641_v28 = vpop.f32.mrf.mxu0 }
 0x10e   : > { %v4131_v29 = vadd.f32 %v641_v28, %v4126_v26 }
 0x10f   : > { %v643_v30 = vpop.f32.mrf.mxu0 }
 0x110   : > { %v1024_v0 = vand.u32 2147483647, %v4131_v29  ;;  %v4135_v31 = vadd.f32 %v643_v30, %v4128_v27  ;;  %v832_v9 = vmax.f32 %v4131_v29, 0.0  ;;  %vm896_vm2 = vcmp.ne.f32.partialorder %v4131_v29, %v4131_v29 }
 0x111   : > { %v647_v32 = vpop.f32.mrf.mxu0 }
 0x112   : > { %v1088_v33 = vsub.f32 0.0, %v1024_v0  ;;  %v1025_v34 = vand.u32 2147483647, %v4135_v31  ;;  %v4139_v35 = vadd.f32 %v647_v32, %v4126_v26  ;;  %v833_v20 = vmax.f32 %v4135_v31, 0.0 }
 0x113   : > { %v649_v36 = vpop.f32.mrf.mxu0  ;;  %vm897_vm1 = vcmp.ne.f32.partialorder %v4135_v31, %v4135_v31 }
 0x114   : > { %v1089_v37 = vsub.f32 0.0, %v1025_v34  ;;  %v4142_v38 = vadd.f32 %v649_v36, %v4128_v27  ;;  %v1152_v39 = vmul.f32 1.442695, %v1088_v33  ;;  %v1026_v40 = vand.u32 2147483647, %v4139_v35 }
 0x115   : > { %v653_v41 = vpop.f32.mrf.mxu0  ;;  %v834_v28 = vmax.f32 %v4139_v35, 0.0  ;;  %vm898_vm7 = vcmp.ne.f32.partialorder %v4139_v35, %v4139_v35 }
 0x116   : > { %v1154_v42 = vmul.f32 1.442695, %v1089_v37  ;;  %v1027_v43 = vand.u32 2147483647, %v4142_v38  ;;  %v1090_v47 = vsub.f32 0.0, %v1026_v40  ;;  %v4150_v48 = vadd.f32 %v653_v41, %v4126_v26 }
 0x117   : > { %v655_v44 = vpop.f32.mrf.mxu0  ;;  %v835_v25 = vmax.f32 %v4142_v38, 0.0  ;;  %vm899_vm5 = vcmp.ne.f32.partialorder %v4142_v38, %v4142_v38 }
 0x118   : > { %3183 = vpow2.f32 %v1154_v42  ;;  %v1091_v45 = vsub.f32 0.0, %v1027_v43  ;;  %v4147_v46 = vadd.f32 %v655_v44, %v4128_v27  ;;  %v1156_v53 = vmul.f32 1.442695, %v1090_v47 }
 0x119   : > { %3185 = vpow2.f32 %v1152_v39  ;;  %v659_v49 = vpop.f32.mrf.mxu0  ;;  %v1028_v54 = vand.u32 2147483647, %v4150_v48  ;;  %vm900_vm10 = vcmp.ne.f32.partialorder %v4150_v48, %v4150_v48 }
 0x11a   : > { %v1158_v50 = vmul.f32 1.442695, %v1091_v45  ;;  %v1029_v51 = vand.u32 2147483647, %v4147_v46  ;;  %v4155_v55 = vadd.f32 %v659_v49, %v4126_v26  ;;  %v837_v33 = vmax.f32 %v4147_v46, 0.0 }
 0x11b   : > { %v661_v52 = vpop.f32.mrf.mxu0  ;;  %v1092_v61 = vsub.f32 0.0, %v1028_v54  ;;  %vm901_vm9 = vcmp.ne.f32.partialorder %v4147_v46, %v4147_v46 }
 0x11c   : > { %3187 = vpow2.f32 %v1158_v50  ;;  %v4158_v57 = vadd.f32 %v661_v52, %v4128_v27  ;;  %v1093_v58 = vsub.f32 0.0, %v1029_v51  ;;  %v1030_v62 = vand.u32 2147483647, %v4155_v55 }
 0x11d   : > { %v665_v56 = vpop.f32.mrf.mxu0  ;;  %3189 = vpow2.f32 %v1156_v53  ;;  %v1160_v10 = vmul.f32 1.442695, %v1092_v61  ;;  %vm902_vm14 = vcmp.ne.f32.partialorder %v4155_v55, %v4155_v55 }
 0x11e   : > { %v4161_v59 = vadd.f32 %v665_v56, %v4126_v26  ;;  %v1031_v1 = vand.u32 2147483647, %v4158_v57  ;;  %v1162_v4 = vmul.f32 1.442695, %v1093_v58  ;;  %v1094_v11 = vsub.f32 0.0, %v1030_v62 }
 0x11f   : > { %v667_v60 = vpop.f32.mrf.mxu0  ;;  %vm903_vm12 = vcmp.ne.f32.partialorder %v4158_v57, %v4158_v57 }
 0x120   : > { %v4166_v2 = vadd.f32 %v667_v60, %v4128_v27  ;;  %v1032_v5 = vand.u32 2147483647, %v4161_v59  ;;  %v1095_v14 = vsub.f32 0.0, %v1031_v1  ;;  %3191 = vpow2.f32 %v1162_v4 }
 0x121   : > { %v671_v63 = vpop.f32.mrf.mxu0  ;;  %3193 = vpow2.f32 %v1160_v10  ;;  %v1164_v30 = vmul.f32 1.442695, %v1094_v11 }
 0x122   : > { %v4169_v3 = vadd.f32 %v671_v63, %v4126_v26  ;;  %v1033_v15 = vand.u32 2147483647, %v4166_v2  ;;  %v1096_v18 = vsub.f32 0.0, %v1032_v5  ;;  %v1166_v36 = vmul.f32 1.442695, %v1095_v14 }
 0x123   : > { %v673_v6 = vpop.f32.mrf.mxu0 }
 0x124   : > { %v4173_v7 = vadd.f32 %v673_v6, %v4128_v27  ;;  %v1034_v16 = vand.u32 2147483647, %v4169_v3  ;;  %v1097_v37 = vsub.f32 0.0, %v1033_v15  ;;  %v1168_v41 = vmul.f32 1.442695, %v1096_v18 }
 0x125   : > { %v4175_v8 = vpop.eup %3183  ;;  %v677_v12 = vpop.f32.mrf.mxu0 }
 0x126   : > { %v4178_v13 = vpop.eup %3185  ;;  %v4183_v17 = vadd.f32 %v677_v12, %v4126_v26  ;;  %v1289_v22 = vadd.f32 1.0, %v4175_v8  ;;  %v1035_v23 = vand.u32 2147483647, %v4173_v7  ;;  %v1098_v39 = vsub.f32 0.0, %v1034_v16 }
 0x127   : > { %v679_v19 = vpop.f32.mrf.mxu0  ;;  %v1280_v32 = vadd.f32 1.0, %v4178_v13  ;;  %v1283_v49 = vmul.f32 -0.5, %v4178_v13  ;;  %v1286_v50 = vand.u32 2147483647, %v4178_v13  ;;  %v1292_v53 = vmul.f32 -0.5, %v4175_v8 }
 0x128   : > { %v4189_v24 = vadd.f32 %v679_v19, %v4128_v27  ;;  %v1036_v40 = vand.u32 2147483647, %v4183_v17  ;;  %3195 = vlog2.f32 %v1289_v22  ;;  %v1099_v45 = vsub.f32 0.0, %v1035_v23 }
 0x129   : > { %v683_v0 = vpop.f32.mrf.mxu0  ;;  %v4195_v34 = vpop.eup %3187  ;;  %3197 = vlog2.f32 %v1280_v32  ;;  %v1170_v58 = vmul.f32 1.442695, %v1097_v37  ;;  %v1172_v60 = vmul.f32 1.442695, %v1098_v39  ;;  %v1295_v10 = vand.u32 2147483647, %v4175_v8 }
 0x12a   : > { %v1037_v42 = vand.u32 2147483647, %v4189_v24  ;;  %v4200_v43 = vadd.f32 %v683_v0, %v4126_v26  ;;  %v1307_v54 = vadd.f32 1.0, %v4195_v34  ;;  %v4210_v56 = vpop.eup %3189  ;;  %3199 = vpow2.f32 %v1164_v30 }
 0x12b   : > { %v685_v44 = vpop.f32.mrf.mxu0  ;;  %v1100_v61 = vsub.f32 0.0, %v1036_v40  ;;  %v1174_v5 = vmul.f32 1.442695, %v1099_v45  ;;  %v1293_v12 = vadd.f32 1.0, %v1292_v53  ;;  %v1284_v14 = vadd.f32 1.0, %v1283_v49 }
 0x12c   : > { %v4203_v47 = vadd.f32 %v685_v44, %v4128_v27  ;;  %v1038_v51 = vand.u32 2147483647, %v4200_v43  ;;  %v1101_v62 = vsub.f32 0.0, %v1037_v42  ;;  %3201 = vlog2.f32 %v1307_v54 }
 0x12d   : > { %v689_v52 = vpop.f32.mrf.mxu0  ;;  %3203 = vpow2.f32 %v1166_v36  ;;  %v1298_v15 = vadd.f32 1.0, %v4210_v56  ;;  %v1176_v16 = vmul.f32 1.442695, %v1100_v61  ;;  %v1310_v19 = vmul.f32 -0.5, %v4195_v34  ;;  %v4223_v32 = vpop.eup %3191 }
 0x12e   : > { %v1039_v63 = vand.u32 2147483647, %v4203_v47  ;;  %v4214_v1 = vadd.f32 %v689_v52, %v4126_v26  ;;  %v1102_v6 = vsub.f32 0.0, %v1038_v51  ;;  %3205 = vpow2.f32 %v1168_v41  ;;  %v4235_v45 = vpop.eup %3193 }
 0x12f   : > { %v691_v4 = vpop.f32.mrf.mxu0  ;;  %3207 = vpow2.f32 %v1170_v58  ;;  %v1178_v22 = vmul.f32 1.442695, %v1101_v62  ;;  %vm4228_vm0 = vcmp.lt.f32.partialorder %v1295_v10, 0.0004427343  ;;  %v1294_v41 = vmul.f32 %v4175_v8, %v1293_v12 }
 0x130   : > { %v4219_v18 = vadd.f32 %v691_v4, %v4128_v27  ;;  %3209 = vpow2.f32 %v1172_v60  ;;  %v1103_v23 = vsub.f32 0.0, %v1039_v63  ;;  %v1040_v30 = vand.u32 2147483647, %v4214_v1 }
 0x131   : > { %v695_v11 = vpop.f32.mrf.mxu0  ;;  %3211 = vpow2.f32 %v1174_v5  ;;  %v1180_v36 = vmul.f32 1.442695, %v1102_v6  ;;  %v1285_v42 = vmul.f32 %v4178_v13, %v1284_v14  ;;  %v1313_v44 = vand.u32 2147483647, %v4195_v34 }
 0x132   : > { %v4226_v37 = vadd.f32 %v695_v11, %v4126_v26  ;;  %3213 = vlog2.f32 %v1298_v15  ;;  %v1041_v49 = vand.u32 2147483647, %v4219_v18  ;;  %v1311_v52 = vadd.f32 1.0, %v1310_v19 }
 0x133   : > { %v697_v0 = vpop.f32.mrf.mxu0  ;;  %3215 = vpow2.f32 %v1176_v16  ;;  %v1182_v53 = vmul.f32 1.442695, %v1103_v23  ;;  %v1104_v8 = vsub.f32 0.0, %v1040_v30  ;;  %v1325_v13 = vadd.f32 1.0, %v4223_v32 }
 0x134   : > { %v4239_v51 = vadd.f32 %v697_v0, %v4128_v27  ;;  %3217 = vpow2.f32 %v1178_v22  ;;  %v1042_v60 = vand.u32 2147483647, %v4226_v37  ;;  %vm4247_vm3 = vcmp.lt.f32.partialorder %v1286_v50, 0.0004427343 }
 0x135   : > { %v701_v40 = vpop.f32.mrf.mxu0  ;;  %v3196_v58 = vpop.eup %3195  ;;  %3219 = vpow2.f32 %v1180_v36  ;;  %v1301_v62 = vmul.f32 -0.5, %v4210_v56  ;;  %vm4255_vm4 = vcmp.lt.f32.partialorder %v1313_v44, 0.0004427343  ;;  %v1105_v11 = vsub.f32 0.0, %v1041_v49 }
 0x136   : > { %v4253_v63 = vadd.f32 %v701_v40, %v4126_v26  ;;  %v1291_v5 = vmul.f32 0.6931472, %v3196_v58  ;;  %3221 = vlog2.f32 %v1325_v13  ;;  %v3198_v10 = vpop.eup %3197  ;;  %v1043_v12 = vand.u32 2147483647, %v4239_v51 }
 0x137   : > { %v703_v54 = vpop.f32.mrf.mxu0  ;;  %v1312_v50 = vmul.f32 %v4195_v34, %v1311_v52  ;;  %v1304_v14 = vand.u32 2147483647, %v4210_v56  ;;  %v4264_v15 = vpop.eup %3199  ;;  %3223 = vpow2.f32 %v1182_v53  ;;  %v1184_v16 = vmul.f32 1.442695, %v1104_v8 }
 0x138   : > { %v1297_v22 = vsel %vm4228_vm0, %v1294_v41, %v1291_v5  ;;  %v1282_v23 = vmul.f32 0.6931472, %v3198_v10  ;;  %v1106_v0 = vsub.f32 0.0, %v1042_v60  ;;  %v4269_v36 = vadd.f32 %v703_v54, %v4128_v27 }
 0x139   : > { %v707_v4 = vpop.f32.mrf.mxu0  ;;  %v3202_v30 = vpop.eup %3201  ;;  %v1302_v40 = vadd.f32 1.0, %v1301_v62  ;;  %v1328_v44 = vmul.f32 -0.5, %v4223_v32  ;;  %v1044_v49 = vand.u32 2147483647, %v4253_v63  ;;  %v1857_v52 = vadd.f32 %v1297_v22, %v833_v20 }
 0x13a   : > { %v4272_v34 = vpop.eup %3203  ;;  %v1288_v39 = vsel %vm4247_vm3, %v1285_v42, %v1282_v23  ;;  %v1309_v41 = vmul.f32 0.6931472, %v3202_v30  ;;  %v1186_v13 = vmul.f32 1.442695, %v1105_v11  ;;  %v1107_v54 = vsub.f32 0.0, %v1043_v12 }
 0x13b   : > { %v709_v19 = vpop.f32.mrf.mxu0  ;;  %v4279_v8 = vpop.eup %3205  ;;  %v4282_v58 = vadd.f32 %v707_v4, %v4126_v26  ;;  %vm4284_vm6 = vcmp.lt.f32.partialorder %v1304_v14, 0.0004427343  ;;  %v1921_v42 = vsel %vm897_vm1, %v4135_v31, %v1857_v52  ;;  %v1856_v61 = vadd.f32 %v1288_v39, %v832_v9 }
 0x13c   : > { %v4288_v62 = vpop.eup %3207  ;;  %v4291_v20 = vadd.f32 %v709_v19, %v4128_v27  ;;  %v1315_v4 = vsel %vm4255_vm4, %v1312_v50, %v1309_v41  ;;  %3225 = vpow2.f32 %v1184_v16  ;;  %v1188_v11 = vmul.f32 1.442695, %v1106_v0  ;;  %2087 = vmatprep.mubr.f32.mxu0 %v1921_v42 }
 0x13d   : > { %v713_v53 = vpop.f32.mrf.mxu0  ;;  %v4303_v10 = vpop.eup %3209  ;;  %v1045_v12 = vand.u32 2147483647, %v4269_v36  ;;  %v1329_v14 = vadd.f32 1.0, %v1328_v44  ;;  %v1108_v31 = vsub.f32 0.0, %v1044_v49  ;;  %v1920_v6 = vsel %vm896_vm2, %v4131_v29, %v1856_v61 }
 0x13e   : > { %v4306_v19 = vpop.eup %3211  ;;  %v4309_v9 = vadd.f32 %v713_v53, %v4126_v26  ;;  %v1859_v50 = vadd.f32 %v1315_v4, %v835_v25  ;;  %3227 = vpow2.f32 %v1186_v13  ;;  %v1046_v23 = vand.u32 2147483647, %v4282_v58  ;;  %2088 = vmatmul.mubr.f32.vlgmr.msra.gmra.mxu0 %v1920_v6 }
 0x13f   : > { %v715_v5 = vpop.f32.mrf.mxu0  ;;  %v3214_v22 = vpop.eup %3213  ;;  %v1303_v0 = vmul.f32 %v4210_v56, %v1302_v40  ;;  %v1190_v49 = vmul.f32 1.442695, %v1107_v54  ;;  %v1047_v52 = vand.u32 2147483647, %v4291_v20  ;;  %3229 = vpow2.f32 %v1188_v11 }
 0x140   : > { %5733 = vst [vmem:[#allocation5_spill] sm:$0xff] %v4309_v9  ;;  %v4319_v30 = vadd.f32 %v715_v5, %v4128_v27  ;;  %v4322_v44 = vpop.eup %3215  ;;  %v1923_v29 = vsel %vm899_vm5, %v4142_v38, %v1859_v50  ;;  %v1300_v25 = vmul.f32 0.6931472, %v3214_v22  ;;  %v1109_v41 = vsub.f32 0.0, %v1045_v12 }
 0x141   : > { %v719_v16 = vpop.f32.mrf.mxu0  ;;  %v4329_v39 = vpop.eup %3217  ;;  %2092 = vmatprep.mubr.f32.mxu0 %v1923_v29  ;;  %v1330_v13 = vmul.f32 %v4223_v32, %v1329_v14  ;;  %v1331_v56 = vand.u32 2147483647, %v4223_v32  ;;  %v1192_v54 = vmul.f32 1.442695, %v1108_v31  ;;  %v1048_v42 = vand.u32 2147483647, %v4309_v9 }
 0x142   : > { %v4333_v40 = vpop.eup %3219  ;;  %v1306_v61 = vsel %vm4284_vm6, %v1303_v0, %v1300_v25  ;;  %v1316_v5 = vadd.f32 1.0, %v4235_v45  ;;  %v1110_v6 = vsub.f32 0.0, %v1046_v23  ;;  %v1049_v11 = vand.u32 2147483647, %v4319_v30 }
 0x143   : > { %v721_v53 = vpop.f32.mrf.mxu0  ;;  %v3222_v4 = vpop.eup %3221  ;;  %v4341_v12 = vadd.f32 %v719_v16, %v4126_v26  ;;  %v1858_v32 = vadd.f32 %v1306_v61, %v834_v28  ;;  %3231 = vpow2.f32 %v1190_v49  ;;  %v1111_v14 = vsub.f32 0.0, %v1047_v52 }
 0x144   : > { %v4346_v31 = vadd.f32 %v721_v53, %v4128_v27  ;;  %v1327_v60 = vmul.f32 0.6931472, %v3222_v4  ;;  %v4348_v50 = vpop.eup %3223  ;;  %v1194_v22 = vmul.f32 1.442695, %v1109_v41  ;;  %vm1332_vm8 = vcmp.lt.f32.partialorder %v1331_v56, 0.0004427343 }
 0x145   : > { %v725_v38 = vpop.f32.mrf.mxu0  ;;  %5734 = vst [vmem:[#allocation6_spill] sm:$0xff] %v4341_v12  ;;  %v1922_v23 = vsel %vm898_vm7, %v4139_v35, %v1858_v32  ;;  %v1112_v0 = vsub.f32 0.0, %v1048_v42  ;;  %3233 = vlog2.f32 %v1316_v5  ;;  %v1196_v52 = vmul.f32 1.442695, %v1110_v6 }
 0x146   : > { %5735 = vst [vmem:[#allocation7_spill] sm:$0xff] %v4346_v31  ;;  %v4355_v16 = vadd.f32 %v725_v38, %v4126_v26  ;;  %2093 = vmatmul.mubr.f32.gmra.mxu0 %v1922_v23  ;;  %v1333_v28 = vsel %vm1332_vm8, %v1330_v13, %v1327_v60  ;;  %v1113_v29 = vsub.f32 0.0, %v1049_v11  ;;  %v1050_v25 = vand.u32 2147483647, %v4341_v12 }
 0x147   : > { %v727_v49 = vpop.f32.mrf.mxu0  ;;  %v1861_v53 = vadd.f32 %v1333_v28, %v837_v33  ;;  %3235 = vpow2.f32 %v1192_v54  ;;  %v1198_v35 = vmul.f32 1.442695, %v1111_v14  ;;  %v1051_v41 = vand.u32 2147483647, %v4346_v31 }
 0x148   : > { %5736 = vst [vmem:[#allocation8_spill] sm:$0xff] %v4355_v16  ;;  %v1343_v56 = vadd.f32 1.0, %v4272_v34  ;;  %3237 = vpow2.f32 %v1194_v22  ;;  %v1052_v13 = vand.u32 2147483647, %v4355_v16  ;;  %v1200_v38 = vmul.f32 1.442695, %v1112_v0 }
 0x149   : > { %v1925_v42 = vsel %vm901_vm9, %v4147_v46, %v1861_v53  ;;  %v4366_v61 = vpop.eup %3225  ;;  %v1319_v5 = vmul.f32 -0.5, %v4235_v45  ;;  %v4370_v4 = vadd.f32 %v727_v49, %v4128_v27  ;;  %v731_v33 = vpop.f32.mrf.mxu0  ;;  %v1202_v54 = vmul.f32 1.442695, %v1113_v29 }
 0x14a   : > { %2097 = vmatprep.mubr.f32.mxu0 %v1925_v42  ;;  %3239 = vlog2.f32 %v1343_v56  ;;  %v1114_v6 = vsub.f32 0.0, %v1050_v25  ;;  %v1334_v11 = vadd.f32 1.0, %v4264_v15  ;;  %v1115_v46 = vsub.f32 0.0, %v1051_v41 }
 0x14b   : > { %5737 = vst [vmem:[#allocation9_spill] sm:$0xff] %v4370_v4  ;;  %3241 = vpow2.f32 %v1196_v52  ;;  %v4373_v32 = vpop.eup %3227  ;;  %v836_v14 = vmax.f32 %v4150_v48, 0.0  ;;  %v1116_v60 = vsub.f32 0.0, %v1052_v13  ;;  %v1320_v28 = vadd.f32 1.0, %v1319_v5  ;;  %v733_v52 = vpop.f32.mrf.mxu0 }
 0x14c   : > { %3243 = vpow2.f32 %v1198_v35  ;;  %v4378_v0 = vpop.eup %3229  ;;  %v1053_v49 = vand.u32 2147483647, %v4370_v4  ;;  %v1361_v29 = vadd.f32 1.0, %v4288_v62  ;;  %v1204_v25 = vmul.f32 1.442695, %v1114_v6 }
 0x14d   : > { %3245 = vlog2.f32 %v1334_v11  ;;  %v4383_v53 = vadd.f32 %v731_v33, %v4126_v26  ;;  %v1206_v41 = vmul.f32 1.442695, %v1115_v46  ;;  %v1322_v56 = vand.u32 2147483647, %v4235_v45  ;;  %v737_v21 = vpop.f32.mrf.mxu0 }
 0x14e   : > { %3247 = vpow2.f32 %v1200_v38  ;;  %v1346_v42 = vmul.f32 -0.5, %v4272_v34  ;;  %v1352_v13 = vadd.f32 1.0, %v4279_v8  ;;  %v1208_v5 = vmul.f32 1.442695, %v1116_v60 }
 0x14f   : > { %3249 = vpow2.f32 %v1202_v54  ;;  %5738 = vst [vmem:[#allocation10_spill] sm:$0xff] %v4383_v53  ;;  %v1349_v54 = vand.u32 2147483647, %v4272_v34  ;;  %v1337_v33 = vmul.f32 -0.5, %v4264_v15  ;;  %v1321_v6 = vmul.f32 %v4235_v45, %v1320_v28 }
 0x150   : > { %v4391_v38 = vpop.eup %3231  ;;  %3251 = vlog2.f32 %v1361_v29  ;;  %v1117_v11 = vsub.f32 0.0, %v1053_v49  ;;  %v1054_v23 = vand.u32 2147483647, %v4383_v53  ;;  %v1340_v22 = vand.u32 2147483647, %v4264_v15 }
 0x151   : > { %3253 = vlog2.f32 %v1352_v13  ;;  %v4400_v60 = vadd.f32 %v733_v52, %v4128_v27  ;;  %vm1323_vm11 = vcmp.lt.f32.partialorder %v1322_v56, 0.0004427343  ;;  %v1347_v45 = vadd.f32 1.0, %v1346_v42  ;;  %v739_v13 = vpop.f32.mrf.mxu0 }
 0x152   : > { %v3234_v35 = vpop.eup %3233  ;;  %3255 = vpow2.f32 %v1204_v25  ;;  %vm4406_vm13 = vcmp.lt.f32.partialorder %v1349_v54, 0.0004427343  ;;  %v1338_v29 = vadd.f32 1.0, %v1337_v33  ;;  %v4411_v25 = vadd.f32 %v737_v21, %v4126_v26 }
 0x153   : > { %5739 = vst [vmem:[#allocation11_spill] sm:$0xff] %v4400_v60  ;;  %3257 = vpow2.f32 %v1206_v41  ;;  %v1318_v16 = vmul.f32 0.6931472, %v3234_v35  ;;  %v1210_v35 = vmul.f32 1.442695, %v1117_v11  ;;  %v1364_v56 = vmul.f32 -0.5, %v4288_v62  ;;  %v743_v12 = vpop.f32.mrf.mxu0 }
 0x154   : > { %v4404_v28 = vpop.eup %3235  ;;  %3259 = vpow2.f32 %v1208_v5  ;;  %5742 = vst [vmem:[#allocation12_spill] sm:$0xff] %v4411_v25  ;;  %v1379_v42 = vadd.f32 1.0, %v4306_v19  ;;  %v1118_v5 = vsub.f32 0.0, %v1054_v23  ;;  %vm4419_vm15 = vcmp.lt.f32.partialorder %v1340_v22, 0.0004427343 }
 0x155   : > { %v4413_v52 = vpop.eup %3237  ;;  %v1324_v41 = vsel %vm1323_vm11, %v1321_v6, %v1318_v16  ;;  %v1055_v21 = vand.u32 2147483647, %v4400_v60  ;;  %v1348_v6 = vmul.f32 %v4272_v34, %v1347_v45  ;;  %v1367_v11 = vand.u32 2147483647, %v4288_v62 }
 0x156   : > { %v1860_v53 = vadd.f32 %v1324_v41, %v836_v14  ;;  %v1355_v4 = vmul.f32 -0.5, %v4279_v8  ;;  %v1339_v23 = vmul.f32 %v4264_v15, %v1338_v29  ;;  %v1056_v41 = vand.u32 2147483647, %v4411_v25 }
 0x157   : > { %v3240_v46 = vpop.eup %3239  ;;  %3261 = vlog2.f32 %v1379_v42  ;;  %v4440_v45 = vadd.f32 %v739_v13, %v4128_v27  ;;  %v1212_v15 = vmul.f32 1.442695, %v1118_v5  ;;  %v1119_v25 = vsub.f32 0.0, %v1055_v21 }
 0x158   : > { %v4424_v33 = vpop.eup %3241  ;;  %v1345_v16 = vmul.f32 0.6931472, %v3240_v46  ;;  %v1924_v22 = vsel %vm900_vm10, %v4150_v48, %v1860_v53  ;;  %3263 = vpow2.f32 %v1210_v35  ;;  %v1365_v46 = vadd.f32 1.0, %v1364_v56 }
 0x159   : > { %v4429_v14 = vpop.eup %3243  ;;  %2098 = vmatmul.mubr.f32.gmra.mxu0 %v1924_v22  ;;  %v5745_v48 = vmax.f32 %v4158_v57, 0.0  ;;  %vm905_vm0 = vcmp.ne.f32.partialorder %v4166_v2, %v4166_v2  ;;  %vm4450_vm1 = vcmp.lt.f32.partialorder %v1367_v11, 0.0004427343  ;;  %vm904_vm2 = vcmp.ne.f32.partialorder %v4161_v59, %v4161_v59 }
 0x15a   : > { %v3246_v60 = vpop.eup %3245  ;;  %v1351_v34 = vsel %vm4406_vm13, %v1348_v6, %v1345_v16  ;;  %v1356_v56 = vadd.f32 1.0, %v1355_v4  ;;  %v1358_v13 = vand.u32 2147483647, %v4279_v8  ;;  %v1370_v42 = vadd.f32 1.0, %v4303_v10 }
 0x15b   : > { %v4442_v31 = vpop.eup %3247  ;;  %v1863_v53 = vadd.f32 %v1351_v34, %v5745_v48  ;;  %v1336_v29 = vmul.f32 0.6931472, %v3246_v60  ;;  %v1120_v21 = vsub.f32 0.0, %v1056_v41  ;;  %v4465_v16 = vadd.f32 %v743_v12, %v4126_v26  ;;  %v745_v48 = vpop.f32.mrf.mxu0 }
 0x15c   : > { %v4448_v35 = vpop.eup %3249  ;;  %v5748_v4 = vmax.f32 %v4155_v55, 0.0  ;;  %v1366_v22 = vmul.f32 %v4288_v62, %v1365_v46  ;;  %v1057_v34 = vand.u32 2147483647, %v4440_v45  ;;  %3265 = vlog2.f32 %v1370_v42 }
 0x15d   : > { %v1927_v60 = vsel %vm903_vm12, %v4158_v57, %v1863_v53  ;;  %v1342_v5 = vsel %vm4419_vm15, %v1339_v23, %v1336_v29  ;;  %v3252_v6 = vpop.eup %3251  ;;  %3267 = vpow2.f32 %v1212_v15  ;;  %v1214_v57 = vmul.f32 1.442695, %v1119_v25 }
 0x15e   : > { %2102 = vmatprep.mubr.f32.mxu0 %v1927_v60  ;;  %v1862_v11 = vadd.f32 %v1342_v5, %v5748_v4  ;;  %v3254_v9 = vpop.eup %3253  ;;  %v1363_v54 = vmul.f32 0.6931472, %v3252_v6  ;;  %v1382_v23 = vmul.f32 -0.5, %v4306_v19  ;;  %v1357_v62 = vmul.f32 %v4279_v8, %v1356_v56  ;;  %v749_v56 = vpop.f32.mrf.mxu0 }
 0x15f   : > { %v4472_v41 = vpop.eup %3255  ;;  %v1354_v53 = vmul.f32 0.6931472, %v3254_v9  ;;  %vm1359_vm3 = vcmp.lt.f32.partialorder %v1358_v13, 0.0004427343  ;;  %v1216_v15 = vmul.f32 1.442695, %v1120_v21  ;;  %v4490_v8 = vadd.f32 %v745_v48, %v4128_v27 }
 0x160   : > { %v1926_v12 = vsel %vm902_vm14, %v4155_v55, %v1862_v11  ;;  %v4479_v46 = vpop.eup %3257  ;;  %v1369_v25 = vsel %vm4450_vm1, %v1366_v22, %v1363_v54  ;;  %v1058_v29 = vand.u32 2147483647, %v4465_v16  ;;  %v1397_v42 = vadd.f32 1.0, %v4329_v39 }
 0x161   : > { %2103 = vmatmul.mubr.f32.gmra.mxu0 %v1926_v12  ;;  %v4485_v60 = vpop.eup %3259  ;;  %v5749_v5 = vmax.f32 %v4166_v2, 0.0  ;;  %v1360_v9 = vsel %vm1359_vm3, %v1357_v62, %v1354_v53  ;;  %v1121_v6 = vsub.f32 0.0, %v1057_v34  ;;  %v5750_v13 = vmax.f32 %v4161_v59, 0.0 }
 0x162   : > { %v1383_v4 = vadd.f32 1.0, %v1382_v23  ;;  %v1385_v21 = vand.u32 2147483647, %v4306_v19  ;;  %3269 = vlog2.f32 %v1397_v42  ;;  %v843_v22 = vmax.f32 %v4173_v7, 0.0 }
 0x163   : > { %v1865_v55 = vadd.f32 %v1369_v25, %v5749_v5  ;;  %v1864_v49 = vadd.f32 %v1360_v9, %v5750_v13  ;;  %3271 = vpow2.f32 %v1214_v57  ;;  %v1373_v34 = vmul.f32 -0.5, %v4303_v10 }
 0x164   : > { %vm907_vm4 = vcmp.ne.f32.partialorder %v4173_v7, %v4173_v7  ;;  %v1122_v54 = vsub.f32 0.0, %v1058_v29  ;;  %v4508_v57 = vadd.f32 %v749_v56, %v4126_v26  ;;  %v3262_v23 = vpop.eup %3261  ;;  %3273 = vpow2.f32 %v1216_v15  ;;  %v751_v15 = vpop.f32.mrf.mxu0 }
 0x165   : > { %v1929_v11 = vsel %vm905_vm0, %v4166_v2, %v1865_v55  ;;  %v1928_v48 = vsel %vm904_vm2, %v4161_v59, %v1864_v49  ;;  %v1218_v2 = vmul.f32 1.442695, %v1121_v6  ;;  %v1059_v12 = vand.u32 2147483647, %v4490_v8  ;;  %v4512_v62 = vpop.eup %3263 }
 0x166   : > { %2107 = vmatprep.mubr.f32.mxu1 %v1929_v11  ;;  %v1388_v53 = vadd.f32 1.0, %v4322_v44  ;;  %v1381_v25 = vmul.f32 0.6931472, %v3262_v23  ;;  %v1384_v59 = vmul.f32 %v4306_v19, %v1383_v4  ;;  %vm1386_vm5 = vcmp.lt.f32.partialorder %v1385_v21, 0.0004427343 }
 0x167   : > { %2108 = vmatmul.mubr.f32.vlgmr.msra.gmra.mxu1 %v1928_v48  ;;  %v842_v42 = vmax.f32 %v4169_v3, 0.0  ;;  %v1374_v29 = vadd.f32 1.0, %v1373_v34  ;;  %v1376_v5 = vand.u32 2147483647, %v4303_v10  ;;  %v1400_v55 = vmul.f32 -0.5, %v4329_v39 }
 0x168   : > { %3275 = vlog2.f32 %v1388_v53  ;;  %v1387_v9 = vsel %vm1386_vm5, %v1384_v59, %v1381_v25  ;;  %v1220_v6 = vmul.f32 1.442695, %v1122_v54  ;;  %v1060_v56 = vand.u32 2147483647, %v4508_v57  ;;  %v755_v53 = vpop.f32.mrf.mxu0 }
 0x169   : > { %v1415_v13 = vadd.f32 1.0, %v4348_v50  ;;  %3277 = vpow2.f32 %v1218_v2  ;;  %v1867_v49 = vadd.f32 %v1387_v9, %v843_v22  ;;  %vm906_vm6 = vcmp.ne.f32.partialorder %v4169_v3, %v4169_v3  ;;  %v3266_v4 = vpop.eup %3265 }
 0x16a   : > { %v1123_v19 = vsub.f32 0.0, %v1059_v12  ;;  %v845_v21 = vmax.f32 %v4189_v24, 0.0  ;;  %v1403_v11 = vand.u32 2147483647, %v4329_v39  ;;  %v4525_v34 = vadd.f32 %v751_v15, %v4128_v27  ;;  %v4527_v48 = vpop.eup %3267 }
 0x16b   : > { %3279 = vlog2.f32 %v1415_v13  ;;  %v1931_v22 = vsel %vm907_vm4, %v4173_v7, %v1867_v49  ;;  %v1372_v54 = vmul.f32 0.6931472, %v3266_v4  ;;  %v1375_v23 = vmul.f32 %v4303_v10, %v1374_v29 }
 0x16c   : > { %v1401_v2 = vadd.f32 1.0, %v1400_v55  ;;  %2112 = vmatprep.mubr.f32.mxu1 %v1931_v22  ;;  %3281 = vpow2.f32 %v1220_v6  ;;  %vm1377_vm7 = vcmp.lt.f32.partialorder %v1376_v5, 0.0004427343  ;;  %vm909_vm8 = vcmp.ne.f32.partialorder %v4189_v24, %v4189_v24  ;;  %v757_v22 = vpop.f32.mrf.mxu0 }
 0x16d   : > { %v1124_v12 = vsub.f32 0.0, %v1060_v56  ;;  %v1378_v25 = vsel %vm1377_vm7, %v1375_v23, %v1372_v54  ;;  %v1222_v59 = vmul.f32 1.442695, %v1123_v19  ;;  %v1391_v15 = vmul.f32 -0.5, %v4322_v44 }
 0x16e   : > { %v1406_v9 = vadd.f32 1.0, %v4333_v40  ;;  %v1866_v13 = vadd.f32 %v1378_v25, %v842_v42  ;;  %vm4538_vm9 = vcmp.lt.f32.partialorder %v1403_v11, 0.0004427343  ;;  %v1061_v10 = vand.u32 2147483647, %v4525_v34 }
 0x16f   : > { %v1418_v29 = vmul.f32 -0.5, %v4348_v50  ;;  %v3270_v5 = vpop.eup %3269  ;;  %v1402_v55 = vmul.f32 %v4329_v39, %v1401_v2  ;;  %v844_v6 = vmax.f32 %v4183_v17, 0.0  ;;  %v4547_v56 = vadd.f32 %v755_v53, %v4126_v26 }
 0x170   : > { %3283 = vlog2.f32 %v1406_v9  ;;  %v4549_v49 = vpop.eup %3271  ;;  %v1930_v42 = vsel %vm906_vm6, %v4169_v3, %v1866_v13  ;;  %v1399_v19 = vmul.f32 0.6931472, %v3270_v5  ;;  %v1224_v4 = vmul.f32 1.442695, %v1124_v12 }
 0x171   : > { %5753 = vst [vmem:[#allocation13_spill] sm:$0xff] %v4547_v56  ;;  %v1394_v11 = vand.u32 2147483647, %v4322_v44  ;;  %2113 = vmatmul.mubr.f32.gmra.mxu1 %v1930_v42  ;;  %3285 = vpow2.f32 %v1222_v59  ;;  %vm908_vm10 = vcmp.ne.f32.partialorder %v4183_v17, %v4183_v17  ;;  %v1392_v39 = vadd.f32 1.0, %v1391_v15  ;;  %v4559_v23 = vpop.eup %3273 }
 0x172   : > { %v1433_v54 = vadd.f32 1.0, %v4373_v32  ;;  %v1405_v2 = vsel %vm4538_vm9, %v1402_v55, %v1399_v19  ;;  %v1125_v53 = vsub.f32 0.0, %v1061_v10  ;;  %v1419_v3 = vadd.f32 1.0, %v1418_v29  ;;  %v761_v55 = vpop.f32.mrf.mxu0 }
 0x173   : > { %v1421_v12 = vand.u32 2147483647, %v4348_v50  ;;  %v1869_v25 = vadd.f32 %v1405_v2, %v845_v21  ;;  %v1062_v9 = vand.u32 2147483647, %v4547_v56  ;;  %v4566_v59 = vadd.f32 %v757_v22, %v4128_v27 }
 0x174   : > { %3287 = vlog2.f32 %v1433_v54  ;;  %vm4568_vm11 = vcmp.lt.f32.partialorder %v1394_v11, 0.0004427343  ;;  %v847_v7 = vmax.f32 %v4203_v47, 0.0  ;;  %vm911_vm12 = vcmp.ne.f32.partialorder %v4203_v47, %v4203_v47  ;;  %v763_v15 = vpop.f32.mrf.mxu0 }
 0x175   : > { %v3276_v13 = vpop.eup %3275  ;;  %3289 = vpow2.f32 %v1224_v4  ;;  %v1933_v21 = vsel %vm909_vm8, %v4189_v24, %v1869_v25  ;;  %v1393_v29 = vmul.f32 %v4322_v44, %v1392_v39  ;;  %v1409_v5 = vmul.f32 -0.5, %v4333_v40 }
 0x176   : > { %v1390_v10 = vmul.f32 0.6931472, %v3276_v13  ;;  %v4581_v42 = vpop.eup %3277  ;;  %2117 = vmatprep.mubr.f32.mxu1 %v1933_v21  ;;  %v1226_v19 = vmul.f32 1.442695, %v1125_v53  ;;  %v1420_v4 = vmul.f32 %v4348_v50, %v1419_v3  ;;  %vm4584_vm13 = vcmp.lt.f32.partialorder %v1421_v12, 0.0004427343 }
 0x177   : > { %v1424_v22 = vadd.f32 1.0, %v4366_v61  ;;  %v1126_v44 = vsub.f32 0.0, %v1062_v9  ;;  %v1412_v39 = vand.u32 2147483647, %v4333_v40  ;;  %v1063_v2 = vand.u32 2147483647, %v4566_v59 }
 0x178   : > { %v3280_v54 = vpop.eup %3279  ;;  %v1396_v24 = vsel %vm4568_vm11, %v1393_v29, %v1390_v10  ;;  %v4594_v53 = vadd.f32 %v761_v55, %v4126_v26  ;;  %v846_v3 = vmax.f32 %v4200_v43, 0.0  ;;  %vm910_vm14 = vcmp.ne.f32.partialorder %v4200_v43, %v4200_v43 }
 0x179   : > { %v1868_v25 = vadd.f32 %v1396_v24, %v844_v6  ;;  %v1417_v13 = vmul.f32 0.6931472, %v3280_v54  ;;  %3291 = vlog2.f32 %v1424_v22  ;;  %v4596_v50 = vpop.eup %3281  ;;  %v1410_v12 = vadd.f32 1.0, %v1409_v5 }
 0x17a   : > { %v1436_v9 = vmul.f32 -0.5, %v4373_v32  ;;  %3293 = vpow2.f32 %v1226_v19  ;;  %v1451_v10 = vadd.f32 1.0, %v4391_v38  ;;  %v1228_v55 = vmul.f32 1.442695, %v1126_v44 }
 0x17b   : > { %v1932_v6 = vsel %vm908_vm10, %v4183_v17, %v1868_v25  ;;  %v1423_v21 = vsel %vm4584_vm13, %v1420_v4, %v1417_v13  ;;  %v1127_v22 = vsub.f32 0.0, %v1063_v2  ;;  %v1439_v5 = vand.u32 2147483647, %v4373_v32  ;;  %v767_v25 = vpop.f32.mrf.mxu0 }
 0x17c   : > { %2118 = vmatmul.mubr.f32.gmra.mxu1 %v1932_v6  ;;  %v1871_v29 = vadd.f32 %v1423_v21, %v847_v7  ;;  %vm4610_vm15 = vcmp.lt.f32.partialorder %v1412_v39, 0.0004427343  ;;  %v1064_v56 = vand.u32 2147483647, %v4594_v53  ;;  %v4616_v17 = vadd.f32 %v763_v15, %v4128_v27 }
 0x17d   : > { %v3284_v54 = vpop.eup %3283  ;;  %3295 = vlog2.f32 %v1451_v10  ;;  %v1411_v4 = vmul.f32 %v4333_v40, %v1410_v12  ;;  %v1437_v11 = vadd.f32 1.0, %v1436_v9  ;;  %v849_v39 = vmax.f32 %v4219_v18, 0.0 }
 0x17e   : > { %v1935_v7 = vsel %vm911_vm12, %v4203_v47, %v1871_v29  ;;  %v1408_v19 = vmul.f32 0.6931472, %v3284_v54  ;;  %v4623_v44 = vpop.eup %3285  ;;  %vm913_vm0 = vcmp.ne.f32.partialorder %v4219_v18, %v4219_v18  ;;  %v1427_v2 = vmul.f32 -0.5, %v4366_v61 }
 0x17f   : > { %2122 = vmatprep.mubr.f32.mxu1 %v1935_v7  ;;  %v1442_v13 = vadd.f32 1.0, %v4378_v0  ;;  %3297 = vpow2.f32 %v1228_v55  ;;  %v1230_v15 = vmul.f32 1.442695, %v1127_v22  ;;  %vm4632_vm1 = vcmp.lt.f32.partialorder %v1439_v5, 0.0004427343  ;;  %v769_v5 = vpop.f32.mrf.mxu0 }
 0x180   : > { %v1414_v47 = vsel %vm4610_vm15, %v1411_v4, %v1408_v19  ;;  %v1128_v6 = vsub.f32 0.0, %v1064_v56  ;;  %v1065_v21 = vand.u32 2147483647, %v4616_v17  ;;  %v1438_v54 = vmul.f32 %v4373_v32, %v1437_v11 }
 0x181   : > { %v3288_v12 = vpop.eup %3287  ;;  %v1870_v9 = vadd.f32 %v1414_v47, %v846_v3  ;;  %3299 = vlog2.f32 %v1442_v13  ;;  %v848_v55 = vmax.f32 %v4214_v1, 0.0  ;;  %v1430_v24 = vand.u32 2147483647, %v4366_v61 }
 0x182   : > { %v4637_v10 = vpop.eup %3289  ;;  %v1435_v29 = vmul.f32 0.6931472, %v3288_v12  ;;  %vm912_vm2 = vcmp.ne.f32.partialorder %v4214_v1, %v4214_v1  ;;  %v1428_v56 = vadd.f32 1.0, %v1427_v2  ;;  %v1454_v3 = vmul.f32 -0.5, %v4391_v38 }
 0x183   : > { %v1934_v22 = vsel %vm910_vm14, %v4200_v43, %v1870_v9  ;;  %3301 = vpow2.f32 %v1230_v15  ;;  %v4652_v7 = vadd.f32 %v767_v25, %v4126_v26  ;;  %v1469_v19 = vadd.f32 1.0, %v4413_v52 }
 0x184   : > { %2123 = vmatmul.mubr.f32.gmra.mxu1 %v1934_v22  ;;  %v1441_v32 = vsel %vm4632_vm1, %v1438_v54, %v1435_v29  ;;  %v1232_v11 = vmul.f32 1.442695, %v1128_v6  ;;  %v1129_v43 = vsub.f32 0.0, %v1065_v21  ;;  %v851_v13 = vmax.f32 %v4239_v51, 0.0  ;;  %v773_v6 = vpop.f32.mrf.mxu0 }
 0x185   : > { %v1873_v4 = vadd.f32 %v1441_v32, %v849_v39  ;;  %vm4656_vm3 = vcmp.lt.f32.partialorder %v1430_v24, 0.0004427343  ;;  %v1445_v15 = vmul.f32 -0.5, %v4378_v0  ;;  %v4662_v40 = vadd.f32 %v769_v5, %v4128_v27 }
 0x186   : > { %v3292_v47 = vpop.eup %3291  ;;  %3303 = vlog2.f32 %v1469_v19  ;;  %v1429_v12 = vmul.f32 %v4366_v61, %v1428_v56  ;;  %v1455_v9 = vadd.f32 1.0, %v1454_v3  ;;  %vm915_vm4 = vcmp.ne.f32.partialorder %v4239_v51, %v4239_v51  ;;  %v775_v2 = vpop.f32.mrf.mxu0 }
 0x187   : > { %v1937_v39 = vsel %vm913_vm0, %v4219_v18, %v1873_v4  ;;  %v1426_v25 = vmul.f32 0.6931472, %v3292_v47  ;;  %v4669_v21 = vpop.eup %3293  ;;  %v1457_v29 = vand.u32 2147483647, %v4391_v38  ;;  %v1066_v54 = vand.u32 2147483647, %v4652_v7 }
 0x188   : > { %2127 = vmatprep.mubr.f32.mxu1 %v1937_v39  ;;  %v1460_v24 = vadd.f32 1.0, %v4404_v28  ;;  %3305 = vpow2.f32 %v1232_v11  ;;  %v1234_v22 = vmul.f32 1.442695, %v1129_v43  ;;  %v850_v61 = vmax.f32 %v4226_v37, 0.0 }
 0x189   : > { %v1432_v18 = vsel %vm4656_vm3, %v1429_v12, %v1426_v25  ;;  %v1446_v5 = vadd.f32 1.0, %v1445_v15  ;;  %v1067_v32 = vand.u32 2147483647, %v4662_v40  ;;  %v4681_v19 = vadd.f32 %v773_v6, %v4126_v26 }
 0x18a   : > { %v3296_v56 = vpop.eup %3295  ;;  %v1872_v3 = vadd.f32 %v1432_v18, %v848_v55  ;;  %v1456_v47 = vmul.f32 %v4391_v38, %v1455_v9  ;;  %v1472_v39 = vmul.f32 -0.5, %v4413_v52  ;;  %3307 = vlog2.f32 %v1460_v24 }
 0x18b   : > { %v1453_v4 = vmul.f32 0.6931472, %v3296_v56  ;;  %vm1458_vm5 = vcmp.lt.f32.partialorder %v1457_v29, 0.0004427343  ;;  %v1130_v43 = vsub.f32 0.0, %v1066_v54  ;;  %3309 = vpow2.f32 %v1234_v22 }
 0x18c   : > { %v1936_v11 = vsel %vm912_vm2, %v4214_v1, %v1872_v3  ;;  %v1448_v55 = vand.u32 2147483647, %v4378_v0  ;;  %v4690_v15 = vpop.eup %3297  ;;  %vm914_vm6 = vcmp.ne.f32.partialorder %v4226_v37, %v4226_v37  ;;  %v1487_v38 = vadd.f32 1.0, %v4429_v14 }
 0x18d   : > { %2128 = vmatmul.mubr.f32.gmra.mxu1 %v1936_v11  ;;  %v1459_v25 = vsel %vm1458_vm5, %v1456_v47, %v1453_v4  ;;  %v1447_v6 = vmul.f32 %v4378_v0, %v1446_v5  ;;  %v1131_v1 = vsub.f32 0.0, %v1067_v32  ;;  %v1068_v29 = vand.u32 2147483647, %v4681_v19  ;;  %v779_v4 = vpop.f32.mrf.mxu0 }
 0x18e   : > { %v3300_v12 = vpop.eup %3299  ;;  %v1875_v9 = vadd.f32 %v1459_v25, %v851_v13  ;;  %v1473_v24 = vadd.f32 1.0, %v1472_v39  ;;  %v4698_v18 = vadd.f32 %v775_v2, %v4128_v27  ;;  %3311 = vlog2.f32 %v1487_v38 }
 0x18f   : > { %v1444_v54 = vmul.f32 0.6931472, %v3300_v12  ;;  %v1236_v56 = vmul.f32 1.442695, %v1130_v43  ;;  %vm1449_vm7 = vcmp.lt.f32.partialorder %v1448_v55, 0.0004427343  ;;  %vm917_vm8 = vcmp.ne.f32.partialorder %v4269_v36, %v4269_v36 }
 0x190   : > { %v1939_v22 = vsel %vm915_vm4, %v4239_v51, %v1875_v9  ;;  %v853_v13 = vmax.f32 %v4269_v36, 0.0  ;;  %v4705_v3 = vpop.eup %3301  ;;  %v1475_v5 = vand.u32 2147483647, %v4413_v52  ;;  %v1463_v32 = vmul.f32 -0.5, %v4404_v28 }
 0x191   : > { %2132 = vmatprep.mubr.f32.mxu1 %v1939_v22  ;;  %v1450_v0 = vsel %vm1449_vm7, %v1447_v6, %v1444_v54  ;;  %v1238_v39 = vmul.f32 1.442695, %v1131_v1  ;;  %v1132_v11 = vsub.f32 0.0, %v1068_v29  ;;  %v1478_v51 = vadd.f32 1.0, %v4424_v33  ;;  %v781_v1 = vpop.f32.mrf.mxu0 }
 0x192   : > { %v1874_v47 = vadd.f32 %v1450_v0, %v850_v61  ;;  %v1474_v55 = vmul.f32 %v4413_v52, %v1473_v24  ;;  %v1466_v2 = vand.u32 2147483647, %v4404_v28  ;;  %v1069_v25 = vand.u32 2147483647, %v4698_v18 }
 0x193   : > { %v3304_v43 = vpop.eup %3303  ;;  %v1490_v38 = vmul.f32 -0.5, %v4429_v14  ;;  %v4721_v61 = vadd.f32 %v779_v4, %v4126_v26  ;;  %3313 = vlog2.f32 %v1478_v51  ;;  %vm1476_vm9 = vcmp.lt.f32.partialorder %v1475_v5, 0.0004427343 }
 0x194   : > { %v1938_v12 = vsel %vm914_vm6, %v4226_v37, %v1874_v47  ;;  %v1471_v9 = vmul.f32 0.6931472, %v3304_v43  ;;  %3315 = vpow2.f32 %v1236_v56  ;;  %v852_v52 = vmax.f32 %v4253_v63, 0.0 }
 0x195   : > { %2133 = vmatmul.mubr.f32.gmra.mxu1 %v1938_v12  ;;  %v1464_v6 = vadd.f32 1.0, %v1463_v32  ;;  %v4724_v29 = vpop.eup %3305  ;;  %v1240_v24 = vmul.f32 1.442695, %v1132_v11  ;;  %vm916_vm10 = vcmp.ne.f32.partialorder %v4253_v63, %v4253_v63  ;;  %v1505_v37 = vadd.f32 1.0, %v4448_v35 }
 0x196   : > { %v1477_v54 = vsel %vm1476_vm9, %v1474_v55, %v1471_v9  ;;  %3317 = vpow2.f32 %v1238_v39  ;;  %vm4729_vm11 = vcmp.lt.f32.partialorder %v1466_v2, 0.0004427343  ;;  %v1133_v56 = vsub.f32 0.0, %v1069_v25  ;;  %v785_v25 = vpop.f32.mrf.mxu0 }
 0x197   : > { %v1877_v22 = vadd.f32 %v1477_v54, %v853_v13  ;;  %v3308_v5 = vpop.eup %3307  ;;  %v1491_v4 = vadd.f32 1.0, %v1490_v38  ;;  %v1070_v32 = vand.u32 2147483647, %v4721_v61  ;;  %v4735_v47 = vadd.f32 %v781_v1, %v4128_v27 }
 0x198   : > { %3319 = vlog2.f32 %v1505_v37  ;;  %v1462_v39 = vmul.f32 0.6931472, %v3308_v5  ;;  %v1465_v13 = vmul.f32 %v4404_v28, %v1464_v6  ;;  %v1481_v51 = vmul.f32 -0.5, %v4424_v33  ;;  %v4743_v43 = vpop.eup %3309 }
 0x199   : > { %v1941_v11 = vsel %vm917_vm8, %v4269_v36, %v1877_v22  ;;  %3321 = vpow2.f32 %v1240_v24  ;;  %v855_v55 = vmax.f32 %v4291_v20, 0.0  ;;  %vm919_vm12 = vcmp.ne.f32.partialorder %v4291_v20, %v4291_v20 }
 0x19a   : > { %2137 = vmatprep.mubr.f32.mxu1 %v1941_v11  ;;  %v1493_v2 = vand.u32 2147483647, %v4429_v14  ;;  %v1468_v36 = vsel %vm4729_vm11, %v1465_v13, %v1462_v39  ;;  %v1242_v38 = vmul.f32 1.442695, %v1133_v56  ;;  %v854_v28 = vmax.f32 %v4282_v58, 0.0 }
 0x19b   : > { %v1496_v12 = vadd.f32 1.0, %v4442_v31  ;;  %v3312_v9 = vpop.eup %3311  ;;  %v1876_v6 = vadd.f32 %v1468_v36, %v852_v52  ;;  %v1492_v1 = vmul.f32 %v4429_v14, %v1491_v4  ;;  %v1134_v54 = vsub.f32 0.0, %v1070_v32  ;;  %v787_v52 = vpop.f32.mrf.mxu0 }
 0x19c   : > { %v1071_v24 = vand.u32 2147483647, %v4735_v47  ;;  %v1489_v37 = vmul.f32 0.6931472, %v3312_v9  ;;  %v1482_v22 = vadd.f32 1.0, %v1481_v51  ;;  %v4756_v5 = vadd.f32 %v785_v25, %v4126_v26 }
 0x19d   : > { %3323 = vlog2.f32 %v1496_v12  ;;  %v1940_v0 = vsel %vm916_vm10, %v4253_v63, %v1876_v6  ;;  %vm1494_vm13 = vcmp.lt.f32.partialorder %v1493_v2, 0.0004427343  ;;  %vm918_vm14 = vcmp.ne.f32.partialorder %v4282_v58, %v4282_v58 }
 0x19e   : > { %5766 = vst [vmem:[#allocation14_spill] sm:$0xff] %v4756_v5  ;;  %v1508_v14 = vmul.f32 -0.5, %v4448_v35  ;;  %2138 = vmatmul.mubr.f32.gmra.mxu1 %v1940_v0  ;;  %3325 = vpow2.f32 %v1242_v38  ;;  %v1495_v56 = vsel %vm1494_vm13, %v1492_v1, %v1489_v37  ;;  %v1484_v4 = vand.u32 2147483647, %v4424_v33  ;;  %v791_v1 = vpop.f32.mrf.mxu0 }
 0x19f   : > { %v1523_v32 = vadd.f32 1.0, %v4479_v46  ;;  %v1879_v11 = vadd.f32 %v1495_v56, %v855_v55  ;;  %v1244_v39 = vmul.f32 1.442695, %v1134_v54  ;;  %v1135_v13 = vsub.f32 0.0, %v1071_v24 }
 0x1a0   : > { %v857_v51 = vmax.f32 %v4319_v30, 0.0  ;;  %v3314_v63 = vpop.eup %3313  ;;  %v1483_v2 = vmul.f32 %v4424_v33, %v1482_v22  ;;  %v1072_v25 = vand.u32 2147483647, %v4756_v5  ;;  %v4771_v36 = vadd.f32 %v787_v52, %v4128_v27 }
 0x1a1   : > { %3327 = vlog2.f32 %v1523_v32  ;;  %v4773_v38 = vpop.eup %3315  ;;  %v1943_v55 = vsel %vm919_vm12, %v4291_v20, %v1879_v11  ;;  %v1480_v12 = vmul.f32 0.6931472, %v3314_v63  ;;  %v1509_v9 = vadd.f32 1.0, %v1508_v14  ;;  %v5768_v11 = vld [vmem:[#allocation5_spill] sm:$0xff] }
 0x1a2   : > { %5767 = vst [vmem:[#allocation15_spill] sm:$0xff] %v4771_v36  ;;  %v1511_v6 = vand.u32 2147483647, %v4448_v35  ;;  %2142 = vmatprep.mubr.f32.mxu1 %v1943_v55  ;;  %vm1485_vm15 = vcmp.lt.f32.partialorder %v1484_v4, 0.0004427343  ;;  %vm921_vm0 = vcmp.ne.f32.partialorder %v4319_v30, %v4319_v30  ;;  %v1499_v33 = vmul.f32 -0.5, %v4442_v31 }
 0x1a3   : > { %v1514_v54 = vadd.f32 1.0, %v4472_v41  ;;  %v4784_v24 = vpop.eup %3317  ;;  %3329 = vpow2.f32 %v1244_v39  ;;  %v1486_v37 = vsel %vm1485_vm15, %v1483_v2, %v1480_v12  ;;  %v1246_v22 = vmul.f32 1.442695, %v1135_v13  ;;  %v793_v2 = vpop.f32.mrf.mxu0 }
 0x1a4   : > { %v1502_v20 = vand.u32 2147483647, %v4442_v31  ;;  %v1878_v14 = vadd.f32 %v1486_v37, %v854_v28  ;;  %v1136_v52 = vsub.f32 0.0, %v1072_v25  ;;  %v1073_v56 = vand.u32 2147483647, %v4771_v36 }
 0x1a5   : > { %v3320_v0 = vpop.eup %3319  ;;  %3331 = vlog2.f32 %v1514_v54  ;;  %v1510_v32 = vmul.f32 %v4448_v35, %v1509_v9  ;;  %vm1512_vm1 = vcmp.lt.f32.partialorder %v1511_v6, 0.0004427343  ;;  %v856_v63 = vmax.f32 %v5768_v11, 0.0 }
 0x1a6   : > { %v1507_v4 = vmul.f32 0.6931472, %v3320_v0  ;;  %v4790_v55 = vpop.eup %3321  ;;  %v1942_v39 = vsel %vm918_vm14, %v4282_v58, %v1878_v14  ;;  %vm920_vm2 = vcmp.ne.f32.partialorder %v5768_v11, %v5768_v11  ;;  %v1500_v28 = vadd.f32 1.0, %v1499_v33  ;;  %v5772_v33 = vld [vmem:[#allocation7_spill] sm:$0xff] }
 0x1a7   : > { %v1526_v13 = vmul.f32 -0.5, %v4479_v46  ;;  %2143 = vmatmul.mubr.f32.gmra.mxu1 %v1942_v39  ;;  %3333 = vpow2.f32 %v1246_v22  ;;  %v4800_v25 = vadd.f32 %v791_v1, %v4126_v26  ;;  %v1541_v12 = vadd.f32 1.0, %v4512_v62 }
 0x1a8   : > { %v1513_v35 = vsel %vm1512_vm1, %v1510_v32, %v1507_v4  ;;  %v1248_v6 = vmul.f32 1.442695, %v1136_v52  ;;  %vm4803_vm3 = vcmp.lt.f32.partialorder %v1502_v20, 0.0004427343  ;;  %v1137_v58 = vsub.f32 0.0, %v1073_v56  ;;  %v797_v4 = vpop.f32.mrf.mxu0 }
 0x1a9   : > { %5769 = vst [vmem:[#allocation5_spill] sm:$0xff] %v4800_v25  ;;  %v1881_v9 = vadd.f32 %v1513_v35, %v857_v51  ;;  %v859_v0 = vmax.f32 %v5772_v33, 0.0  ;;  %v1517_v14 = vmul.f32 -0.5, %v4472_v41  ;;  %v4810_v22 = vadd.f32 %v793_v2, %v4128_v27 }
 0x1aa   : > { %v3324_v37 = vpop.eup %3323  ;;  %3335 = vlog2.f32 %v1541_v12  ;;  %v1501_v20 = vmul.f32 %v4442_v31, %v1500_v28  ;;  %v1527_v52 = vadd.f32 1.0, %v1526_v13  ;;  %vm923_vm4 = vcmp.ne.f32.partialorder %v5772_v33, %v5772_v33  ;;  %v5773_v31 = vld [vmem:[#allocation6_spill] sm:$0xff] }
 0x1ab   : > { %v1945_v51 = vsel %vm921_vm0, %v4319_v30, %v1881_v9  ;;  %v1498_v1 = vmul.f32 0.6931472, %v3324_v37  ;;  %v4817_v56 = vpop.eup %3325  ;;  %v1529_v32 = vand.u32 2147483647, %v4479_v46  ;;  %v1074_v39 = vand.u32 2147483647, %v4800_v25 }
 0x1ac   : > { %2147 = vmatprep.mubr.f32.mxu1 %v1945_v51  ;;  %v1532_v2 = vadd.f32 1.0, %v4485_v60  ;;  %3337 = vpow2.f32 %v1248_v6  ;;  %v1250_v35 = vmul.f32 1.442695, %v1137_v58  ;;  %v858_v28 = vmax.f32 %v5773_v31, 0.0  ;;  %v799_v58 = vpop.f32.mrf.mxu0 }
 0x1ad   : > { %v1504_v30 = vsel %vm4803_vm3, %v1501_v20, %v1498_v1  ;;  %v1518_v9 = vadd.f32 1.0, %v1517_v14  ;;  %v1075_v37 = vand.u32 2147483647, %v4810_v22  ;;  %v4829_v51 = vadd.f32 %v797_v4, %v4126_v26 }
 0x1ae   : > { %v3328_v13 = vpop.eup %3327  ;;  %v1880_v12 = vadd.f32 %v1504_v30, %v856_v63  ;;  %v1528_v25 = vmul.f32 %v4479_v46, %v1527_v52  ;;  %v1544_v36 = vmul.f32 -0.5, %v4512_v62  ;;  %3339 = vlog2.f32 %v1532_v2 }
 0x1af   : > { %5774 = vst [vmem:[#allocation7_spill] sm:$0xff] %v4829_v51  ;;  %v1525_v5 = vmul.f32 0.6931472, %v3328_v13  ;;  %vm1530_vm5 = vcmp.lt.f32.partialorder %v1529_v32, 0.0004427343  ;;  %v1138_v54 = vsub.f32 0.0, %v1074_v39  ;;  %3341 = vpow2.f32 %v1250_v35 }
 0x1b0   : > { %v1944_v6 = vsel %vm920_vm2, %v5768_v11, %v1880_v12  ;;  %v1520_v63 = vand.u32 2147483647, %v4472_v41  ;;  %v4838_v14 = vpop.eup %3329  ;;  %vm922_vm6 = vcmp.ne.f32.partialorder %v5773_v31, %v5773_v31  ;;  %v1559_v46 = vadd.f32 1.0, %v4549_v49  ;;  %v5776_v35 = vld [vmem:[#allocation9_spill] sm:$0xff] }
 0x1b1   : > { %2148 = vmatmul.mubr.f32.gmra.mxu1 %v1944_v6  ;;  %v1531_v1 = vsel %vm1530_vm5, %v1528_v25, %v1525_v5  ;;  %v1519_v4 = vmul.f32 %v4472_v41, %v1518_v9  ;;  %v1139_v11 = vsub.f32 0.0, %v1075_v37  ;;  %v1076_v32 = vand.u32 2147483647, %v4829_v51  ;;  %v803_v9 = vpop.f32.mrf.mxu0 }
 0x1b2   : > { %v3332_v20 = vpop.eup %3331  ;;  %v1883_v52 = vadd.f32 %v1531_v1, %v859_v0  ;;  %v1545_v2 = vadd.f32 1.0, %v1544_v36  ;;  %v4846_v30 = vadd.f32 %v799_v58, %v4128_v27  ;;  %3343 = vlog2.f32 %v1559_v46 }
 0x1b3   : > { %v1516_v39 = vmul.f32 0.6931472, %v3332_v20  ;;  %v1252_v25 = vmul.f32 1.442695, %v1138_v54  ;;  %vm1521_vm7 = vcmp.lt.f32.partialorder %v1520_v63, 0.0004427343  ;;  %vm925_vm8 = vcmp.ne.f32.partialorder %v5776_v35, %v5776_v35 }
 0x1b4   : > { %5775 = vst [vmem:[#allocation6_spill] sm:$0xff] %v4846_v30  ;;  %v1947_v5 = vsel %vm923_vm4, %v5772_v33, %v1883_v52  ;;  %v861_v0 = vmax.f32 %v5776_v35, 0.0  ;;  %v4853_v13 = vpop.eup %3333  ;;  %v1547_v36 = vand.u32 2147483647, %v4512_v62  ;;  %v1535_v12 = vmul.f32 -0.5, %v4485_v60 }
 0x1b5   : > { %2152 = vmatprep.mubr.f32.mxu1 %v1947_v5  ;;  %v1522_v41 = vsel %vm1521_vm7, %v1519_v4, %v1516_v39  ;;  %v1254_v6 = vmul.f32 1.442695, %v1139_v11  ;;  %v1140_v58 = vsub.f32 0.0, %v1076_v32  ;;  %v1550_v33 = vadd.f32 1.0, %v4527_v48  ;;  %v805_v39 = vpop.f32.mrf.mxu0 }
 0x1b6   : > { %v1882_v37 = vadd.f32 %v1522_v41, %v858_v28  ;;  %v1546_v63 = vmul.f32 %v4512_v62, %v1545_v2  ;;  %v1538_v1 = vand.u32 2147483647, %v4485_v60  ;;  %v1077_v46 = vand.u32 2147483647, %v4846_v30  ;;  %v5778_v62 = vld [vmem:[#allocation8_spill] sm:$0xff] }
 0x1b7   : > { %v3336_v54 = vpop.eup %3335  ;;  %v1562_v20 = vmul.f32 -0.5, %v4549_v49  ;;  %v4869_v28 = vadd.f32 %v803_v9, %v4126_v26  ;;  %3345 = vlog2.f32 %v1550_v33  ;;  %vm1548_vm9 = vcmp.lt.f32.partialorder %v1547_v36, 0.0004427343 }
 0x1b8   : > { %v1946_v52 = vsel %vm922_vm6, %v5773_v31, %v1882_v37  ;;  %v1543_v4 = vmul.f32 0.6931472, %v3336_v54  ;;  %3347 = vpow2.f32 %v1252_v25  ;;  %v860_v11 = vmax.f32 %v5778_v62, 0.0 }
 0x1b9   : > { %5777 = vst [vmem:[#allocation9_spill] sm:$0xff] %v4869_v28  ;;  %2153 = vmatmul.mubr.f32.gmra.mxu1 %v1946_v52  ;;  %v1536_v32 = vadd.f32 1.0, %v1535_v12  ;;  %v4872_v2 = vpop.eup %3337  ;;  %v1256_v41 = vmul.f32 1.442695, %v1140_v58  ;;  %vm924_vm10 = vcmp.ne.f32.partialorder %v5778_v62, %v5778_v62  ;;  %v1577_v31 = vadd.f32 1.0, %v4581_v42 }
 0x1ba   : > { %v1549_v5 = vsel %vm1548_vm9, %v1546_v63, %v1543_v4  ;;  %3349 = vpow2.f32 %v1254_v6  ;;  %vm4877_vm11 = vcmp.lt.f32.partialorder %v1538_v1, 0.0004427343  ;;  %v1141_v25 = vsub.f32 0.0, %v1077_v46  ;;  %v5781_v46 = vld [vmem:[#allocation11_spill] sm:$0xff]  ;;  %v809_v4 = vpop.f32.mrf.mxu0 }
 0x1bb   : > { %v1885_v9 = vadd.f32 %v1549_v5, %v861_v0  ;;  %v3340_v36 = vpop.eup %3339  ;;  %v1563_v33 = vadd.f32 1.0, %v1562_v20  ;;  %v1078_v12 = vand.u32 2147483647, %v4869_v28  ;;  %v4883_v54 = vadd.f32 %v805_v39, %v4128_v27  ;;  %v5782_v5 = vld [vmem:[#allocation10_spill] sm:$0xff] }
 0x1bc   : > { %3351 = vlog2.f32 %v1577_v31  ;;  %v1534_v6 = vmul.f32 0.6931472, %v3340_v36  ;;  %v1537_v0 = vmul.f32 %v4485_v60, %v1536_v32  ;;  %v1553_v63 = vmul.f32 -0.5, %v4527_v48  ;;  %v4891_v1 = vpop.eup %3341 }
 0x1bd   : > { %v1949_v58 = vsel %vm925_vm8, %v5776_v35, %v1885_v9  ;;  %3353 = vpow2.f32 %v1256_v41  ;;  %v863_v20 = vmax.f32 %v5781_v46, 0.0  ;;  %vm927_vm12 = vcmp.ne.f32.partialorder %v5781_v46, %v5781_v46 }
 0x1be   : > { %2157 = vmatprep.mubr.f32.mxu1 %v1949_v58  ;;  %v1565_v52 = vand.u32 2147483647, %v4549_v49  ;;  %v1540_v35 = vsel %vm4877_vm11, %v1537_v0, %v1534_v6  ;;  %v1258_v39 = vmul.f32 1.442695, %v1141_v25  ;;  %v862_v60 = vmax.f32 %v5782_v5, 0.0 }
 0x1bf   : > { %v1568_v32 = vadd.f32 1.0, %v4559_v23  ;;  %v3344_v31 = vpop.eup %3343  ;;  %v1884_v9 = vadd.f32 %v1540_v35, %v860_v11  ;;  %v1564_v41 = vmul.f32 %v4549_v49, %v1563_v33  ;;  %v1142_v36 = vsub.f32 0.0, %v1078_v12  ;;  %v811_v11 = vpop.f32.mrf.mxu0 }
 0x1c0   : > { %v1079_v58 = vand.u32 2147483647, %v4883_v54  ;;  %v1561_v28 = vmul.f32 0.6931472, %v3344_v31  ;;  %v1554_v51 = vadd.f32 1.0, %v1553_v63  ;;  %v4904_v30 = vadd.f32 %v809_v4, %v4126_v26 }
 0x1c1   : > { %3355 = vlog2.f32 %v1568_v32  ;;  %v1948_v37 = vsel %vm924_vm10, %v5778_v62, %v1884_v9  ;;  %vm1566_vm13 = vcmp.lt.f32.partialorder %v1565_v52, 0.0004427343  ;;  %vm926_vm14 = vcmp.ne.f32.partialorder %v5782_v5, %v5782_v5 }
 0x1c2   : > { %5783 = vst [vmem:[#allocation8_spill] sm:$0xff] %v4904_v30  ;;  %v1580_v49 = vmul.f32 -0.5, %v4581_v42  ;;  %2158 = vmatmul.mubr.f32.gmra.mxu1 %v1948_v37  ;;  %3357 = vpow2.f32 %v1258_v39  ;;  %v1567_v25 = vsel %vm1566_vm13, %v1564_v41, %v1561_v28  ;;  %v1556_v33 = vand.u32 2147483647, %v4527_v48 }
 0x1c3   : > { %v1595_v12 = vadd.f32 1.0, %v4623_v44  ;;  %v1887_v6 = vadd.f32 %v1567_v25, %v863_v20  ;;  %v1260_v0 = vmul.f32 1.442695, %v1142_v36  ;;  %v1143_v63 = vsub.f32 0.0, %v1079_v58 }
 0x1c4   : > { %v865_v4 = vmax.f32 %v4440_v45, 0.0  ;;  %v3346_v62 = vpop.eup %3345  ;;  %v1555_v52 = vmul.f32 %v4527_v48, %v1554_v51  ;;  %v1080_v35 = vand.u32 2147483647, %v4904_v30  ;;  %v4919_v32 = vadd.f32 %v811_v11, %v4128_v27  ;;  %v815_v51 = vpop.f32.mrf.mxu0 }
 0x1c5   : > { %3359 = vlog2.f32 %v1595_v12  ;;  %v4921_v39 = vpop.eup %3347  ;;  %v1951_v28 = vsel %vm927_vm12, %v5781_v46, %v1887_v6  ;;  %v1552_v20 = vmul.f32 0.6931472, %v3346_v62  ;;  %v1581_v31 = vadd.f32 1.0, %v1580_v49  ;;  %v5784_v62 = vld [vmem:[#allocation12_spill] sm:$0xff] }
 0x1c6   : > { %v1583_v9 = vand.u32 2147483647, %v4581_v42  ;;  %2162 = vmatprep.mubr.f32.mxu1 %v1951_v28  ;;  %vm1557_vm15 = vcmp.lt.f32.partialorder %v1556_v33, 0.0004427343  ;;  %vm929_vm0 = vcmp.ne.f32.partialorder %v4440_v45, %v4440_v45  ;;  %v1571_v48 = vmul.f32 -0.5, %v4559_v23 }
 0x1c7   : > { %v1586_v41 = vadd.f32 1.0, %v4596_v50  ;;  %v4932_v36 = vpop.eup %3349  ;;  %3361 = vpow2.f32 %v1260_v0  ;;  %v1558_v58 = vsel %vm1557_vm15, %v1555_v52, %v1552_v20  ;;  %v1262_v37 = vmul.f32 1.442695, %v1143_v63  ;;  %v817_v52 = vpop.f32.mrf.mxu0 }
 0x1c8   : > { %v1574_v46 = vand.u32 2147483647, %v4559_v23  ;;  %v1886_v11 = vadd.f32 %v1558_v58, %v862_v60  ;;  %v1144_v25 = vsub.f32 0.0, %v1080_v35  ;;  %v1081_v33 = vand.u32 2147483647, %v4919_v32 }
 0x1c9   : > { %v3352_v49 = vpop.eup %3351  ;;  %3363 = vlog2.f32 %v1586_v41  ;;  %v1582_v6 = vmul.f32 %v4581_v42, %v1581_v31  ;;  %vm1584_vm1 = vcmp.lt.f32.partialorder %v1583_v9, 0.0004427343  ;;  %v864_v28 = vmax.f32 %v5784_v62, 0.0 }
 0x1ca   : > { %v1579_v12 = vmul.f32 0.6931472, %v3352_v49  ;;  %v4938_v30 = vpop.eup %3353  ;;  %v1950_v0 = vsel %vm926_vm14, %v5782_v5, %v1886_v11  ;;  %vm928_vm2 = vcmp.ne.f32.partialorder %v5784_v62, %v5784_v62  ;;  %v1572_v60 = vadd.f32 1.0, %v1571_v48 }
 0x1cb   : > { %v1598_v63 = vmul.f32 -0.5, %v4623_v44  ;;  %2163 = vmatmul.mubr.f32.gmra.mxu1 %v1950_v0  ;;  %3365 = vpow2.f32 %v1262_v37  ;;  %v4948_v35 = vadd.f32 %v815_v51, %v4126_v26  ;;  %v1613_v20 = vadd.f32 1.0, %v4669_v21 }
 0x1cc   : > { %v1585_v42 = vsel %vm1584_vm1, %v1582_v6, %v1579_v12  ;;  %v1264_v9 = vmul.f32 1.442695, %v1144_v25  ;;  %vm4951_vm3 = vcmp.lt.f32.partialorder %v1574_v46, 0.0004427343  ;;  %v1145_v5 = vsub.f32 0.0, %v1081_v33  ;;  %v821_v6 = vpop.f32.mrf.mxu0 }
 0x1cd   : > { %5785 = vst [vmem:[#allocation11_spill] sm:$0xff] %v4948_v35  ;;  %v1889_v31 = vadd.f32 %v1585_v42, %v865_v4  ;;  %v867_v48 = vmax.f32 %v4490_v8, 0.0  ;;  %v1589_v49 = vmul.f32 -0.5, %v4596_v50  ;;  %v4958_v37 = vadd.f32 %v817_v52, %v4128_v27 }
 0x1ce   : > { %v3356_v58 = vpop.eup %3355  ;;  %3367 = vlog2.f32 %v1613_v20  ;;  %v1573_v46 = vmul.f32 %v4559_v23, %v1572_v60  ;;  %v1599_v11 = vadd.f32 1.0, %v1598_v63  ;;  %vm931_vm4 = vcmp.ne.f32.partialorder %v4490_v8, %v4490_v8 }
 0x1cf   : > { %v1953_v4 = vsel %vm929_vm0, %v4440_v45, %v1889_v31  ;;  %v1570_v51 = vmul.f32 0.6931472, %v3356_v58  ;;  %v4965_v25 = vpop.eup %3357  ;;  %v1601_v33 = vand.u32 2147483647, %v4623_v44  ;;  %v1082_v12 = vand.u32 2147483647, %v4948_v35 }
 0x1d0   : > { %2167 = vmatprep.mubr.f32.mxu1 %v1953_v4  ;;  %v1604_v0 = vadd.f32 1.0, %v4637_v10  ;;  %3369 = vpow2.f32 %v1264_v9  ;;  %v1266_v52 = vmul.f32 1.442695, %v1145_v5  ;;  %v866_v23 = vmax.f32 %v4465_v16, 0.0  ;;  %v823_v5 = vpop.f32.mrf.mxu0 }
 0x1d1   : > { %v1576_v45 = vsel %vm4951_vm3, %v1573_v46, %v1570_v51  ;;  %v1590_v42 = vadd.f32 1.0, %v1589_v49  ;;  %v1083_v20 = vand.u32 2147483647, %v4958_v37  ;;  %v1616_v31 = vmul.f32 -0.5, %v4669_v21 }
 0x1d2   : > { %v3360_v60 = vpop.eup %3359  ;;  %v1888_v63 = vadd.f32 %v1576_v45, %v864_v28  ;;  %v1600_v4 = vmul.f32 %v4623_v44, %v1599_v11  ;;  %v4979_v35 = vadd.f32 %v821_v6, %v4126_v26  ;;  %3371 = vlog2.f32 %v1604_v0 }
 0x1d3   : > { %v1597_v58 = vmul.f32 0.6931472, %v3360_v60  ;;  %vm1602_vm5 = vcmp.lt.f32.partialorder %v1601_v33, 0.0004427343  ;;  %v1146_v41 = vsub.f32 0.0, %v1082_v12  ;;  %3373 = vpow2.f32 %v1266_v52 }
 0x1d4   : > { %v1952_v9 = vsel %vm928_vm2, %v5784_v62, %v1888_v63  ;;  %v1592_v28 = vand.u32 2147483647, %v4596_v50  ;;  %v4986_v49 = vpop.eup %3361  ;;  %vm930_vm6 = vcmp.ne.f32.partialorder %v4465_v16, %v4465_v16  ;;  %v1631_v44 = vadd.f32 1.0, %v4705_v3  ;;  %v827_v63 = vpop.f32.mrf.mxu0 }
 0x1d5   : > { %2168 = vmatmul.mubr.f32.gmra.mxu1 %v1952_v9  ;;  %v1603_v51 = vsel %vm1602_vm5, %v1600_v4, %v1597_v58  ;;  %v1591_v6 = vmul.f32 %v4596_v50, %v1590_v42  ;;  %v1147_v62 = vsub.f32 0.0, %v1083_v20  ;;  %v1617_v33 = vadd.f32 1.0, %v1616_v31 }
 0x1d6   : > { %v3364_v46 = vpop.eup %3363  ;;  %v1891_v11 = vadd.f32 %v1603_v51, %v867_v48  ;;  %v1084_v0 = vand.u32 2147483647, %v4979_v35  ;;  %v4994_v45 = vadd.f32 %v823_v5, %v4128_v27  ;;  %3375 = vlog2.f32 %v1631_v44 }
 0x1d7   : > { %v1588_v12 = vmul.f32 0.6931472, %v3364_v46  ;;  %v1268_v60 = vmul.f32 1.442695, %v1146_v41  ;;  %vm1593_vm7 = vcmp.lt.f32.partialorder %v1592_v28, 0.0004427343  ;;  %vm933_vm8 = vcmp.ne.f32.partialorder %v4525_v34, %v4525_v34 }
 0x1d8   : > { %v1955_v52 = vsel %vm931_vm4, %v4490_v8, %v1891_v11  ;;  %v869_v48 = vmax.f32 %v4525_v34, 0.0  ;;  %v5001_v50 = vpop.eup %3365  ;;  %v1619_v20 = vand.u32 2147483647, %v4669_v21  ;;  %v1607_v31 = vmul.f32 -0.5, %v4637_v10 }
 0x1d9   : > { %2172 = vmatprep.mubr.f32.mxu1 %v1955_v52  ;;  %v1594_v42 = vsel %vm1593_vm7, %v1591_v6, %v1588_v12  ;;  %v1270_v4 = vmul.f32 1.442695, %v1147_v62  ;;  %v1618_v8 = vmul.f32 %v4669_v21, %v1617_v33  ;;  %v1622_v9 = vadd.f32 1.0, %v4690_v15  ;;  %v829_v21 = vpop.f32.mrf.mxu0 }
 0x1da   : > { %v1890_v58 = vadd.f32 %v1594_v42, %v866_v23  ;;  %v1148_v28 = vsub.f32 0.0, %v1084_v0  ;;  %v1610_v5 = vand.u32 2147483647, %v4637_v10  ;;  %v1085_v51 = vand.u32 2147483647, %v4994_v45 }
 0x1db   : > { %v3368_v41 = vpop.eup %3367  ;;  %v1634_v44 = vmul.f32 -0.5, %v4705_v3  ;;  %v5017_v23 = vadd.f32 %v827_v63, %v4126_v26  ;;  %3377 = vlog2.f32 %v1622_v9  ;;  %vm1620_vm9 = vcmp.lt.f32.partialorder %v1619_v20, 0.0004427343 }
 0x1dc   : > { %v1954_v46 = vsel %vm930_vm6, %v4465_v16, %v1890_v58  ;;  %v1615_v11 = vmul.f32 0.6931472, %v3368_v41  ;;  %3379 = vpow2.f32 %v1268_v60  ;;  %v868_v6 = vmax.f32 %v4508_v57, 0.0 }
 0x1dd   : > { %2173 = vmatmul.mubr.f32.gmra.mxu1 %v1954_v46  ;;  %v1608_v62 = vadd.f32 1.0, %v1607_v31  ;;  %v5020_v33 = vpop.eup %3369  ;;  %3381 = vpow2.f32 %v1270_v4  ;;  %vm932_vm10 = vcmp.ne.f32.partialorder %v4508_v57, %v4508_v57  ;;  %v1649_v16 = vadd.f32 1.0, %v4743_v43 }
 0x1de   : > { %v1621_v12 = vsel %vm1620_vm9, %v1618_v8, %v1615_v11  ;;  %v1272_v26 = vmul.f32 1.442695, %v1148_v28  ;;  %v1149_v52 = vsub.f32 0.0, %v1085_v51  ;;  %v5026_v63 = vadd.f32 %v829_v21, %v4128_v27 }
 0x1df   : > { %v1893_v0 = vadd.f32 %v1621_v12, %v869_v48  ;;  %v3372_v60 = vpop.eup %3371  ;;  %vm5028_vm11 = vcmp.lt.f32.partialorder %v1610_v5, 0.0004427343  ;;  %v1635_v20 = vadd.f32 1.0, %v1634_v44  ;;  %v1086_v31 = vand.u32 2147483647, %v5017_v23 }
 0x1e0   : > { %3383 = vlog2.f32 %v1649_v16  ;;  %v1606_v48 = vmul.f32 0.6931472, %v3372_v60  ;;  %v1609_v4 = vmul.f32 %v4637_v10, %v1608_v62  ;;  %v1625_v27 = vmul.f32 -0.5, %v4690_v15  ;;  %v5039_v8 = vpop.eup %3373 }
 0x1e1   : > { %v1957_v58 = vsel %vm933_vm8, %v4525_v34, %v1893_v0  ;;  %v871_v9 = vmax.f32 %v4566_v59, 0.0  ;;  %vm935_vm12 = vcmp.ne.f32.partialorder %v4566_v59, %v4566_v59  ;;  %v1637_v41 = vand.u32 2147483647, %v4705_v3 }
 0x1e2   : > { %2177 = vmatprep.mubr.f32.mxu1 %v1957_v58  ;;  %v1640_v28 = vadd.f32 1.0, %v4724_v29  ;;  %3385 = vpow2.f32 %v1272_v26  ;;  %v1612_v34 = vsel %vm5028_vm11, %v1609_v4, %v1606_v48  ;;  %v1274_v5 = vmul.f32 1.442695, %v1149_v52  ;;  %v5790_v26 = vld [vmem:[#allocation13_spill] sm:$0xff] }
 0x1e3   : > { %v1087_v10 = vand.u32 2147483647, %v5026_v63  ;;  %v3376_v51 = vpop.eup %3375  ;;  %v1892_v44 = vadd.f32 %v1612_v34, %v868_v6  ;;  %v1636_v46 = vmul.f32 %v4705_v3, %v1635_v20  ;;  %v1150_v11 = vsub.f32 0.0, %v1086_v31 }
 0x1e4   : > { %v1667_v21 = vadd.f32 1.0, %v4784_v24  ;;  %v1633_v62 = vmul.f32 0.6931472, %v3376_v51  ;;  %v1626_v12 = vadd.f32 1.0, %v1625_v27  ;;  %v1652_v16 = vmul.f32 -0.5, %v4743_v43 }
 0x1e5   : > { %3387 = vlog2.f32 %v1640_v28  ;;  %v1956_v0 = vsel %vm932_vm10, %v4508_v57, %v1892_v44  ;;  %vm1638_vm13 = vcmp.lt.f32.partialorder %v1637_v41, 0.0004427343  ;;  %v870_v52 = vmax.f32 %v5790_v26, 0.0 }
 0x1e6   : > { %3389 = vlog2.f32 %v1667_v21  ;;  %2178 = vmatmul.mubr.f32.gmra.mxu1 %v1956_v0  ;;  %v1639_v6 = vsel %vm1638_vm13, %v1636_v46, %v1633_v62  ;;  %vm934_vm14 = vcmp.ne.f32.partialorder %v5790_v26, %v5790_v26  ;;  %v1628_v3 = vand.u32 2147483647, %v4690_v15 }
 0x1e7   : > { %v1151_v60 = vsub.f32 0.0, %v1087_v10  ;;  %3391 = vpow2.f32 %v1274_v5  ;;  %v1895_v42 = vadd.f32 %v1639_v6, %v871_v9  ;;  %v1276_v20 = vmul.f32 1.442695, %v1150_v11 }
 0x1e8   : > { %v1658_v31 = vadd.f32 1.0, %v4773_v38  ;;  %v3378_v58 = vpop.eup %3377  ;;  %v1627_v57 = vmul.f32 %v4690_v15, %v1626_v12  ;;  %v873_v48 = vmax.f32 %v4616_v17, 0.0  ;;  %v1653_v4 = vadd.f32 1.0, %v1652_v16 }
 0x1e9   : > { %v1655_v27 = vand.u32 2147483647, %v4743_v43  ;;  %v5064_v41 = vpop.eup %3379  ;;  %v1959_v28 = vsel %vm935_vm12, %v4566_v59, %v1895_v42  ;;  %v1624_v34 = vmul.f32 0.6931472, %v3378_v58  ;;  %v1643_v9 = vmul.f32 -0.5, %v4724_v29 }
 0x1ea   : > { %3393 = vlog2.f32 %v1658_v31  ;;  %v5071_v5 = vpop.eup %3381  ;;  %2182 = vmatprep.mubr.f32.mxu1 %v1959_v28  ;;  %vm1629_vm15 = vcmp.lt.f32.partialorder %v1628_v3, 0.0004427343  ;;  %v1278_v15 = vmul.f32 1.442695, %v1151_v60  ;;  %vm937_vm0 = vcmp.ne.f32.partialorder %v4616_v17, %v4616_v17 }
 0x1eb   : > { %v1685_v10 = vadd.f32 1.0, %v4817_v56  ;;  %3395 = vpow2.f32 %v1276_v20  ;;  %v1630_v51 = vsel %vm1629_vm15, %v1627_v57, %v1624_v34  ;;  %v872_v44 = vmax.f32 %v4594_v53, 0.0 }
 0x1ec   : > { %v1670_v59 = vmul.f32 -0.5, %v4784_v24  ;;  %v1894_v11 = vadd.f32 %v1630_v51, %v870_v52  ;;  %vm5078_vm1 = vcmp.lt.f32.partialorder %v1655_v27, 0.0004427343  ;;  %v1646_v62 = vand.u32 2147483647, %v4724_v29 }
 0x1ed   : > { %v3384_v46 = vpop.eup %3383  ;;  %3397 = vlog2.f32 %v1685_v10  ;;  %v1654_v16 = vmul.f32 %v4743_v43, %v1653_v4  ;;  %v1644_v0 = vadd.f32 1.0, %v1643_v9  ;;  %v1676_v6 = vadd.f32 1.0, %v4790_v55 }
 0x1ee   : > { %v1651_v12 = vmul.f32 0.6931472, %v3384_v46  ;;  %v1958_v3 = vsel %vm934_vm14, %v5790_v26, %v1894_v11  ;;  %3399 = vpow2.f32 %v1278_v15  ;;  %vm936_vm2 = vcmp.ne.f32.partialorder %v4594_v53, %v4594_v53 }
 0x1ef   : > { %v875_v52 = vmax.f32 %v4662_v40, 0.0  ;;  %v5092_v60 = vpop.eup %3385  ;;  %2183 = vmatmul.mubr.f32.gmra.mxu1 %v1958_v3  ;;  %vm939_vm3 = vcmp.ne.f32.partialorder %v4662_v40, %v4662_v40  ;;  %v1671_v42 = vadd.f32 1.0, %v1670_v59  ;;  %v1661_v20 = vmul.f32 -0.5, %v4773_v38 }
 0x1f0   : > { %v1657_v43 = vsel %vm5078_vm1, %v1654_v16, %v1651_v12  ;;  %3401 = vlog2.f32 %v1676_v6  ;;  %vm5099_vm4 = vcmp.lt.f32.partialorder %v1646_v62, 0.0004427343  ;;  %v1673_v58 = vand.u32 2147483647, %v4784_v24 }
 0x1f1   : > { %v1897_v26 = vadd.f32 %v1657_v43, %v873_v48  ;;  %v1703_v57 = vadd.f32 1.0, %v4853_v13  ;;  %v1645_v27 = vmul.f32 %v4724_v29, %v1644_v0  ;;  %v874_v28 = vmax.f32 %v4652_v7, 0.0 }
 0x1f2   : > { %v3388_v4 = vpop.eup %3387  ;;  %v1664_v34 = vand.u32 2147483647, %v4773_v38  ;;  %v1694_v9 = vadd.f32 1.0, %v4838_v14  ;;  %v1688_v51 = vmul.f32 -0.5, %v4817_v56  ;;  %v1672_v29 = vmul.f32 %v4784_v24, %v1671_v42 }
 0x1f3   : > { %v3390_v15 = vpop.eup %3389  ;;  %v1961_v48 = vsel %vm937_vm0, %v4616_v17, %v1897_v26  ;;  %v1642_v10 = vmul.f32 0.6931472, %v3388_v4  ;;  %3403 = vlog2.f32 %v1703_v57  ;;  %v1662_v46 = vadd.f32 1.0, %v1661_v20 }
 0x1f4   : > { %2187 = vmatprep.mubr.f32.mxu1 %v1961_v48  ;;  %v1669_v59 = vmul.f32 0.6931472, %v3390_v15  ;;  %3405 = vlog2.f32 %v1694_v9  ;;  %v5115_v11 = vpop.eup %3391  ;;  %vm1674_vm5 = vcmp.lt.f32.partialorder %v1673_v58, 0.0004427343  ;;  %vm938_vm6 = vcmp.ne.f32.partialorder %v4652_v7, %v4652_v7 }
 0x1f5   : > { %v1648_v21 = vsel %vm5099_vm4, %v1645_v27, %v1642_v10  ;;  %v1679_v17 = vmul.f32 -0.5, %v4790_v55  ;;  %v877_v16 = vmax.f32 %v4698_v18, 0.0  ;;  %v1691_v0 = vand.u32 2147483647, %v4817_v56 }
 0x1f6   : > { %v1896_v62 = vadd.f32 %v1648_v21, %v872_v44  ;;  %v1675_v12 = vsel %vm1674_vm5, %v1672_v29, %v1669_v59  ;;  %vm5124_vm7 = vcmp.lt.f32.partialorder %v1664_v34, 0.0004427343  ;;  %vm941_vm8 = vcmp.ne.f32.partialorder %v4698_v18, %v4698_v18 }
 0x1f7   : > { %v3394_v24 = vpop.eup %3393  ;;  %v1899_v6 = vadd.f32 %v1675_v12, %v875_v52  ;;  %v1689_v43 = vadd.f32 1.0, %v1688_v51  ;;  %v1721_v42 = vadd.f32 1.0, %v4891_v1  ;;  %v1663_v26 = vmul.f32 %v4773_v38, %v1662_v46 }
 0x1f8   : > { %v1960_v44 = vsel %vm936_vm2, %v4594_v53, %v1896_v62  ;;  %v1660_v20 = vmul.f32 0.6931472, %v3394_v24  ;;  %v1706_v52 = vmul.f32 -0.5, %v4853_v13  ;;  %v5137_v31 = vpop.eup %3395  ;;  %v876_v57 = vmax.f32 %v4681_v19, 0.0 }
 0x1f9   : > { %2188 = vmatmul.mubr.f32.gmra.mxu1 %v1960_v44  ;;  %v1963_v58 = vsel %vm939_vm3, %v4662_v40, %v1899_v6  ;;  %v1680_v4 = vadd.f32 1.0, %v1679_v17  ;;  %3407 = vlog2.f32 %v1721_v42  ;;  %vm5146_vm9 = vcmp.lt.f32.partialorder %v1691_v0, 0.0004427343 }
 0x1fa   : > { %v3398_v27 = vpop.eup %3397  ;;  %2192 = vmatprep.mubr.f32.mxu1 %v1963_v58  ;;  %v1666_v53 = vsel %vm5124_vm7, %v1663_v26, %v1660_v20  ;;  %vm940_vm10 = vcmp.ne.f32.partialorder %v4681_v19, %v4681_v19  ;;  %v1697_v34 = vmul.f32 -0.5, %v4838_v14  ;;  %v1712_v40 = vadd.f32 1.0, %v4872_v2 }
 0x1fb   : > { %v1898_v9 = vadd.f32 %v1666_v53, %v874_v28  ;;  %v1687_v15 = vmul.f32 0.6931472, %v3398_v27  ;;  %v1690_v48 = vmul.f32 %v4817_v56, %v1689_v43  ;;  %v1682_v10 = vand.u32 2147483647, %v4790_v55  ;;  %v5156_v51 = vpop.eup %3399 }
 0x1fc   : > { %v879_v59 = vmax.f32 %v4735_v47, 0.0  ;;  %v1707_v29 = vadd.f32 1.0, %v1706_v52  ;;  %v1709_v46 = vand.u32 2147483647, %v4853_v13  ;;  %3409 = vlog2.f32 %v1712_v40 }
 0x1fd   : > { %v3402_v21 = vpop.eup %3401  ;;  %v1962_v17 = vsel %vm938_vm6, %v4652_v7, %v1898_v9  ;;  %v1693_v28 = vsel %vm5146_vm9, %v1690_v48, %v1687_v15  ;;  %v1681_v56 = vmul.f32 %v4790_v55, %v1680_v4  ;;  %v1739_v62 = vadd.f32 1.0, %v4932_v36 }
 0x1fe   : > { %2193 = vmatmul.mubr.f32.gmra.mxu1 %v1962_v17  ;;  %v1901_v12 = vadd.f32 %v1693_v28, %v877_v16  ;;  %v1678_v0 = vmul.f32 0.6931472, %v3402_v21  ;;  %v1698_v24 = vadd.f32 1.0, %v1697_v34  ;;  %v1724_v6 = vmul.f32 -0.5, %v4891_v1  ;;  %v5172_v7 = vpop.f32.mrf.mxu0 }
 0x1ff   : > { %vm1683_vm11 = vcmp.lt.f32.partialorder %v1682_v10, 0.0004427343  ;;  %vm943_vm12 = vcmp.ne.f32.partialorder %v4735_v47, %v4735_v47  ;;  %v1700_v3 = vand.u32 2147483647, %v4838_v14  ;;  %3411 = vlog2.f32 %v1739_v62 }
 0x200   : > { %v3404_v43 = vpop.eup %3403  ;;  %v1965_v55 = vsel %vm941_vm8, %v4698_v18, %v1901_v12  ;;  %v1684_v16 = vsel %vm1683_vm11, %v1681_v56, %v1678_v0  ;;  %v1708_v42 = vmul.f32 %v4853_v13, %v1707_v29  ;;  %v878_v44 = vmax.f32 %v4721_v61, 0.0  ;;  %v2091_v27 = vpop.f32.mrf.mxu0  ;;  %v5800_v12 = vld [vmem:[#allocation14_spill] sm:$0xff] }
 0x201   : > { %v3406_v20 = vpop.eup %3405  ;;  %2197 = vmatprep.mubr.f32.mxu1 %v1965_v55  ;;  %v1900_v26 = vadd.f32 %v1684_v16, %v876_v57  ;;  %v1705_v52 = vmul.f32 0.6931472, %v3404_v43  ;;  %v1715_v58 = vmul.f32 -0.5, %v4872_v2  ;;  %v1730_v4 = vadd.f32 1.0, %v4921_v39 }
 0x202   : > { %vm1710_vm13 = vcmp.lt.f32.partialorder %v1709_v46, 0.0004427343  ;;  %v1696_v53 = vmul.f32 0.6931472, %v3406_v20  ;;  %v1699_v38 = vmul.f32 %v4838_v14, %v1698_v24  ;;  %v1725_v34 = vadd.f32 1.0, %v1724_v6  ;;  %v5799_v46 = vld [vmem:[#allocation15_spill] sm:$0xff] }
 0x203   : > { %v1964_v18 = vsel %vm940_vm10, %v4681_v19, %v1900_v26  ;;  %v1711_v13 = vsel %vm1710_vm13, %v1708_v42, %v1705_v52  ;;  %vm1701_vm14 = vcmp.lt.f32.partialorder %v1700_v3, 0.0004427343  ;;  %3413 = vlog2.f32 %v1730_v4 }
 0x204   : > { %2198 = vmatmul.mubr.f32.gmra.mxu1 %v1964_v18  ;;  %v1903_v57 = vadd.f32 %v1711_v13, %v879_v59  ;;  %v1702_v40 = vsel %vm1701_vm14, %v1699_v38, %v1696_v53  ;;  %v1727_v9 = vand.u32 2147483647, %v4891_v1  ;;  %v1742_v15 = vmul.f32 -0.5, %v4932_v36 }
 0x205   : > { %vm942_vm15 = vcmp.ne.f32.partialorder %v4721_v61, %v4721_v61  ;;  %v1902_v14 = vadd.f32 %v1702_v40, %v878_v44  ;;  %v1716_v48 = vadd.f32 1.0, %v1715_v58  ;;  %v1757_v10 = vadd.f32 1.0, %v4965_v25 }
 0x206   : > { %v3408_v29 = vpop.eup %3407  ;;  %v1967_v19 = vsel %vm943_vm12, %v4735_v47, %v1903_v57  ;;  %v881_v59 = vmax.f32 %v5799_v46, 0.0  ;;  %vm945_vm0 = vcmp.ne.f32.partialorder %v5799_v46, %v5799_v46  ;;  %v1726_v21 = vmul.f32 %v4891_v1, %v1725_v34  ;;  %v5200_v17 = vpop.f32.mrf.mxu0  ;;  %v5801_v34 = vld [vmem:[#allocation5_spill] sm:$0xff] }
 0x207   : > { %2202 = vmatprep.mubr.f32.mxu1 %v1967_v19  ;;  %v1966_v28 = vsel %vm942_vm15, %v4721_v61, %v1902_v14  ;;  %v1723_v56 = vmul.f32 0.6931472, %v3408_v29  ;;  %v1718_v62 = vand.u32 2147483647, %v4872_v2  ;;  %3415 = vlog2.f32 %v1757_v10 }
 0x208   : > { %2203 = vmatmul.mubr.f32.gmra.mxu1 %v1966_v28  ;;  %vm1728_vm1 = vcmp.lt.f32.partialorder %v1727_v9, 0.0004427343  ;;  %v880_v47 = vmax.f32 %v5800_v12, 0.0  ;;  %v1743_v0 = vadd.f32 1.0, %v1742_v15  ;;  %v1748_v24 = vadd.f32 1.0, %v4938_v30  ;;  %v2096_v6 = vpop.f32.mrf.mxu0  ;;  %v5802_v28 = vld [vmem:[#allocation6_spill] sm:$0xff] }
 0x209   : > { %v3410_v3 = vpop.eup %3409  ;;  %v1729_v43 = vsel %vm1728_vm1, %v1726_v21, %v1723_v56  ;;  %vm944_vm2 = vcmp.ne.f32.partialorder %v5800_v12, %v5800_v12  ;;  %v1717_v1 = vmul.f32 %v4872_v2, %v1716_v48  ;;  %v1733_v61 = vmul.f32 -0.5, %v4921_v39 }
 0x20a   : > { %v1905_v55 = vadd.f32 %v1729_v43, %v881_v59  ;;  %v1714_v16 = vmul.f32 0.6931472, %v3410_v3  ;;  %v1745_v42 = vand.u32 2147483647, %v4932_v36  ;;  %3417 = vlog2.f32 %v1748_v24 }
 0x20b   : > { %vm1719_vm3 = vcmp.lt.f32.partialorder %v1718_v62, 0.0004427343  ;;  %v883_v44 = vmax.f32 %v4810_v22, 0.0  ;;  %vm947_vm4 = vcmp.ne.f32.partialorder %v4810_v22, %v4810_v22  ;;  %v1775_v20 = vadd.f32 1.0, %v5001_v50 }
 0x20c   : > { %v3412_v26 = vpop.eup %3411  ;;  %v1969_v2 = vsel %vm945_vm0, %v5799_v46, %v1905_v55  ;;  %v1720_v52 = vsel %vm1719_vm3, %v1717_v1, %v1714_v16  ;;  %v1744_v58 = vmul.f32 %v4932_v36, %v1743_v0  ;;  %v1760_v4 = vmul.f32 -0.5, %v4965_v25 }
 0x20d   : > { %2207 = vmatprep.mubr.f32.mxu1 %v1969_v2  ;;  %v1904_v27 = vadd.f32 %v1720_v52, %v880_v47  ;;  %v1741_v53 = vmul.f32 0.6931472, %v3412_v26  ;;  %v1734_v38 = vadd.f32 1.0, %v1733_v61  ;;  %3419 = vlog2.f32 %v1775_v20 }
 0x20e   : > { %vm1746_vm5 = vcmp.lt.f32.partialorder %v1745_v42, 0.0004427343  ;;  %v882_v18 = vmax.f32 %v5801_v34, 0.0  ;;  %v1736_v13 = vand.u32 2147483647, %v4921_v39  ;;  %v1766_v57 = vadd.f32 1.0, %v4986_v49 }
 0x20f   : > { %v1968_v40 = vsel %vm944_vm2, %v5800_v12, %v1904_v27  ;;  %v1747_v36 = vsel %vm1746_vm5, %v1744_v58, %v1741_v53  ;;  %vm946_vm6 = vcmp.ne.f32.partialorder %v5801_v34, %v5801_v34  ;;  %v1751_v9 = vmul.f32 -0.5, %v4938_v30 }
 0x210   : > { %v3414_v15 = vpop.eup %3413  ;;  %2208 = vmatmul.mubr.f32.gmra.mxu1 %v1968_v40  ;;  %v1907_v14 = vadd.f32 %v1747_v36, %v883_v44  ;;  %v1761_v48 = vadd.f32 1.0, %v1760_v4  ;;  %v1763_v10 = vand.u32 2147483647, %v4965_v25  ;;  %3421 = vlog2.f32 %v1766_v57 }
 0x211   : > { %v1732_v29 = vmul.f32 0.6931472, %v3414_v15  ;;  %v1735_v19 = vmul.f32 %v4921_v39, %v1734_v38  ;;  %v1778_v46 = vmul.f32 -0.5, %v5001_v50  ;;  %v1793_v59 = vadd.f32 1.0, %v5039_v8 }
 0x212   : > { %v1971_v21 = vsel %vm947_vm4, %v4810_v22, %v1907_v14  ;;  %vm1737_vm7 = vcmp.lt.f32.partialorder %v1736_v13, 0.0004427343  ;;  %v885_v56 = vmax.f32 %v5802_v28, 0.0  ;;  %vm949_vm8 = vcmp.ne.f32.partialorder %v5802_v28, %v5802_v28  ;;  %v5805_v22 = vld [vmem:[#allocation7_spill] sm:$0xff]  ;;  %v5810_v14 = vld [vmem:[#allocation9_spill] sm:$0xff] }
 0x213   : > { %2212 = vmatprep.mubr.f32.mxu1 %v1971_v21  ;;  %v1738_v62 = vsel %vm1737_vm7, %v1735_v19, %v1732_v29  ;;  %v1752_v12 = vadd.f32 1.0, %v1751_v9  ;;  %v1754_v39 = vand.u32 2147483647, %v4938_v30  ;;  %3423 = vlog2.f32 %v1793_v59 }
 0x214   : > { %v3416_v47 = vpop.eup %3415  ;;  %v1906_v0 = vadd.f32 %v1738_v62, %v882_v18  ;;  %v1762_v24 = vmul.f32 %v4965_v25, %v1761_v48  ;;  %vm5244_vm9 = vcmp.lt.f32.partialorder %v1763_v10, 0.0004427343  ;;  %v884_v3 = vmax.f32 %v5805_v22, 0.0 }
 0x215   : > { %v1759_v43 = vmul.f32 0.6931472, %v3416_v47  ;;  %v1779_v1 = vadd.f32 1.0, %v1778_v46  ;;  %v1781_v61 = vand.u32 2147483647, %v5001_v50  ;;  %v1784_v55 = vadd.f32 1.0, %v5020_v33 }
 0x216   : > { %v1970_v16 = vsel %vm946_vm6, %v5801_v34, %v1906_v0  ;;  %vm948_vm10 = vcmp.ne.f32.partialorder %v5805_v22, %v5805_v22  ;;  %v887_v25 = vmax.f32 %v4883_v54, 0.0  ;;  %v1769_v42 = vmul.f32 -0.5, %v4986_v49  ;;  %v5813_v0 = vld [vmem:[#allocation8_spill] sm:$0xff] }
 0x217   : > { %v3418_v44 = vpop.eup %3417  ;;  %2213 = vmatmul.mubr.f32.gmra.mxu1 %v1970_v16  ;;  %v1765_v20 = vsel %vm5244_vm9, %v1762_v24, %v1759_v43  ;;  %v1753_v26 = vmul.f32 %v4938_v30, %v1752_v12  ;;  %vm5262_vm11 = vcmp.lt.f32.partialorder %v1754_v39, 0.0004427343  ;;  %3425 = vlog2.f32 %v1784_v55 }
 0x218   : > { %v1909_v52 = vadd.f32 %v1765_v20, %v885_v56  ;;  %v1750_v58 = vmul.f32 0.6931472, %v3418_v44  ;;  %v1796_v4 = vmul.f32 -0.5, %v5039_v8  ;;  %v1811_v27 = vadd.f32 1.0, %v5071_v5 }
 0x219   : > { %vm951_vm12 = vcmp.ne.f32.partialorder %v4883_v54, %v4883_v54  ;;  %v1780_v53 = vmul.f32 %v5001_v50, %v1779_v1  ;;  %vm5271_vm13 = vcmp.lt.f32.partialorder %v1781_v61, 0.0004427343  ;;  %v1772_v30 = vand.u32 2147483647, %v4986_v49  ;;  %v5282_v40 = vpop.f32.mrf.mxu0 }
 0x21a   : > { %v3420_v34 = vpop.eup %3419  ;;  %v1973_v18 = vsel %vm949_vm8, %v5802_v28, %v1909_v52  ;;  %v1756_v13 = vsel %vm5262_vm11, %v1753_v26, %v1750_v58  ;;  %v1770_v57 = vadd.f32 1.0, %v1769_v42  ;;  %3427 = vlog2.f32 %v1811_v27 }
 0x21b   : > { %2217 = vmatprep.mubr.f32.mxu1 %v1973_v18  ;;  %v1908_v50 = vadd.f32 %v1756_v13, %v884_v3  ;;  %v1777_v36 = vmul.f32 0.6931472, %v3420_v34  ;;  %v1799_v9 = vand.u32 2147483647, %v5039_v8  ;;  %v1802_v15 = vadd.f32 1.0, %v5064_v41  ;;  %v2101_v19 = vpop.f32.mrf.mxu0 }
 0x21c   : > { %v886_v48 = vmax.f32 %v5810_v14, 0.0  ;;  %vm950_vm14 = vcmp.ne.f32.partialorder %v5810_v14, %v5810_v14  ;;  %v889_v10 = vmax.f32 %v4919_v32, 0.0  ;;  %v1797_v29 = vadd.f32 1.0, %v1796_v4 }
 0x21d   : > { %v3422_v46 = vpop.eup %3421  ;;  %v1972_v59 = vsel %vm948_vm10, %v5805_v22, %v1908_v50  ;;  %v1783_v21 = vsel %vm5271_vm13, %v1780_v53, %v1777_v36  ;;  %vm953_vm15 = vcmp.ne.f32.partialorder %v4919_v32, %v4919_v32  ;;  %v1787_v28 = vmul.f32 -0.5, %v5020_v33  ;;  %v5818_v36 = vld [vmem:[#allocation11_spill] sm:$0xff] }
 0x21e   : > { %3429 = vlog2.f32 %v1802_v15  ;;  %2218 = vmatmul.mubr.f32.gmra.mxu1 %v1972_v59  ;;  %v1911_v56 = vadd.f32 %v1783_v21, %v887_v25  ;;  %v1768_v62 = vmul.f32 0.6931472, %v3422_v46  ;;  %v1771_v12 = vmul.f32 %v4986_v49, %v1770_v57 }
 0x21f   : > { %v1814_v39 = vmul.f32 -0.5, %v5071_v5  ;;  %vm1773_vm0 = vcmp.lt.f32.partialorder %v1772_v30, 0.0004427343  ;;  %vm5301_vm1 = vcmp.lt.f32.partialorder %v1799_v9, 0.0004427343  ;;  %v888_v24 = vmax.f32 %v5813_v0, 0.0 }
 0x220   : > { %v1829_v6 = vadd.f32 1.0, %v5115_v11  ;;  %v3424_v22 = vpop.eup %3423  ;;  %v1975_v3 = vsel %vm951_vm12, %v4883_v54, %v1911_v56  ;;  %v1774_v43 = vsel %vm1773_vm0, %v1771_v12, %v1768_v62  ;;  %v1798_v49 = vmul.f32 %v5039_v8, %v1797_v29 }
 0x221   : > { %v1790_v1 = vand.u32 2147483647, %v5020_v33  ;;  %2222 = vmatprep.mubr.f32.mxu1 %v1975_v3  ;;  %v1910_v61 = vadd.f32 %v1774_v43, %v886_v48  ;;  %v1795_v55 = vmul.f32 0.6931472, %v3424_v22  ;;  %v1788_v16 = vadd.f32 1.0, %v1787_v28  ;;  %v5313_v25 = vpop.f32.mrf.mxu0 }
 0x222   : > { %3431 = vlog2.f32 %v1829_v6  ;;  %vm952_vm2 = vcmp.ne.f32.partialorder %v5813_v0, %v5813_v0  ;;  %v1815_v42 = vadd.f32 1.0, %v1814_v39  ;;  %v1817_v44 = vand.u32 2147483647, %v5071_v5 }
 0x223   : > { %v1820_v54 = vadd.f32 1.0, %v5092_v60  ;;  %v1974_v8 = vsel %vm950_vm14, %v5810_v14, %v1910_v61  ;;  %v1801_v20 = vsel %vm5301_vm1, %v1798_v49, %v1795_v55  ;;  %v891_v26 = vmax.f32 %v4958_v37, 0.0  ;;  %v2106_v52 = vpop.f32.mrf.mxu0 }
 0x224   : > { %v1805_v2 = vmul.f32 -0.5, %v5064_v41  ;;  %v3426_v58 = vpop.eup %3425  ;;  %2223 = vmatmul.mubr.f32.gmra.mxu1 %v1974_v8  ;;  %v1913_v4 = vadd.f32 %v1801_v20, %v889_v10  ;;  %vm5327_vm3 = vcmp.lt.f32.partialorder %v1790_v1, 0.0004427343  ;;  %vm955_vm4 = vcmp.ne.f32.partialorder %v4958_v37, %v4958_v37 }
 0x225   : > { %v1832_v53 = vmul.f32 -0.5, %v5115_v11  ;;  %3433 = vlog2.f32 %v1820_v54  ;;  %v1786_v38 = vmul.f32 0.6931472, %v3426_v58  ;;  %v1789_v30 = vmul.f32 %v5020_v33, %v1788_v16  ;;  %v5350_v33 = vld [vmem:[%s5686_s4] ss:$0 sm:$0xff] }
 0x226   : > { %v1808_v34 = vand.u32 2147483647, %v5064_v41  ;;  %v1847_v18 = vadd.f32 1.0, %v5156_v51  ;;  %v1977_v13 = vsel %vm953_vm15, %v4919_v32, %v1913_v4  ;;  %v1816_v57 = vmul.f32 %v5071_v5, %v1815_v42 }
 0x227   : > { %vm5342_vm5 = vcmp.lt.f32.partialorder %v1817_v44, 0.0004427343  ;;  %v890_v9 = vmax.f32 %v5818_v36, 0.0  ;;  %v2109_v15 = vpop.f32.mrf.mxu1  ;;  %v3428_v14 = vpop.eup %3427  ;;  %2227 = vmatprep.mubr.f32.mxu1 %v1977_v13  ;;  %v1792_v48 = vsel %vm5327_vm3, %v1789_v30, %v1786_v38  ;;  %vm954_vm6 = vcmp.ne.f32.partialorder %v5818_v36, %v5818_v36 }
 0x228   : > { %v1806_v32 = vadd.f32 1.0, %v1805_v2  ;;  %v893_v5 = vmax.f32 %v4994_v45, 0.0  ;;  %3435 = vlog2.f32 %v1847_v18  ;;  %v1912_v10 = vadd.f32 %v1792_v48, %v888_v24 }
 0x229   : > { %v1813_v29 = vmul.f32 0.6931472, %v3428_v14  ;;  %v1833_v19 = vadd.f32 1.0, %v1832_v53  ;;  %v1838_v46 = vadd.f32 1.0, %v5137_v31  ;;  %v2111_v59 = vpop.f32.mrf.mxu1  ;;  %vm5358_vm7 = vcmp.lt.f32.partialorder %v1808_v34, 0.0004427343 }
 0x22a   : > { %v1835_v28 = vand.u32 2147483647, %v5115_v11  ;;  %v1823_v56 = vmul.f32 -0.5, %v5092_v60  ;;  %v5366_v62 = vadd.f32 %v5350_v33, %v5172_v7  ;;  %v1976_v39 = vsel %vm952_vm2, %v5813_v0, %v1912_v10 }
 0x22b   : > { %v3430_v12 = vpop.eup %3429  ;;  %v1819_v47 = vsel %vm5342_vm5, %v1816_v57, %v1813_v29  ;;  %v1850_v24 = vmul.f32 -0.5, %v5156_v51  ;;  %3437 = vlog2.f32 %v1838_v46  ;;  %2228 = vmatmul.mubr.f32.gmra.mxu1 %v1976_v39  ;;  %v1807_v3 = vmul.f32 %v5064_v41, %v1806_v32 }
 0x22c   : > { %v1915_v6 = vadd.f32 %v1819_v47, %v891_v26  ;;  %v1804_v22 = vmul.f32 0.6931472, %v3430_v12  ;;  %vm957_vm8 = vcmp.ne.f32.partialorder %v4994_v45, %v4994_v45  ;;  %v892_v7 = vmax.f32 %v4979_v35, 0.0 }
 0x22d   : > { %v1834_v43 = vmul.f32 %v5115_v11, %v1833_v19  ;;  %v1826_v0 = vand.u32 2147483647, %v5092_v60  ;;  %v2752_v49 = vmul.f32 -1.442695, %v5366_v62  ;;  %v5384_v1 = vadd.f32 %v5350_v33, %v5200_v17 }
 0x22e   : > { %v1979_v41 = vsel %vm955_vm4, %v4958_v37, %v1915_v6  ;;  %v1810_v61 = vsel %vm5358_vm7, %v1807_v3, %v1804_v22  ;;  %v1824_v55 = vadd.f32 1.0, %v1823_v56  ;;  %v5394_v11 = vadd.f32 %v5350_v33, %v5282_v40 }
 0x22f   : > { %v3432_v16 = vpop.eup %3431  ;;  %2232 = vmatprep.mubr.f32.mxu1 %v1979_v41  ;;  %v1914_v42 = vadd.f32 %v1810_v61, %v890_v9  ;;  %v1851_v44 = vadd.f32 1.0, %v1850_v24  ;;  %3439 = vpow2.f32 %v2752_v49  ;;  %v2753_v17 = vmul.f32 -1.442695, %v5384_v1 }
 0x230   : > { %v1831_v54 = vmul.f32 0.6931472, %v3432_v16  ;;  %v2754_v8 = vmul.f32 -1.442695, %v5394_v11  ;;  %v5400_v37 = vadd.f32 %v5350_v33, %v5313_v25  ;;  %v5403_v20 = vadd.f32 %v5350_v33, %v2109_v15 }
 0x231   : > { %v1978_v40 = vsel %vm954_vm6, %v5818_v36, %v1914_v42  ;;  %vm1836_vm9 = vcmp.lt.f32.partialorder %v1835_v28, 0.0004427343  ;;  %v1841_v26 = vmul.f32 -0.5, %v5137_v31  ;;  %3441 = vpow2.f32 %v2753_v17  ;;  %v2114_v30 = vpop.f32.mrf.mxu1 }
 0x232   : > { %v3434_v2 = vpop.eup %3433  ;;  %2233 = vmatmul.mubr.f32.gmra.mxu1 %v1978_v40  ;;  %v1837_v52 = vsel %vm1836_vm9, %v1834_v43, %v1831_v54  ;;  %3443 = vpow2.f32 %v2754_v8  ;;  %v2755_v58 = vmul.f32 -1.442695, %v5400_v37  ;;  %v2756_v25 = vmul.f32 -1.442695, %v5403_v20 }
 0x233   : > { %v1917_v4 = vadd.f32 %v1837_v52, %v893_v5  ;;  %v1822_v27 = vmul.f32 0.6931472, %v3434_v2  ;;  %v1825_v53 = vmul.f32 %v5092_v60, %v1824_v55  ;;  %v1853_v38 = vand.u32 2147483647, %v5156_v51  ;;  %v2116_v60 = vpop.f32.mrf.mxu1 }
 0x234   : > { %vm1827_vm10 = vcmp.lt.f32.partialorder %v1826_v0, 0.0004427343  ;;  %v1852_v34 = vmul.f32 %v5156_v51, %v1851_v44  ;;  %3445 = vpow2.f32 %v2755_v58  ;;  %v5416_v18 = vadd.f32 %v5350_v33, %v2114_v30 }
 0x235   : > { %v3436_v13 = vpop.eup %3435  ;;  %v1981_v57 = vsel %vm957_vm8, %v4994_v45, %v1917_v4  ;;  %v1828_v50 = vsel %vm1827_vm10, %v1825_v53, %v1822_v27  ;;  %v1842_v36 = vadd.f32 1.0, %v1841_v26  ;;  %3447 = vpow2.f32 %v2756_v25 }
 0x236   : > { %2237 = vmatprep.mubr.f32.mxu1 %v1981_v57  ;;  %v1916_v9 = vadd.f32 %v1828_v50, %v892_v7  ;;  %v1849_v15 = vmul.f32 0.6931472, %v3436_v13  ;;  %v1844_v14 = vand.u32 2147483647, %v5137_v31  ;;  %v2757_v51 = vmul.f32 -1.442695, %v5416_v18 }
 0x237   : > { %vm956_vm11 = vcmp.ne.f32.partialorder %v4979_v35, %v4979_v35  ;;  %v895_v48 = vmax.f32 %v5026_v63, 0.0  ;;  %vm1854_vm12 = vcmp.lt.f32.partialorder %v1853_v38, 0.0004427343  ;;  %v1843_v19 = vmul.f32 %v5137_v31, %v1842_v36 }
 0x238   : > { %v3438_v32 = vpop.eup %3437  ;;  %v1980_v45 = vsel %vm956_vm11, %v4979_v35, %v1916_v9  ;;  %v1855_v5 = vsel %vm1854_vm12, %v1852_v34, %v1849_v15  ;;  %3449 = vpow2.f32 %v2757_v51  ;;  %vm959_vm13 = vcmp.ne.f32.partialorder %v5026_v63, %v5026_v63 }
 0x239   : > { %2238 = vmatmul.mubr.f32.gmra.mxu1 %v1980_v45  ;;  %v1919_v10 = vadd.f32 %v1855_v5, %v895_v48  ;;  %v1840_v29 = vmul.f32 0.6931472, %v3438_v32  ;;  %v894_v46 = vmax.f32 %v5017_v23, 0.0  ;;  %vm1845_vm14 = vcmp.lt.f32.partialorder %v1844_v14, 0.0004427343 }
 0x23a   : > { %vm958_vm15 = vcmp.ne.f32.partialorder %v5017_v23, %v5017_v23  ;;  %v5821_v61 = vlaneseq  ;;  %vm2551_vm1 = vcmask 130048  }
 0x23b   : > { %v1983_v59 = vsel %vm959_vm13, %v5026_v63, %v1919_v10  ;;  %v1846_v21 = vsel %vm1845_vm14, %v1843_v19, %v1840_v29 }
 0x23c   : > { %v3440_v28 = vpop.eup %3439  ;;  %2242 = vmatprep.mubr.f32.mxu1 %v1983_v59  ;;  %v1918_v56 = vadd.f32 %v1846_v21, %v894_v46  ;;  %v2119_v12 = vpop.f32.mrf.mxu1  ;;  %v2505_v55 = vand.u32 127, %v5821_v61 }
 0x23d   : > { %v2344_v35 = vadd.f32 1.0, %v3440_v28  ;;  %v5437_v47 = vadd.f32 %v5350_v33, %v2119_v12 }
 0x23e   : > { %v3442_v39 = vpop.eup %3441  ;;  %v1982_v31 = vsel %vm958_vm15, %v5017_v23, %v1918_v56  ;;  %v2121_v6 = vpop.f32.mrf.mxu1  ;;  %v2510_v54 = vand.u32 3, %v2505_v55 }
 0x23f   : > { %v3444_v24 = vpop.eup %3443  ;;  %2243 = vmatmul.mubr.f32.gmra.mxu1 %v1982_v31  ;;  %3451 = vrcp.f32 %v2344_v35  ;;  %v2345_v63 = vadd.f32 1.0, %v3442_v39  ;;  %v2758_v3 = vmul.f32 -1.442695, %v5437_v47 }
 0x240   : > { %v2346_v22 = vadd.f32 1.0, %v3444_v24  ;;  %vm5447_vm0 = vcmp.lt.s32.totalorder %v2510_v54, 3 }
 0x241   : > { %v3446_v7 = vpop.eup %3445  ;;  %3453 = vrcp.f32 %v2345_v63 }
 0x242   : > { %v3448_v43 = vpop.eup %3447  ;;  %3455 = vrcp.f32 %v2346_v22  ;;  %v2347_v0 = vadd.f32 1.0, %v3446_v7 }
 0x243   : > { %v2348_v49 = vadd.f32 1.0, %v3448_v43  ;;  %3457 = vpow2.f32 %v2758_v3 }
 0x244   : > { %3459 = vrcp.f32 %v2347_v0  ;;  %v2124_v41 = vpop.f32.mrf.mxu1 }
 0x245   : > { %v3450_v23 = vpop.eup %3449  ;;  %3461 = vrcp.f32 %v2348_v49  ;;  %v5443_v42 = vadd.f32 %v5350_v33, %v2124_v41 }
 0x246   : > { %v2349_v16 = vadd.f32 1.0, %v3450_v23  ;;  %v2126_v44 = vpop.f32.mrf.mxu1 }
 0x247   : > { %v2759_v17 = vmul.f32 -1.442695, %v5443_v42 }
 0x248   : > { %3463 = vrcp.f32 %v2349_v16 }
 0x249   : > { %3465 = vpow2.f32 %v2759_v17 }
 0x24c   : > { %v3452_v8 = vpop.eup %3451 }
 0x24d   : > { %v2440_v40 = vmul.f32 1.002, %v3452_v8  ;;  %v2129_v52 = vpop.f32.mrf.mxu1 }
 0x24e   : > { %v3454_v26 = vpop.eup %3453  ;;  %v5457_v27 = vadd.f32 %v5350_v33, %v2129_v52 }
 0x24f   : > { %v3456_v58 = vpop.eup %3455  ;;  %v2784_v25 = vadd.f32 -0.001, %v2440_v40  ;;  %v2441_v4 = vmul.f32 1.002, %v3454_v26  ;;  %v2131_v30 = vpop.f32.mrf.mxu1 }
 0x250   : > { %v3458_v53 = vpop.eup %3457  ;;  %v2442_v38 = vmul.f32 1.002, %v3456_v58  ;;  %v2760_v36 = vmul.f32 -1.442695, %v5457_v27 }
 0x251   : > { %v3460_v34 = vpop.eup %3459  ;;  %v2519_v13 = vsel %vm5447_vm0, %v2784_v25, %v5366_v62  ;;  %v2785_v57 = vadd.f32 -0.001, %v2441_v4  ;;  %v2350_v50 = vadd.f32 1.0, %v3458_v53 }
 0x252   : > { %v3462_v60 = vpop.eup %3461  ;;  %2552 = vst.msk [vmem:[%s5454_s30] sm:$0xff] %vm2551_vm1, %v2519_v13  ;;  %v2786_v9 = vadd.f32 -0.001, %v2442_v38  ;;  %v2443_v15 = vmul.f32 1.002, %v3460_v34 }
 0x253   : > { %v2520_v14 = vsel %vm5447_vm0, %v2785_v57, %v5384_v1  ;;  %v2444_v51 = vmul.f32 1.002, %v3462_v60  ;;  %3467 = vrcp.f32 %v2350_v50 }
 0x254   : > { %2553 = vst.msk [vmem:[%s5454_s30 + $0x8] sm:$0xff] %vm2551_vm1, %v2520_v14  ;;  %v2521_v62 = vsel %vm5447_vm0, %v2786_v9, %v5394_v11  ;;  %v2787_v48 = vadd.f32 -0.001, %v2443_v15  ;;  %3469 = vpow2.f32 %v2760_v36 }
 0x255   : > { %v3464_v32 = vpop.eup %3463  ;;  %2554 = vst.msk [vmem:[%s5454_s30 + $0x10] sm:$0xff] %vm2551_vm1, %v2521_v62  ;;  %v2788_v45 = vadd.f32 -0.001, %v2444_v51  ;;  %v2134_v10 = vpop.f32.mrf.mxu1 }
 0x256   : > { %v2522_v1 = vsel %vm5447_vm0, %v2787_v48, %v5400_v37  ;;  %v2445_v5 = vmul.f32 1.002, %v3464_v32  ;;  %v3466_v29 = vpop.eup %3465  ;;  %v2135_v19 = vadd.f32 %v5350_v33, %v2134_v10 }
 0x257   : > { %2555 = vst.msk [vmem:[%s5454_s30 + $0x18] sm:$0xff] %vm2551_vm1, %v2522_v1  ;;  %v2523_v11 = vsel %vm5447_vm0, %v2788_v45, %v5403_v20  ;;  %v2351_v59 = vadd.f32 1.0, %v3466_v29  ;;  %v2136_v21 = vpop.f32.mrf.mxu1 }
 0x258   : > { %2556 = vst.msk [vmem:[%s5454_s30 + $0x20] sm:$0xff] %vm2551_vm1, %v2523_v11  ;;  %v2789_v46 = vadd.f32 -0.001, %v2445_v5  ;;  %v2761_v28 = vmul.f32 -1.442695, %v2135_v19 }
 0x259   : > { %3471 = vrcp.f32 %v2351_v59 }
 0x25a   : > { %v2524_v37 = vsel %vm5447_vm0, %v2789_v46, %v5416_v18  ;;  %3473 = vpow2.f32 %v2761_v28 }
 0x25b   : > { %2557 = vst.msk [vmem:[%s5454_s30 + $0x28] sm:$0xff] %vm2551_vm1, %v2524_v37 }
 0x25e   : > { %v2139_v35 = vpop.f32.mrf.mxu1 }
 0x25f   : > { %v2140_v39 = vadd.f32 %v5350_v33, %v2139_v35 }
 0x260   : > { %v3468_v56 = vpop.eup %3467  ;;  %v2141_v24 = vpop.f32.mrf.mxu1 }
 0x261   : > { %v3470_v20 = vpop.eup %3469  ;;  %v2446_v12 = vmul.f32 1.002, %v3468_v56  ;;  %v2762_v6 = vmul.f32 -1.442695, %v2140_v39 }
 0x262   : > { %v2352_v31 = vadd.f32 1.0, %v3470_v20 }
 0x263   : > { %v2790_v63 = vadd.f32 -0.001, %v2446_v12 }
 0x264   : > { %3475 = vrcp.f32 %v2352_v31 }
 0x265   : > { %v2525_v18 = vsel %vm5447_vm0, %v2790_v63, %v5437_v47  ;;  %3477 = vpow2.f32 %v2762_v6 }
 0x266   : > { %2558 = vst.msk [vmem:[%s5454_s30 + $0x30] sm:$0xff] %vm2551_vm1, %v2525_v18  ;;  %v3472_v22 = vpop.eup %3471 }
 0x267   : > { %v3474_v3 = vpop.eup %3473  ;;  %v2447_v7 = vmul.f32 1.002, %v3472_v22  ;;  %v2144_v0 = vpop.f32.mrf.mxu1 }
 0x268   : > { %v2353_v43 = vadd.f32 1.0, %v3474_v3  ;;  %v2145_v23 = vadd.f32 %v5350_v33, %v2144_v0 }
 0x269   : > { %v2791_v49 = vadd.f32 -0.001, %v2447_v7  ;;  %v2146_v41 = vpop.f32.mrf.mxu1 }
 0x26a   : > { %3479 = vrcp.f32 %v2353_v43  ;;  %v2763_v55 = vmul.f32 -1.442695, %v2145_v23 }
 0x26b   : > { %v2526_v61 = vsel %vm5447_vm0, %v2791_v49, %v5443_v42 }
 0x26c   : > { %2559 = vst.msk [vmem:[%s5454_s30 + $0x38] sm:$0xff] %vm2551_vm1, %v2526_v61  ;;  %3481 = vpow2.f32 %v2763_v55 }
 0x271   : > { %v3476_v47 = vpop.eup %3475  ;;  %v2149_v17 = vpop.f32.mrf.mxu1 }
 0x272   : > { %v3478_v16 = vpop.eup %3477  ;;  %v2448_v44 = vmul.f32 1.002, %v3476_v47  ;;  %v2150_v8 = vadd.f32 %v5350_v33, %v2149_v17 }
 0x273   : > { %v2354_v54 = vadd.f32 1.0, %v3478_v16  ;;  %v2151_v26 = vpop.f32.mrf.mxu1 }
 0x274   : > { %v2792_v40 = vadd.f32 -0.001, %v2448_v44  ;;  %v2764_v52 = vmul.f32 -1.442695, %v2150_v8 }
 0x275   : > { %3483 = vrcp.f32 %v2354_v54 }
 0x276   : > { %v2527_v42 = vsel %vm5447_vm0, %v2792_v40, %v5457_v27  ;;  %3485 = vpow2.f32 %v2764_v52 }
 0x277   : > { %2560 = vst.msk [vmem:[%s5454_s30 + $0x40] sm:$0xff] %vm2551_vm1, %v2527_v42  ;;  %v3480_v58 = vpop.eup %3479 }
 0x278   : > { %v2449_v25 = vmul.f32 1.002, %v3480_v58 }
 0x279   : > { %v2154_v4 = vpop.f32.mrf.mxu1  ;;  %v3482_v53 = vpop.eup %3481 }
 0x27a   : > { %v2793_v38 = vadd.f32 -0.001, %v2449_v25  ;;  %v2155_v30 = vadd.f32 %v5350_v33, %v2154_v4  ;;  %v2355_v34 = vadd.f32 1.0, %v3482_v53 }
 0x27b   : > { %v2156_v13 = vpop.f32.mrf.mxu1 }
 0x27c   : > { %v2528_v57 = vsel %vm5447_vm0, %v2793_v38, %v2135_v19  ;;  %v2765_v50 = vmul.f32 -1.442695, %v2155_v30  ;;  %3487 = vrcp.f32 %v2355_v34 }
 0x27d   : > { %2561 = vst.msk [vmem:[%s5454_s30 + $0x48] sm:$0xff] %vm2551_vm1, %v2528_v57 }
 0x27e   : > { %3489 = vpow2.f32 %v2765_v50 }
 0x282   : > { %v3484_v27 = vpop.eup %3483  ;;  %v2159_v9 = vpop.f32.mrf.mxu1 }
 0x283   : > { %v2450_v36 = vmul.f32 1.002, %v3484_v27  ;;  %v3486_v60 = vpop.eup %3485  ;;  %v2160_v51 = vadd.f32 %v5350_v33, %v2159_v9 }
 0x284   : > { %v2356_v14 = vadd.f32 1.0, %v3486_v60  ;;  %v2161_v62 = vpop.f32.mrf.mxu1 }
 0x285   : > { %v2794_v15 = vadd.f32 -0.001, %v2450_v36  ;;  %v2766_v32 = vmul.f32 -1.442695, %v2160_v51 }
 0x286   : > { %3491 = vrcp.f32 %v2356_v14 }
 0x287   : > { %v2529_v48 = vsel %vm5447_vm0, %v2794_v15, %v2140_v39  ;;  %3493 = vpow2.f32 %v2766_v32 }
 0x288   : > { %2562 = vst.msk [vmem:[%s5454_s30 + $0x50] sm:$0xff] %vm2551_vm1, %v2529_v48 }
 0x289   : > { %v3488_v45 = vpop.eup %3487 }
 0x28a   : > { %v2451_v5 = vmul.f32 1.002, %v3488_v45 }
 0x28b   : > { %v3490_v1 = vpop.eup %3489  ;;  %v2164_v29 = vpop.f32.mrf.mxu1 }
 0x28c   : > { %v2357_v10 = vadd.f32 1.0, %v3490_v1  ;;  %v2795_v11 = vadd.f32 -0.001, %v2451_v5  ;;  %v2165_v19 = vadd.f32 %v5350_v33, %v2164_v29 }
 0x28d   : > { %v2166_v46 = vpop.f32.mrf.mxu1 }
 0x28e   : > { %3495 = vrcp.f32 %v2357_v10  ;;  %v2530_v59 = vsel %vm5447_vm0, %v2795_v11, %v2145_v23  ;;  %v2767_v21 = vmul.f32 -1.442695, %v2165_v19 }
 0x28f   : > { %2563 = vst.msk [vmem:[%s5454_s30 + $0x58] sm:$0xff] %vm2551_vm1, %v2530_v59 }
 0x290   : > { %3497 = vpow2.f32 %v2767_v21 }
 0x293   : > { %v3492_v28 = vpop.eup %3491 }
 0x294   : > { %v2452_v37 = vmul.f32 1.002, %v3492_v28  ;;  %v3494_v56 = vpop.eup %3493 }
 0x295   : > { %v2169_v35 = vpop.f32.mrf.mxu1  ;;  %v2358_v12 = vadd.f32 1.0, %v3494_v56 }
 0x296   : > { %v2796_v20 = vadd.f32 -0.001, %v2452_v37  ;;  %v2170_v39 = vadd.f32 %v5350_v33, %v2169_v35 }
 0x297   : > { %v2171_v31 = vpop.f32.mrf.mxu1  ;;  %3499 = vrcp.f32 %v2358_v12 }
 0x298   : > { %v2531_v24 = vsel %vm5447_vm0, %v2796_v20, %v2150_v8  ;;  %v2768_v63 = vmul.f32 -1.442695, %v2170_v39 }
 0x299   : > { %2564 = vst.msk [vmem:[%s5454_s30 + $0x60] sm:$0xff] %vm2551_vm1, %v2531_v24 }
 0x29a   : > { %3501 = vpow2.f32 %v2768_v63 }
 0x29b   : > { %v3496_v6 = vpop.eup %3495 }
 0x29c   : > { %v2453_v18 = vmul.f32 1.002, %v3496_v6 }
 0x29d   : > { %v2174_v22 = vpop.f32.mrf.mxu1  ;;  %v3498_v3 = vpop.eup %3497 }
 0x29e   : > { %v2797_v7 = vadd.f32 -0.001, %v2453_v18  ;;  %v2175_v43 = vadd.f32 %v5350_v33, %v2174_v22  ;;  %v2359_v0 = vadd.f32 1.0, %v3498_v3 }
 0x29f   : > { %v2176_v49 = vpop.f32.mrf.mxu1 }
 0x2a0   : > { %v2532_v23 = vsel %vm5447_vm0, %v2797_v7, %v2155_v30  ;;  %v2769_v41 = vmul.f32 -1.442695, %v2175_v43  ;;  %3503 = vrcp.f32 %v2359_v0 }
 0x2a1   : > { %2565 = vst.msk [vmem:[%s5454_s30 + $0x68] sm:$0xff] %vm2551_vm1, %v2532_v23 }
 0x2a2   : > { %3505 = vpow2.f32 %v2769_v41 }
 0x2a4   : > { %v3500_v61 = vpop.eup %3499 }
 0x2a5   : > { %v2454_v55 = vmul.f32 1.002, %v3500_v61 }
 0x2a6   : > { %v2179_v16 = vpop.f32.mrf.mxu1 }
 0x2a7   : > { %v3502_v47 = vpop.eup %3501  ;;  %v2798_v44 = vadd.f32 -0.001, %v2454_v55  ;;  %v5535_v54 = vadd.f32 %v5350_v33, %v2179_v16 }
 0x2a8   : > { %v2360_v17 = vadd.f32 1.0, %v3502_v47  ;;  %v2181_v8 = vpop.f32.mrf.mxu1 }
 0x2a9   : > { %v2533_v40 = vsel %vm5447_vm0, %v2798_v44, %v2160_v51  ;;  %v2770_v26 = vmul.f32 -1.442695, %v5535_v54 }
 0x2aa   : > { %3507 = vrcp.f32 %v2360_v17  ;;  %2566 = vst.msk [vmem:[%s5454_s30 + $0x70] sm:$0xff] %vm2551_vm1, %v2533_v40 }
 0x2ab   : > { %3509 = vpow2.f32 %v2770_v26 }
 0x2ad   : > { %v3504_v52 = vpop.eup %3503 }
 0x2ae   : > { %v2455_v58 = vmul.f32 1.002, %v3504_v52 }
 0x2af   : > { %v3506_v42 = vpop.eup %3505  ;;  %v2184_v4 = vpop.f32.mrf.mxu1 }
 0x2b0   : > { %v2361_v25 = vadd.f32 1.0, %v3506_v42  ;;  %v2799_v53 = vadd.f32 -0.001, %v2455_v58  ;;  %v5543_v38 = vadd.f32 %v5350_v33, %v2184_v4 }
 0x2b1   : > { %v2186_v30 = vpop.f32.mrf.mxu1 }
 0x2b2   : > { %3511 = vrcp.f32 %v2361_v25  ;;  %v2534_v34 = vsel %vm5447_vm0, %v2799_v53, %v2165_v19  ;;  %v2771_v13 = vmul.f32 -1.442695, %v5543_v38 }
 0x2b3   : > { %2567 = vst.msk [vmem:[%s5454_s30 + $0x78] sm:$0xff] %vm2551_vm1, %v2534_v34 }
 0x2b4   : > { %3513 = vpow2.f32 %v2771_v13 }
 0x2b7   : > { %v3508_v57 = vpop.eup %3507 }
 0x2b8   : > { %v2456_v50 = vmul.f32 1.002, %v3508_v57  ;;  %v3510_v27 = vpop.eup %3509 }
 0x2b9   : > { %v2189_v36 = vpop.f32.mrf.mxu1  ;;  %v2362_v9 = vadd.f32 1.0, %v3510_v27 }
 0x2ba   : > { %v2800_v60 = vadd.f32 -0.001, %v2456_v50  ;;  %v5551_v15 = vadd.f32 %v5350_v33, %v2189_v36 }
 0x2bb   : > { %v2191_v14 = vpop.f32.mrf.mxu1  ;;  %3515 = vrcp.f32 %v2362_v9 }
 0x2bc   : > { %v2535_v51 = vsel %vm5447_vm0, %v2800_v60, %v2170_v39  ;;  %v2772_v62 = vmul.f32 -1.442695, %v5551_v15 }
 0x2bd   : > { %2568 = vst.msk [vmem:[%s5454_s30 + $0x80] sm:$0xff] %vm2551_vm1, %v2535_v51 }
 0x2be   : > { %3517 = vpow2.f32 %v2772_v62  ;;  %v2194_v48 = vpop.f32.mrf.mxu1 }
 0x2bf   : > { %v3512_v32 = vpop.eup %3511  ;;  %v5559_v45 = vadd.f32 %v5350_v33, %v2194_v48 }
 0x2c0   : > { %v2457_v1 = vmul.f32 1.002, %v3512_v32  ;;  %v2196_v5 = vpop.f32.mrf.mxu1 }
 0x2c1   : > { %v2773_v10 = vmul.f32 -1.442695, %v5559_v45  ;;  %v3514_v29 = vpop.eup %3513 }
 0x2c2   : > { %v2801_v11 = vadd.f32 -0.001, %v2457_v1  ;;  %v2363_v19 = vadd.f32 1.0, %v3514_v29 }
 0x2c3   : > { %3519 = vpow2.f32 %v2773_v10 }
 0x2c4   : > { %v2536_v46 = vsel %vm5447_vm0, %v2801_v11, %v2175_v43  ;;  %v2199_v59 = vpop.f32.mrf.mxu1  ;;  %3521 = vrcp.f32 %v2363_v19 }
 0x2c5   : > { %2569 = vst.msk [vmem:[%s5454_s30 + $0x88] sm:$0xff] %vm2551_vm1, %v2536_v46  ;;  %v5567_v21 = vadd.f32 %v5350_v33, %v2199_v59 }
 0x2c6   : > { %v2201_v28 = vpop.f32.mrf.mxu1 }
 0x2c7   : > { %v2774_v37 = vmul.f32 -1.442695, %v5567_v21 }
 0x2c8   : > { %v2204_v56 = vpop.f32.mrf.mxu1  ;;  %v3516_v35 = vpop.eup %3515 }
 0x2c9   : > { %3523 = vpow2.f32 %v2774_v37  ;;  %v5571_v20 = vadd.f32 %v5350_v33, %v2204_v56  ;;  %v2458_v12 = vmul.f32 1.002, %v3516_v35 }
 0x2ca   : > { %v2206_v39 = vpop.f32.mrf.mxu1 }
 0x2cb   : > { %v3518_v31 = vpop.eup %3517  ;;  %v2775_v24 = vmul.f32 -1.442695, %v5571_v20  ;;  %v2802_v63 = vadd.f32 -0.001, %v2458_v12 }
 0x2cc   : > { %v2364_v6 = vadd.f32 1.0, %v3518_v31 }
 0x2cd   : > { %3525 = vpow2.f32 %v2775_v24  ;;  %v2537_v18 = vsel %vm5447_vm0, %v2802_v63, %v5535_v54 }
 0x2ce   : > { %3527 = vrcp.f32 %v2364_v6  ;;  %2570 = vst.msk [vmem:[%s5454_s30 + $0x90] sm:$0xff] %vm2551_vm1, %v2537_v18 }
 0x2d0   : > { %v3520_v22 = vpop.eup %3519  ;;  %v2209_v3 = vpop.f32.mrf.mxu1 }
 0x2d1   : > { %v2365_v7 = vadd.f32 1.0, %v3520_v22  ;;  %v5580_v43 = vadd.f32 %v5350_v33, %v2209_v3  ;;  %v3522_v0 = vpop.eup %3521 }
 0x2d2   : > { %v2211_v49 = vpop.f32.mrf.mxu1  ;;  %v2459_v23 = vmul.f32 1.002, %v3522_v0 }
 0x2d3   : > { %3529 = vrcp.f32 %v2365_v7  ;;  %v2776_v41 = vmul.f32 -1.442695, %v5580_v43 }
 0x2d4   : > { %v2803_v61 = vadd.f32 -0.001, %v2459_v23 }
 0x2d5   : > { %3531 = vpow2.f32 %v2776_v41 }
 0x2d6   : > { %v3524_v55 = vpop.eup %3523  ;;  %v2538_v47 = vsel %vm5447_vm0, %v2803_v61, %v5543_v38 }
 0x2d7   : > { %v2366_v16 = vadd.f32 1.0, %v3524_v55  ;;  %v2214_v44 = vpop.f32.mrf.mxu1  ;;  %2571 = vst.msk [vmem:[%s5454_s30 + $0x98] sm:$0xff] %vm2551_vm1, %v2538_v47 }
 0x2d8   : > { %v5589_v17 = vadd.f32 %v5350_v33, %v2214_v44 }
 0x2d9   : > { %3533 = vrcp.f32 %v2366_v16  ;;  %v2216_v54 = vpop.f32.mrf.mxu1 }
 0x2da   : > { %v3526_v8 = vpop.eup %3525  ;;  %v2777_v40 = vmul.f32 -1.442695, %v5589_v17 }
 0x2db   : > { %v3528_v26 = vpop.eup %3527  ;;  %v2367_v52 = vadd.f32 1.0, %v3526_v8 }
 0x2dc   : > { %v2460_v42 = vmul.f32 1.002, %v3528_v26  ;;  %3535 = vpow2.f32 %v2777_v40 }
 0x2dd   : > { %3537 = vrcp.f32 %v2367_v52 }
 0x2de   : > { %v2804_v58 = vadd.f32 -0.001, %v2460_v42  ;;  %v2219_v25 = vpop.f32.mrf.mxu1 }
 0x2df   : > { %v5593_v4 = vadd.f32 %v5350_v33, %v2219_v25 }
 0x2e0   : > { %v3530_v53 = vpop.eup %3529  ;;  %v2539_v38 = vsel %vm5447_vm0, %v2804_v58, %v5551_v15  ;;  %v2221_v30 = vpop.f32.mrf.mxu1 }
 0x2e1   : > { %2572 = vst.msk [vmem:[%s5454_s30 + $0xa0] sm:$0xff] %vm2551_vm1, %v2539_v38  ;;  %v2461_v34 = vmul.f32 1.002, %v3530_v53  ;;  %v2778_v13 = vmul.f32 -1.442695, %v5593_v4 }
 0x2e2   : > { %v3532_v57 = vpop.eup %3531 }
 0x2e3   : > { %v2805_v50 = vadd.f32 -0.001, %v2461_v34  ;;  %v2368_v27 = vadd.f32 1.0, %v3532_v57  ;;  %3539 = vpow2.f32 %v2778_v13 }
 0x2e4   : > { %v2224_v36 = vpop.f32.mrf.mxu1 }
 0x2e5   : > { %v2540_v60 = vsel %vm5447_vm0, %v2805_v50, %v5559_v45  ;;  %3541 = vrcp.f32 %v2368_v27  ;;  %v5605_v9 = vadd.f32 %v5350_v33, %v2224_v36 }
 0x2e6   : > { %v3534_v15 = vpop.eup %3533  ;;  %2573 = vst.msk [vmem:[%s5454_s30 + $0xa8] sm:$0xff] %vm2551_vm1, %v2540_v60  ;;  %v2226_v14 = vpop.f32.mrf.mxu1 }
 0x2e7   : > { %v2462_v51 = vmul.f32 1.002, %v3534_v15  ;;  %v2779_v62 = vmul.f32 -1.442695, %v5605_v9 }
 0x2e9   : > { %v3536_v48 = vpop.eup %3535  ;;  %v2806_v32 = vadd.f32 -0.001, %v2462_v51  ;;  %3543 = vpow2.f32 %v2779_v62 }
 0x2ea   : > { %v3538_v1 = vpop.eup %3537  ;;  %v2369_v5 = vadd.f32 1.0, %v3536_v48 }
 0x2eb   : > { %v2541_v45 = vsel %vm5447_vm0, %v2806_v32, %v5567_v21  ;;  %v2463_v10 = vmul.f32 1.002, %v3538_v1  ;;  %v2229_v29 = vpop.f32.mrf.mxu1 }
 0x2ec   : > { %2574 = vst.msk [vmem:[%s5454_s30 + $0xb0] sm:$0xff] %vm2551_vm1, %v2541_v45  ;;  %3545 = vrcp.f32 %v2369_v5  ;;  %v5616_v11 = vadd.f32 %v5350_v33, %v2229_v29 }
 0x2ed   : > { %v2807_v19 = vadd.f32 -0.001, %v2463_v10  ;;  %v2231_v46 = vpop.f32.mrf.mxu1 }
 0x2ee   : > { %v2780_v59 = vmul.f32 -1.442695, %v5616_v11 }
 0x2ef   : > { %v2542_v28 = vsel %vm5447_vm0, %v2807_v19, %v5571_v20 }
 0x2f0   : > { %v3540_v37 = vpop.eup %3539  ;;  %2575 = vst.msk [vmem:[%s5454_s30 + $0xb8] sm:$0xff] %vm2551_vm1, %v2542_v28  ;;  %3547 = vpow2.f32 %v2780_v59 }
 0x2f1   : > { %v2370_v21 = vadd.f32 1.0, %v3540_v37 }
 0x2f2   : > { %v2234_v56 = vpop.f32.mrf.mxu1  ;;  %v3542_v35 = vpop.eup %3541 }
 0x2f3   : > { %v2235_v12 = vadd.f32 %v5350_v33, %v2234_v56  ;;  %v2464_v39 = vmul.f32 1.002, %v3542_v35  ;;  %3549 = vrcp.f32 %v2370_v21 }
 0x2f4   : > { %v2236_v31 = vpop.f32.mrf.mxu1 }
 0x2f5   : > { %v2781_v24 = vmul.f32 -1.442695, %v2235_v12  ;;  %v2808_v63 = vadd.f32 -0.001, %v2464_v39 }
 0x2f6   : > { %v3544_v6 = vpop.eup %3543 }
 0x2f7   : > { %3551 = vpow2.f32 %v2781_v24  ;;  %v2543_v20 = vsel %vm5447_vm0, %v2808_v63, %v5580_v43  ;;  %v2371_v18 = vadd.f32 1.0, %v3544_v6 }
 0x2f8   : > { %2576 = vst.msk [vmem:[%s5454_s30 + $0xc0] sm:$0xff] %vm2551_vm1, %v2543_v20 }
 0x2f9   : > { %v2239_v22 = vpop.f32.mrf.mxu1  ;;  %v3546_v3 = vpop.eup %3545  ;;  %3553 = vrcp.f32 %v2371_v18 }
 0x2fa   : > { %v2240_v7 = vadd.f32 %v5350_v33, %v2239_v22  ;;  %v2465_v0 = vmul.f32 1.002, %v3546_v3 }
 0x2fb   : > { %v2241_v49 = vpop.f32.mrf.mxu1 }
 0x2fc   : > { %v2782_v23 = vmul.f32 -1.442695, %v2240_v7  ;;  %v2809_v41 = vadd.f32 -0.001, %v2465_v0 }
 0x2fd   : > { %v3548_v61 = vpop.eup %3547 }
 0x2fe   : > { %3555 = vpow2.f32 %v2782_v23  ;;  %v2544_v55 = vsel %vm5447_vm0, %v2809_v41, %v5589_v17  ;;  %v2372_v43 = vadd.f32 1.0, %v3548_v61 }
 0x2ff   : > { %v2244_v47 = vpop.f32.mrf.mxu1  ;;  %2577 = vst.msk [vmem:[%s5454_s30 + $0xc8] sm:$0xff] %vm2551_vm1, %v2544_v55 }
 0x300   : > { %v2245_v16 = vadd.f32 %v5350_v33, %v2244_v47  ;;  %v3550_v44 = vpop.eup %3549  ;;  %3557 = vrcp.f32 %v2372_v43 }
 0x301   : > { %v2246_v54 = vpop.f32.mrf.mxu1  ;;  %v2466_v8 = vmul.f32 1.002, %v3550_v44 }
 0x302   : > { %v2783_v40 = vmul.f32 -1.442695, %v2245_v16 }
 0x303   : > { %v2810_v52 = vadd.f32 -0.001, %v2466_v8 }
 0x304   : > { %v3552_v26 = vpop.eup %3551  ;;  %3559 = vpow2.f32 %v2783_v40 }
 0x305   : > { %v2373_v42 = vadd.f32 1.0, %v3552_v26  ;;  %v2545_v17 = vsel %vm5447_vm0, %v2810_v52, %v5593_v4 }
 0x306   : > { %v3554_v58 = vpop.eup %3553  ;;  %2578 = vst.msk [vmem:[%s5454_s30 + $0xd0] sm:$0xff] %vm2551_vm1, %v2545_v17 }
 0x307   : > { %3561 = vrcp.f32 %v2373_v42  ;;  %v2467_v33 = vmul.f32 1.002, %v3554_v58 }
 0x309   : > { %v2811_v25 = vadd.f32 -0.001, %v2467_v33 }
 0x30b   : > { %v3556_v53 = vpop.eup %3555  ;;  %v2546_v38 = vsel %vm5447_vm0, %v2811_v25, %v5605_v9 }
 0x30c   : > { %v2374_v30 = vadd.f32 1.0, %v3556_v53  ;;  %2579 = vst.msk [vmem:[%s5454_s30 + $0xd8] sm:$0xff] %vm2551_vm1, %v2546_v38 }
 0x30d   : > { %v3558_v34 = vpop.eup %3557 }
 0x30e   : > { %3563 = vrcp.f32 %v2374_v30  ;;  %v2468_v13 = vmul.f32 1.002, %v3558_v34 }
 0x310   : > { %v2812_v57 = vadd.f32 -0.001, %v2468_v13 }
 0x311   : > { %v3560_v4 = vpop.eup %3559 }
 0x312   : > { %v2375_v50 = vadd.f32 1.0, %v3560_v4  ;;  %v2547_v27 = vsel %vm5447_vm0, %v2812_v57, %v5616_v11 }
 0x313   : > { %2580 = vst.msk [vmem:[%s5454_s30 + $0xe0] sm:$0xff] %vm2551_vm1, %v2547_v27 }
 0x314   : > { %v3562_v36 = vpop.eup %3561  ;;  %3565 = vrcp.f32 %v2375_v50 }
 0x315   : > { %v2469_v60 = vmul.f32 1.002, %v3562_v36 }
 0x317   : > { %v2813_v9 = vadd.f32 -0.001, %v2469_v60 }
 0x319   : > { %v2548_v15 = vsel %vm5447_vm0, %v2813_v9, %v2235_v12 }
 0x31a   : > { %2581 = vst.msk [vmem:[%s5454_s30 + $0xe8] sm:$0xff] %vm2551_vm1, %v2548_v15 }
 0x31b   : > { %v3564_v14 = vpop.eup %3563 }
 0x31c   : > { %v2470_v51 = vmul.f32 1.002, %v3564_v14 }
 0x31e   : > { %v2814_v62 = vadd.f32 -0.001, %v2470_v51 }
 0x320   : > { %v2549_v48 = vsel %vm5447_vm0, %v2814_v62, %v2240_v7 }
 0x321   : > { %v3566_v32 = vpop.eup %3565  ;;  %2582 = vst.msk [vmem:[%s5454_s30 + $0xf0] sm:$0xff] %vm2551_vm1, %v2549_v48 }
 0x322   : > { %v2471_v1 = vmul.f32 1.002, %v3566_v32 }
 0x324   : > { %v2815_v5 = vadd.f32 -0.001, %v2471_v1 }
 0x326   : > { %v2550_v45 = vsel %vm5447_vm0, %v2815_v5, %v2245_v16 }
 0x327   : > { %2583 = vst.msk [vmem:[%s5454_s30 + $0xf8] sm:$0xff] %vm2551_vm1, %v2550_v45 }
 0x328 PF: > { %s18_s23 = sadd.s32 1, %s3645_s23   ;;  %s5824_s18 = smov %s3629_s19 }
 0x329   : > { %p15_p8 = scmp.ge.s32.totalorder %s18_s23, 4   ;;  %s5825_s19 = smov %s3633_s20 }
 0x32a   : > { %s5826_s20 = smov %s3726_s29  ;;  %s5827_s21 = smov %s3641_s22 }
 0x32b   : > { %s5828_s22 = smov %s5830_s25  ;;  %17 = sbr.rel (!%p15_p8) target bundleno = 4 (0x4), region = 82 }
 0x330   :  { %2614 = vsyncpa [#allocation3], 1 }
 0x331   :  { %2616 = vsyncpa [#allocation3 + $0x1], 1 }

</bundles_post_ra>
